<compile_context>
chip_gen: v7x
topology: tpu7x:2x2x1
jax: 0.10.0
libtpu: 0.0.40
codegen_flags: <defaults>
</compile_context>

<pallas_src>
import functools

import jax
import jax.numpy as jnp
from jax.experimental import pallas as pl
from jax.experimental.pallas import tpu as pltpu


# --------------------------- per-generation VMEM budget ----------------------

def _vmem_limit_bytes():
    """~3/4 of physical VMEM (v5e/v6e 128 MiB -> ~96 MiB, v7x 64 MiB -> 48 MiB)."""
    cap = 64 * 1024 * 1024
    try:
        cap = int(getattr(pltpu.get_tpu_info(), "vmem_capacity_bytes", cap))
    except Exception:
        pass
    return max(32 * 1024 * 1024, min(cap * 3 // 4, 112 * 1024 * 1024))


# ----------------------------- Pallas kernels --------------------------------

def _fused_conv_qkv_kernel(x_ref, wc_ref, wq_ref, bc_ref, bq_ref,
                           conv_ref, qkv_ref):
    # x: (tm, K) bf16 patch tile (loaded from HBM once, feeds both matmuls).
    x = x_ref[...]
    conv_ref[...] = (jnp.dot(x, wc_ref[...], preferred_element_type=jnp.float32)
                     + bc_ref[...])
    qkv = jnp.dot(x, wq_ref[...], preferred_element_type=jnp.float32) + bq_ref[...]
    qkv_ref[...] = qkv.astype(qkv_ref.dtype)          # qkv written directly as bf16


def fused_conv_qkv_gemm(patches, w_conv, w_qkv, b_conv, b_qkv, *, tm=128):
    """One pass over the (M, K) bf16 patch matrix producing
    conv columns (M, n_conv) f32 and qkv columns (M, 2dk+dv) bf16."""
    M, K = patches.shape
    n_conv = w_conv.shape[1]
    n_qkv = w_qkv.shape[1]
    Mp = pl.cdiv(M, tm) * tm
    x = patches if Mp == M else jnp.pad(patches, ((0, Mp - M), (0, 0)))

    conv_cols, qkv_cols = pl.pallas_call(
        _fused_conv_qkv_kernel,
        out_shape=(jax.ShapeDtypeStruct((Mp, n_conv), jnp.float32),
                   jax.ShapeDtypeStruct((Mp, n_qkv), jnp.bfloat16)),
        grid=(Mp // tm,),
        in_specs=[
            pl.BlockSpec((tm, K), lambda i: (i, 0)),
            pl.BlockSpec((K, n_conv), lambda i: (0, 0)),
            pl.BlockSpec((K, n_qkv), lambda i: (0, 0)),
            pl.BlockSpec((1, n_conv), lambda i: (0, 0)),
            pl.BlockSpec((1, n_qkv), lambda i: (0, 0)),
        ],
        out_specs=(pl.BlockSpec((tm, n_conv), lambda i: (i, 0)),
                   pl.BlockSpec((tm, n_qkv), lambda i: (i, 0))),
        compiler_params=pltpu.CompilerParams(
            dimension_semantics=("parallel",),
            vmem_limit_bytes=_vmem_limit_bytes()),
        # TODO(synk): add a K ("arbitrary") grid axis + f32 VMEM accumulator when
        # K = k*k*C_in grows large (keeps v7x's 64 MiB VMEM cap safe).
    )(x, w_conv, w_qkv, b_conv, b_qkv)
    if Mp != M:
        conv_cols, qkv_cols = conv_cols[:M], qkv_cols[:M]
    return conv_cols, qkv_cols


def _attention_kernel(qkv_ref, o_ref, *, nh, dk, dv):
    # qkv_ref: (1, HW, 2dk+dv) bf16 — GEMM-native channels-last slab for one batch.
    # o_ref:   (1, nh, HW, dvh) f32 — exactly torch's pre-reshape attn_out layout.
    dkh = dk // nh
    dvh = dv // nh
    for g in range(nh):                                   # small static head loop
        q = qkv_ref[0, :, g * dkh:(g + 1) * dkh]          # (HW, dkh), scale pre-folded
        k = qkv_ref[0, :, dk + g * dkh: dk + (g + 1) * dkh]
        v = qkv_ref[0, :, 2 * dk + g * dvh: 2 * dk + (g + 1) * dvh]   # (HW, dvh)
        # logits[i, j] = sum_d q[i, d] * k[j, d]
        logits = jnp.einsum('id,jd->ij', q, k,
                            preferred_element_type=jnp.float32)       # (HW, HW) f32
        m = jnp.max(logits, axis=-1, keepdims=True)
        p = jnp.exp(logits - m)                           # single-pass softmax
        l = jnp.sum(p, axis=-1, keepdims=True)
        w = p * pl.reciprocal(l, approx=True)             # divide on the EUP
        o_ref[0, g] = jnp.dot(w.astype(v.dtype), v,
                              preferred_element_type=jnp.float32)     # (HW, dvh)


def pallas_attention(qkv_rows, *, B, HW, nh, dk, dv):
    """qkv_rows: (B*HW, 2dk+dv) bf16 channels-last -> (B, nh, HW, dvh) f32."""
    dvh = dv // nh
    n_qkv = 2 * dk + dv
    qkv = qkv_rows.reshape(B, HW, n_qkv)                  # free row-major reshape
    # Single-pass softmax: per-head (HW, HW) f32 logits live in VMEM.
    # TODO(synk): add a kv-tiled flash-attention path when nh*HW*HW*4 bytes
    # exceeds the per-generation VMEM budget (large feature maps).
    assert 2 * HW * HW * 4 < _vmem_limit_bytes(), "HW too large for single-pass softmax"
    return pl.pallas_call(
        functools.partial(_attention_kernel, nh=nh, dk=dk, dv=dv),
        out_shape=jax.ShapeDtypeStruct((B, nh, HW, dvh), jnp.float32),
        grid=(B,),
        in_specs=[pl.BlockSpec((1, HW, n_qkv), lambda b: (b, 0, 0))],
        out_specs=pl.BlockSpec((1, nh, HW, dvh), lambda b: (b, 0, 0, 0)),
        compiler_params=pltpu.CompilerParams(
            dimension_semantics=("parallel",),
            vmem_limit_bytes=_vmem_limit_bytes()),
    )(qkv)


def _attn_proj_kernel(z_ref, w_ref, b_ref, o_ref):
    # z: (1, dv, HW) f32 channel-major; w: (dv_out, dv_in); b: (dv, 1).
    o_ref[0] = (jnp.dot(w_ref[...], z_ref[0], preferred_element_type=jnp.float32)
                + b_ref[...])                             # lane-dense over HW


def pallas_attn_proj(z, w_attn, b_attn):
    """1x1 conv (dv -> dv) as a per-batch channel GEMM. z: (B, dv, HW) f32."""
    B, dv, HW = z.shape
    return pl.pallas_call(
        _attn_proj_kernel,
        out_shape=jax.ShapeDtypeStruct((B, dv, HW), jnp.float32),
        grid=(B,),
        in_specs=[pl.BlockSpec((1, dv, HW), lambda b: (b, 0, 0)),
                  pl.BlockSpec((dv, dv), lambda b: (0, 0)),
                  pl.BlockSpec((dv, 1), lambda b: (0, 0))],
        out_specs=pl.BlockSpec((1, dv, HW), lambda b: (b, 0, 0)),
        compiler_params=pltpu.CompilerParams(
            dimension_semantics=("parallel",),
            vmem_limit_bytes=_vmem_limit_bytes()),
    )(z, w_attn, b_attn)


# ------------------------------ JAX glue --------------------------------------

def im2col(x_nchw, ksize):
    """NCHW -> (B*H*W, k*k*C) bf16 patch matrix, 'same' padding, stride 1.

    Patch columns ordered (kh, kw, c). PyTorch conv weights (C_out, C_in, kh, kw)
    import as w.permute(2, 3, 1, 0).reshape(k*k*C_in, C_out).
    """
    B, C, H, W = x_nchw.shape
    pad = (ksize - 1) // 2
    x = x_nchw.astype(jnp.bfloat16).transpose(0, 2, 3, 1)            # NHWC bf16
    xp = jnp.pad(x, ((0, 0), (pad, pad), (pad, pad), (0, 0)))
    cols = [xp[:, kh:kh + H, kw:kw + W, :]
            for kh in range(ksize) for kw in range(ksize)]           # (B, H, W, C) each
    patches = jnp.stack(cols, axis=3)                                # (B, H, W, k*k, C)
    # TODO(synk): for large inputs, replace materialized im2col with k*k
    # shifted-GEMM accumulation inside the tiled GEMM kernel (9x HBM saving).
    return patches.reshape(B * H * W, ksize * ksize * C)


def prepare_params(raw, dk, dv, nh):
    """Fold q *= dkh**-0.5 into qkv weight/bias columns; cast/reshape once."""
    dkh = dk // nh
    scale = float(dkh) ** -0.5
    w_qkv = raw["w_qkv"].at[:, :dk].multiply(scale)
    b_qkv = raw["b_qkv"].at[:dk].multiply(scale)
    return {
        "w_conv": raw["w_conv"].astype(jnp.bfloat16),                 # (K, n_conv)
        "b_conv": raw["b_conv"].astype(jnp.float32).reshape(1, -1),
        "w_qkv": w_qkv.astype(jnp.bfloat16),                          # (K, 2dk+dv)
        "b_qkv": b_qkv.astype(jnp.float32).reshape(1, -1),
        "w_attn": raw["w_attn"].astype(jnp.float32),                  # (dv_out, dv_in)
        "b_attn": raw["b_attn"].astype(jnp.float32).reshape(-1, 1),
    }


def attentive_conv_forward(x, params, *, k_size, dk, dv, nh, f_out):
    B, C_in, H, W = x.shape
    HW = H * W
    dvh = dv // nh
    n_conv = f_out - dv

    patches = im2col(x, k_size)                                       # (B*HW, k*k*C_in) bf16

    # One fused pass over the patch matrix: conv columns (f32) + qkv columns (bf16).
    conv_cols, qkv_cols = fused_conv_qkv_gemm(
        patches, params["w_conv"], params["w_qkv"],
        params["b_conv"], params["b_qkv"])

    # Multi-head attention directly on the GEMM-native channels-last layout.
    # Output matches torch's pre-reshape attn_out: (B, nh, HW, dvh).
    attn = pallas_attention(qkv_cols, B=B, HW=HW, nh=nh, dk=dk, dv=dv)

    # torch: reshape (B, nh, HW, dvh) -> (B, nh, dvh, H, W) -> combine_heads ->
    # (B, dv, H, W). Raw row-major reshapes (free), reproduced exactly.
    z = attn.reshape(B, nh, dvh, H, W).reshape(B, dv, HW)

    # 1x1 attn_out conv (dv -> dv), channel-major, lane-dense over HW.
    attn_out = pallas_attn_proj(z, params["w_attn"], params["b_attn"])    # (B, dv, HW)

    # Conv branch back to channel-major (tiny: n_conv channels).
    conv_out = conv_cols.reshape(B, HW, n_conv).transpose(0, 2, 1)        # (B, n_conv, HW)

    # TODO(synk): relative=True positional logits not implemented (module default relative=False).
    return jnp.concatenate([conv_out, attn_out], axis=1).reshape(B, f_out, H, W)


# -------------------------------- main ----------------------------------------

if __name__ == "__main__":
    # Module config: in_channels=4, out_channels=8, k_size=3, dk=8, dv=4, nh=2
    B, C_in, H, W = 2, 4, 16, 16
    f_out, k_size, dk, dv, nh = 8, 3, 8, 4, 2
    assert dk % nh == 0 and dv % nh == 0 and f_out > dv

    key = jax.random.PRNGKey(0)
    keys = jax.random.split(key, 6)
    x = jax.random.normal(keys[0], (B, C_in, H, W), jnp.float32)

    # Deterministic synthetic parameters, stored directly in GEMM layout:
    #   k x k conv (C_out, C_in, kh, kw) -> permute(2,3,1,0).reshape(k*k*C_in, C_out)
    #   1x1 conv (C_out, C_in, 1, 1)     -> reshape(C_out, C_in)   (w_attn)
    kk = k_size * k_size
    raw_params = {
        "w_conv": 0.1 * jax.random.normal(keys[1], (kk * C_in, f_out - dv), jnp.float32),
        "b_conv": 0.1 * jax.random.normal(keys[2], (f_out - dv,), jnp.float32),
        "w_qkv": 0.1 * jax.random.normal(keys[3], (kk * C_in, 2 * dk + dv), jnp.float32),
        "b_qkv": 0.1 * jax.random.normal(keys[4], (2 * dk + dv,), jnp.float32),
        "w_attn": 0.1 * jax.random.normal(keys[5], (dv, dv), jnp.float32),
        "b_attn": jnp.zeros((dv,), jnp.float32),
    }
    params = prepare_params(raw_params, dk, dv, nh)

    fwd = jax.jit(functools.partial(
        attentive_conv_forward, k_size=k_size, dk=dk, dv=dv, nh=nh, f_out=f_out))
    out = fwd(x, params)
    jax.block_until_ready(out)
    assert out.shape == (B, f_out, H, W), out.shape
    print("KERNEL_OK")
</pallas_src>

<mosaic_0001>
module attributes {stable_mosaic.version = 11 : i64} {
  func.func @_fused_conv_qkv_kernel(%arg0: i32, %arg1: memref<128x36xbf16, #tpu.memory_space<vmem>>, %arg2: memref<36x4xbf16, #tpu.memory_space<vmem>>, %arg3: memref<36x20xbf16, #tpu.memory_space<vmem>>, %arg4: memref<1x4xf32, #tpu.memory_space<vmem>>, %arg5: memref<1x20xf32, #tpu.memory_space<vmem>>, %arg6: memref<128x4xf32, #tpu.memory_space<vmem>>, %arg7: memref<128x20xbf16, #tpu.memory_space<vmem>>) attributes {dimension_semantics = [#tpu.dimension_semantics<parallel>], iteration_bounds = array<i64: 4>, scalar_prefetch = 0 : i64, scratch_operands = 0 : i64, tpu.core_type = #tpu.core_type<tc>, window_params = [{transform_indices = @transform_0, window_bounds = array<i64: 128, 36>}, {pipeline_mode = #tpu.pipeline_mode<synchronous>, transform_indices = @transform_1, window_bounds = array<i64: 36, 4>}, {pipeline_mode = #tpu.pipeline_mode<synchronous>, transform_indices = @transform_2, window_bounds = array<i64: 36, 20>}, {pipeline_mode = #tpu.pipeline_mode<synchronous>, transform_indices = @transform_3, window_bounds = array<i64: 1, 4>}, {pipeline_mode = #tpu.pipeline_mode<synchronous>, transform_indices = @transform_4, window_bounds = array<i64: 1, 20>}, {transform_indices = @transform_5, window_bounds = array<i64: 128, 4>}, {transform_indices = @transform_6, window_bounds = array<i64: 128, 20>}]} {
    %c0 = arith.constant 0 : index
    %c0_0 = arith.constant 0 : index
    %0 = vector.load %arg1[%c0, %c0_0] : memref<128x36xbf16, #tpu.memory_space<vmem>>, vector<128x36xbf16>
    %c0_1 = arith.constant 0 : index
    %c0_2 = arith.constant 0 : index
    %1 = vector.load %arg2[%c0_1, %c0_2] : memref<36x4xbf16, #tpu.memory_space<vmem>>, vector<36x4xbf16>
    %cst = arith.constant dense<0.000000e+00> : vector<128x4xf32>
    %2 = tpu.matmul %0, %1, %cst {dimension_numbers = #tpu.dot_dimension_numbers<[1], [0], [0], [1], [0, 0, 1, 1], [], []>} : vector<128x36xbf16>, vector<36x4xbf16>, vector<128x4xf32> -> vector<128x4xf32>
    %c0_3 = arith.constant 0 : index
    %c0_4 = arith.constant 0 : index
    %3 = vector.load %arg4[%c0_3, %c0_4] : memref<1x4xf32, #tpu.memory_space<vmem>>, vector<1x4xf32>
    %4 = vector.broadcast %3 : vector<1x4xf32> to vector<128x4xf32>
    %5 = arith.addf %2, %4 : vector<128x4xf32>
    %c0_5 = arith.constant 0 : index
    %c0_6 = arith.constant 0 : index
    %6 = vector.load %arg6[%c0_5, %c0_6] : memref<128x4xf32, #tpu.memory_space<vmem>>, vector<128x4xf32>
    tpu.vector_store %arg6[%c0_5, %c0_6], %5 {strides = array<i32>} : memref<128x4xf32, #tpu.memory_space<vmem>>, vector<128x4xf32>,
    %c0_7 = arith.constant 0 : index
    %c0_8 = arith.constant 0 : index
    %7 = vector.load %arg3[%c0_7, %c0_8] : memref<36x20xbf16, #tpu.memory_space<vmem>>, vector<36x20xbf16>
    %cst_9 = arith.constant dense<0.000000e+00> : vector<128x20xf32>
    %8 = tpu.matmul %0, %7, %cst_9 {dimension_numbers = #tpu.dot_dimension_numbers<[1], [0], [0], [1], [0, 0, 1, 1], [], []>} : vector<128x36xbf16>, vector<36x20xbf16>, vector<128x20xf32> -> vector<128x20xf32>
    %c0_10 = arith.constant 0 : index
    %c0_11 = arith.constant 0 : index
    %9 = vector.load %arg5[%c0_10, %c0_11] : memref<1x20xf32, #tpu.memory_space<vmem>>, vector<1x20xf32>
    %10 = vector.broadcast %9 : vector<1x20xf32> to vector<128x20xf32>
    %11 = arith.addf %8, %10 : vector<128x20xf32>
    %12 = arith.truncf %11 : vector<128x20xf32> to vector<128x20xbf16>
    %c0_12 = arith.constant 0 : index
    %c0_13 = arith.constant 0 : index
    %13 = vector.load %arg7[%c0_12, %c0_13] : memref<128x20xbf16, #tpu.memory_space<vmem>>, vector<128x20xbf16>
    tpu.vector_store %arg7[%c0_12, %c0_13], %12 {strides = array<i32>} : memref<128x20xbf16, #tpu.memory_space<vmem>>, vector<128x20xbf16>,
    return
  }
  func.func @transform_0(%arg0: i32) -> (i32, i32) {
    %c0_i32 = arith.constant 0 : i32
    %c0_i32_0 = arith.constant 0 : i32
    return %arg0, %c0_i32 : i32, i32
  }
  func.func @transform_1(%arg0: i32) -> (i32, i32) {
    %c0_i32 = arith.constant 0 : i32
    %c0_i32_0 = arith.constant 0 : i32
    %c0_i32_1 = arith.constant 0 : i32
    return %c0_i32, %c0_i32_0 : i32, i32
  }
  func.func @transform_2(%arg0: i32) -> (i32, i32) {
    %c0_i32 = arith.constant 0 : i32
    %c0_i32_0 = arith.constant 0 : i32
    %c0_i32_1 = arith.constant 0 : i32
    return %c0_i32, %c0_i32_0 : i32, i32
  }
  func.func @transform_3(%arg0: i32) -> (i32, i32) {
    %c0_i32 = arith.constant 0 : i32
    %c0_i32_0 = arith.constant 0 : i32
    %c0_i32_1 = arith.constant 0 : i32
    return %c0_i32, %c0_i32_0 : i32, i32
  }
  func.func @transform_4(%arg0: i32) -> (i32, i32) {
    %c0_i32 = arith.constant 0 : i32
    %c0_i32_0 = arith.constant 0 : i32
    %c0_i32_1 = arith.constant 0 : i32
    return %c0_i32, %c0_i32_0 : i32, i32
  }
  func.func @transform_5(%arg0: i32) -> (i32, i32) {
    %c0_i32 = arith.constant 0 : i32
    %c0_i32_0 = arith.constant 0 : i32
    return %arg0, %c0_i32 : i32, i32
  }
  func.func @transform_6(%arg0: i32) -> (i32, i32) {
    %c0_i32 = arith.constant 0 : i32
    %c0_i32_0 = arith.constant 0 : i32
    return %arg0, %c0_i32 : i32, i32
  }
}

module attributes {stable_mosaic.version = 11 : i64} {
  func.func @_attention_kernel(%arg0: i32, %arg1: memref<1x256x20xbf16, #tpu.memory_space<vmem>>, %arg2: memref<1x2x256x2xf32, #tpu.memory_space<vmem>>) attributes {dimension_semantics = [#tpu.dimension_semantics<parallel>], iteration_bounds = array<i64: 2>, scalar_prefetch = 0 : i64, scratch_operands = 0 : i64, tpu.core_type = #tpu.core_type<tc>, window_params = [{transform_indices = @transform_0, window_bounds = array<i64: 1, 256, 20>}, {transform_indices = @transform_1, window_bounds = array<i64: 1, 2, 256, 2>}]} {
    %c0 = arith.constant 0 : index
    %c0_0 = arith.constant 0 : index
    %c0_1 = arith.constant 0 : index
    %0 = vector.load %arg1[%c0, %c0_0, %c0_1] : memref<1x256x20xbf16, #tpu.memory_space<vmem>>, vector<1x256x4xbf16>
    %1 = vector.shape_cast %0 : vector<1x256x4xbf16> to vector<256x4xbf16>
    %c0_2 = arith.constant 0 : index
    %c0_3 = arith.constant 0 : index
    %c8 = arith.constant 8 : index
    %2 = vector.load %arg1[%c0_2, %c0_3, %c8] : memref<1x256x20xbf16, #tpu.memory_space<vmem>>, vector<1x256x4xbf16>
    %3 = vector.shape_cast %2 : vector<1x256x4xbf16> to vector<256x4xbf16>
    %c0_4 = arith.constant 0 : index
    %c0_5 = arith.constant 0 : index
    %c16 = arith.constant 16 : index
    %4 = vector.load %arg1[%c0_4, %c0_5, %c16] : memref<1x256x20xbf16, #tpu.memory_space<vmem>>, vector<1x256x2xbf16>
    %5 = vector.shape_cast %4 : vector<1x256x2xbf16> to vector<256x2xbf16>
    "tpu.trace_start"() <{level = 10 : i32, message = "id,jd->ij"}> : () -> ()
    %cst = arith.constant dense<0.000000e+00> : vector<256x256xf32>
    %6 = tpu.matmul %1, %3, %cst {dimension_numbers = #tpu.dot_dimension_numbers<[1], [1], [0], [0], [0, 0, 1, 0], [], []>} : vector<256x4xbf16>, vector<256x4xbf16>, vector<256x256xf32> -> vector<256x256xf32>
    "tpu.trace_stop"() : () -> ()
    %cst_6 = arith.constant dense<0xFF800000> : vector<256xf32>
    %7 = vector.multi_reduction <maximumf>, %6, %cst_6 [1] : vector<256x256xf32> to vector<256xf32>
    %8 = vector.shape_cast %7 : vector<256xf32> to vector<256x1xf32>
    %9 = vector.broadcast %8 : vector<256x1xf32> to vector<256x256xf32>
    %10 = arith.subf %6, %9 : vector<256x256xf32>
    %11 = math.exp %10 : vector<256x256xf32>
    %cst_7 = arith.constant dense<0.000000e+00> : vector<256xf32>
    %12 = vector.multi_reduction <add>, %11, %cst_7 [1] : vector<256x256xf32> to vector<256xf32>
    %13 = vector.shape_cast %12 : vector<256xf32> to vector<256x1xf32>
    %14 = tpu.reciprocal %13 {approx = true} : vector<256x1xf32> -> vector<256x1xf32>
    %15 = vector.broadcast %14 : vector<256x1xf32> to vector<256x256xf32>
    %16 = arith.mulf %11, %15 : vector<256x256xf32>
    %17 = arith.truncf %16 : vector<256x256xf32> to vector<256x256xbf16>
    %cst_8 = arith.constant dense<0.000000e+00> : vector<256x2xf32>
    %18 = tpu.matmul %17, %5, %cst_8 {dimension_numbers = #tpu.dot_dimension_numbers<[1], [0], [0], [1], [0, 0, 1, 1], [], []>} : vector<256x256xbf16>, vector<256x2xbf16>, vector<256x2xf32> -> vector<256x2xf32>
    %c0_9 = arith.constant 0 : index
    %c0_10 = arith.constant 0 : index
    %c0_11 = arith.constant 0 : index
    %c0_12 = arith.constant 0 : index
    %19 = vector.load %arg2[%c0_9, %c0_10, %c0_11, %c0_12] : memref<1x2x256x2xf32, #tpu.memory_space<vmem>>, vector<1x1x256x2xf32>
    %20 = vector.shape_cast %19 : vector<1x1x256x2xf32> to vector<256x2xf32>
    %21 = vector.shape_cast %18 : vector<256x2xf32> to vector<1x1x256x2xf32>
    tpu.vector_store %arg2[%c0_9, %c0_10, %c0_11, %c0_12], %21 {strides = array<i32>} : memref<1x2x256x2xf32, #tpu.memory_space<vmem>>, vector<1x1x256x2xf32>,
    %c0_13 = arith.constant 0 : index
    %c0_14 = arith.constant 0 : index
    %c4 = arith.constant 4 : index
    %22 = vector.load %arg1[%c0_13, %c0_14, %c4] : memref<1x256x20xbf16, #tpu.memory_space<vmem>>, vector<1x256x4xbf16>
    %23 = vector.shape_cast %22 : vector<1x256x4xbf16> to vector<256x4xbf16>
    %c0_15 = arith.constant 0 : index
    %c0_16 = arith.constant 0 : index
    %c12 = arith.constant 12 : index
    %24 = vector.load %arg1[%c0_15, %c0_16, %c12] : memref<1x256x20xbf16, #tpu.memory_space<vmem>>, vector<1x256x4xbf16>
    %25 = vector.shape_cast %24 : vector<1x256x4xbf16> to vector<256x4xbf16>
    %c0_17 = arith.constant 0 : index
    %c0_18 = arith.constant 0 : index
    %c18 = arith.constant 18 : index
    %26 = vector.load %arg1[%c0_17, %c0_18, %c18] : memref<1x256x20xbf16, #tpu.memory_space<vmem>>, vector<1x256x2xbf16>
    %27 = vector.shape_cast %26 : vector<1x256x2xbf16> to vector<256x2xbf16>
    "tpu.trace_start"() <{level = 10 : i32, message = "id,jd->ij"}> : () -> ()
    %cst_19 = arith.constant dense<0.000000e+00> : vector<256x256xf32>
    %28 = tpu.matmul %23, %25, %cst_19 {dimension_numbers = #tpu.dot_dimension_numbers<[1], [1], [0], [0], [0, 0, 1, 0], [], []>} : vector<256x4xbf16>, vector<256x4xbf16>, vector<256x256xf32> -> vector<256x256xf32>
    "tpu.trace_stop"() : () -> ()
    %cst_20 = arith.constant dense<0xFF800000> : vector<256xf32>
    %29 = vector.multi_reduction <maximumf>, %28, %cst_20 [1] : vector<256x256xf32> to vector<256xf32>
    %30 = vector.shape_cast %29 : vector<256xf32> to vector<256x1xf32>
    %31 = vector.broadcast %30 : vector<256x1xf32> to vector<256x256xf32>
    %32 = arith.subf %28, %31 : vector<256x256xf32>
    %33 = math.exp %32 : vector<256x256xf32>
    %cst_21 = arith.constant dense<0.000000e+00> : vector<256xf32>
    %34 = vector.multi_reduction <add>, %33, %cst_21 [1] : vector<256x256xf32> to vector<256xf32>
    %35 = vector.shape_cast %34 : vector<256xf32> to vector<256x1xf32>
    %36 = tpu.reciprocal %35 {approx = true} : vector<256x1xf32> -> vector<256x1xf32>
    %37 = vector.broadcast %36 : vector<256x1xf32> to vector<256x256xf32>
    %38 = arith.mulf %33, %37 : vector<256x256xf32>
    %39 = arith.truncf %38 : vector<256x256xf32> to vector<256x256xbf16>
    %cst_22 = arith.constant dense<0.000000e+00> : vector<256x2xf32>
    %40 = tpu.matmul %39, %27, %cst_22 {dimension_numbers = #tpu.dot_dimension_numbers<[1], [0], [0], [1], [0, 0, 1, 1], [], []>} : vector<256x256xbf16>, vector<256x2xbf16>, vector<256x2xf32> -> vector<256x2xf32>
    %c0_23 = arith.constant 0 : index
    %c1 = arith.constant 1 : index
    %c0_24 = arith.constant 0 : index
    %c0_25 = arith.constant 0 : index
    %41 = vector.load %arg2[%c0_23, %c1, %c0_24, %c0_25] : memref<1x2x256x2xf32, #tpu.memory_space<vmem>>, vector<1x1x256x2xf32>
    %42 = vector.shape_cast %41 : vector<1x1x256x2xf32> to vector<256x2xf32>
    %43 = vector.shape_cast %40 : vector<256x2xf32> to vector<1x1x256x2xf32>
    tpu.vector_store %arg2[%c0_23, %c1, %c0_24, %c0_25], %43 {strides = array<i32>} : memref<1x2x256x2xf32, #tpu.memory_space<vmem>>, vector<1x1x256x2xf32>,
    return
  }
  func.func @transform_0(%arg0: i32) -> (i32, i32, i32) {
    %c0_i32 = arith.constant 0 : i32
    %c0_i32_0 = arith.constant 0 : i32
    %c0_i32_1 = arith.constant 0 : i32
    return %arg0, %c0_i32, %c0_i32_0 : i32, i32, i32
  }
  func.func @transform_1(%arg0: i32) -> (i32, i32, i32, i32) {
    %c0_i32 = arith.constant 0 : i32
    %c0_i32_0 = arith.constant 0 : i32
    %c0_i32_1 = arith.constant 0 : i32
    %c0_i32_2 = arith.constant 0 : i32
    return %arg0, %c0_i32, %c0_i32_0, %c0_i32_1 : i32, i32, i32, i32
  }
}

module attributes {stable_mosaic.version = 11 : i64} {
  func.func @_attn_proj_kernel(%arg0: i32, %arg1: memref<1x4x256xf32, #tpu.memory_space<vmem>>, %arg2: memref<4x4xf32, #tpu.memory_space<vmem>>, %arg3: memref<4x1xf32, #tpu.memory_space<vmem>>, %arg4: memref<1x4x256xf32, #tpu.memory_space<vmem>>) attributes {dimension_semantics = [#tpu.dimension_semantics<parallel>], iteration_bounds = array<i64: 2>, scalar_prefetch = 0 : i64, scratch_operands = 0 : i64, tpu.core_type = #tpu.core_type<tc>, window_params = [{transform_indices = @transform_0, window_bounds = array<i64: 1, 4, 256>}, {pipeline_mode = #tpu.pipeline_mode<synchronous>, transform_indices = @transform_1, window_bounds = array<i64: 4, 4>}, {pipeline_mode = #tpu.pipeline_mode<synchronous>, transform_indices = @transform_2, window_bounds = array<i64: 4, 1>}, {transform_indices = @transform_3, window_bounds = array<i64: 1, 4, 256>}]} {
    %c0 = arith.constant 0 : index
    %c0_0 = arith.constant 0 : index
    %0 = vector.load %arg2[%c0, %c0_0] : memref<4x4xf32, #tpu.memory_space<vmem>>, vector<4x4xf32>
    %c0_1 = arith.constant 0 : index
    %c0_2 = arith.constant 0 : index
    %c0_3 = arith.constant 0 : index
    %1 = vector.load %arg1[%c0_1, %c0_2, %c0_3] : memref<1x4x256xf32, #tpu.memory_space<vmem>>, vector<1x4x256xf32>
    %2 = vector.shape_cast %1 : vector<1x4x256xf32> to vector<4x256xf32>
    %cst = arith.constant dense<0.000000e+00> : vector<4x256xf32>
    %3 = tpu.matmul %0, %2, %cst {dimension_numbers = #tpu.dot_dimension_numbers<[1], [0], [0], [1], [0, 0, 1, 1], [], []>} : vector<4x4xf32>, vector<4x256xf32>, vector<4x256xf32> -> vector<4x256xf32>
    %c0_4 = arith.constant 0 : index
    %c0_5 = arith.constant 0 : index
    %4 = vector.load %arg3[%c0_4, %c0_5] : memref<4x1xf32, #tpu.memory_space<vmem>>, vector<4x1xf32>
    %5 = vector.broadcast %4 : vector<4x1xf32> to vector<4x256xf32>
    %6 = arith.addf %3, %5 : vector<4x256xf32>
    %c0_6 = arith.constant 0 : index
    %c0_7 = arith.constant 0 : index
    %c0_8 = arith.constant 0 : index
    %7 = vector.load %arg4[%c0_6, %c0_7, %c0_8] : memref<1x4x256xf32, #tpu.memory_space<vmem>>, vector<1x4x256xf32>
    %8 = vector.shape_cast %7 : vector<1x4x256xf32> to vector<4x256xf32>
    %9 = vector.shape_cast %6 : vector<4x256xf32> to vector<1x4x256xf32>
    tpu.vector_store %arg4[%c0_6, %c0_7, %c0_8], %9 {strides = array<i32>} : memref<1x4x256xf32, #tpu.memory_space<vmem>>, vector<1x4x256xf32>,
    return
  }
  func.func @transform_0(%arg0: i32) -> (i32, i32, i32) {
    %c0_i32 = arith.constant 0 : i32
    %c0_i32_0 = arith.constant 0 : i32
    %c0_i32_1 = arith.constant 0 : i32
    return %arg0, %c0_i32, %c0_i32_0 : i32, i32, i32
  }
  func.func @transform_1(%arg0: i32) -> (i32, i32) {
    %c0_i32 = arith.constant 0 : i32
    %c0_i32_0 = arith.constant 0 : i32
    %c0_i32_1 = arith.constant 0 : i32
    return %c0_i32, %c0_i32_0 : i32, i32
  }
  func.func @transform_2(%arg0: i32) -> (i32, i32) {
    %c0_i32 = arith.constant 0 : i32
    %c0_i32_0 = arith.constant 0 : i32
    %c0_i32_1 = arith.constant 0 : i32
    return %c0_i32, %c0_i32_0 : i32, i32
  }
  func.func @transform_3(%arg0: i32) -> (i32, i32, i32) {
    %c0_i32 = arith.constant 0 : i32
    %c0_i32_0 = arith.constant 0 : i32
    %c0_i32_1 = arith.constant 0 : i32
    return %arg0, %c0_i32, %c0_i32_0 : i32, i32, i32
  }
}

</mosaic_0001>

<bundles_post_ra>
// kernel: attentive_conv_forward.3
= control target key start
LH: loop header
LB: loop body
LE: loop exit
PB: predicated region body
PF: predicated region fallthrough
CT: control target
= control target key end

     0   :  { %s1004_s21 = smov 0   ;;  %s1176_s0 = inlined_call_operand.vmem [shape: bf16[512,36], index: 0, kind: input, shape index: {}]   ;;  %s1177_s1 = inlined_call_operand.vmem [shape: bf16[36,4], index: 1, kind: input, shape index: {}]   ;;  %s1178_s2 = inlined_call_operand.vmem [shape: bf16[36,20], index: 2, kind: input, shape index: {}]   ;;  %s1179_s3 = inlined_call_operand.vmem [shape: f32[1,4], index: 3, kind: input, shape index: {}]   ;;  %s1180_s4 = inlined_call_operand.vmem [shape: f32[1,20], index: 4, kind: input, shape index: {}]   ;;  %s1181_s5 = inlined_call_operand.vmem [shape: f32[512,4], index: 5, kind: output, shape index: {0}]   ;;  %s1182_s6 = inlined_call_operand.vmem [shape: bf16[512,20], index: 6, kind: output, shape index: {1}]  }
   0x1 LB: > { %s794_s22 = sadd.s32 4294967295, %s967_s21   ;;  %p798_p0 = scmp.ge.s32.totalorder %s967_s21, 1  ;;  %s967_s21 = sphi %s1004_s21, %s17_s21  }
   0x2   : > { %p216_p1 = scmp.lt.s32.totalorder %s967_s21, 5 }
   0x4   : > { %p217_p2 = pnand %p798_p0, %p216_p1 }
   0x5   : > { %v947_v0 = vld [vmem:[%s1177_s1] sm:$0xff] (!%p217_p2)   ;;  %s799_s27 = sshll.u32 (!%p217_p2), %s794_s22, 4  ;;  %v949_v2 = vld [vmem:[%s1177_s1 + $0x8] sm:$0xff] (!%p217_p2)   ;;  %v951_v4 = vld [vmem:[%s1177_s1 + $0x10] ss:$0 sps:$4 sm:$0x33] (!%p217_p2)  }
   0x6   : > { %220 = sbr.rel (%p217_p2) target bundleno = 263 (0x107), region = 40  ;;  %v948_v1 = vld [vmem:[%s1178_s2] sm:$0xff] (!%p217_p2)   ;;  %893 = vmatprep.subr.bf16.mxu0 (!%p217_p2), %v947_v0  ;;  %p252_p3 = scmp.lt.s32.totalorder (!%p217_p2), %s799_s27, 63  ;;  %v950_v3 = vld [vmem:[%s1178_s2 + $0x8] sm:$0xff] (!%p217_p2)   ;;  %vm378_vm0 = vcmask (!%p217_p2), 1041408   ;;  %vm353_vm1 = vcmask (!%p217_p2), 293888  }
   0x7   : > { %915 = vmatprep.subr.bf16.mxu1 (!%p217_p2), %v948_v1  ;;  %894 = vmatpush3.bf16.msra.mxu0 (!%p217_p2), %v947_v0  ;;  %v952_v5 = vld [vmem:[%s1178_s2 + $0x10] ss:$0 sps:$4 sm:$0x33] (!%p217_p2)   ;;  %v380_v6 = vsel (!%p217_p2), %vm378_vm0, %v951_v4, 0  ;;  %v1058_v16 = vld [vmem:[%s1179_s3] ss:$0 sm:$0xff] (!%p217_p2) }
   0x8   : > { %916 = vmatpush3.bf16.msra.mxu1 (!%p217_p2), %v948_v1  ;;  %895 = vmatprep.subr.bf16.mxu0 (!%p217_p2), %v949_v2  ;;  %v524_v8 = vsel (!%p217_p2), %vm378_vm0, %v952_v5, 0  ;;  %v1063_v17 = vld [vmem:[%s1180_s4] ss:$0 sm:$0xff] (!%p217_p2)  ;;  %vm479_vm2 = vcmask (!%p217_p2), 31744   ;;  %vm687_vm3 = vcmask (!%p217_p2), 158720  }
   0x9   : > { %917 = vmatprep.subr.bf16.mxu1 (!%p217_p2), %v950_v3 }
   0xb   : > { %896 = vmatpush3.bf16.msra.mxu0 (!%p217_p2), %v949_v2 }
   0xc   : > { %918 = vmatpush3.bf16.msra.mxu1 (!%p217_p2), %v950_v3  ;;  %937 = vmatprep.subr.msk.bf16.mxu0 (!%p217_p2), %vm378_vm0, %v951_v4 }
   0xd   : > { %s1184_s27 = smov (!%p252_p3, %s799_s27), 63  ;;  %938 = vmatprep.subr.msk.bf16.mxu1 %vm378_vm0, %v952_v5 }
   0xe   : > { %s800_s12 = sshll.u32 %s1184_s27, 2  ;;  %s802_s16 = sshll.u32 %s1184_s27, 3 }
   0xf   : > { %s255_s15 = scalar_lea.vmem %s1176_s0, %s800_s12  ;;  %898 = vmatpush3.bf16.msra.mxu0 %v380_v6  ;;  %s1068_s24 = scalar_lea.vmem %s1181_s5, %s802_s16 }
  0x10   : > { %v953_v7 = vld [vmem:[%s255_s15] sm:$0xff]   ;;  %v954_v9 = vld [vmem:[%s255_s15 + $0x8] sm:$0xff]   ;;  %v955_v10 = vld [vmem:[%s255_s15 + $0x10] sm:$0xff]   ;;  %920 = vmatpush3.bf16.msra.mxu1 %v524_v8  ;;  %s1078_s28 = scalar_lea.vmem %s1182_s6, %s800_s12 }
  0x11   : > { %899 = vmatprep.mubr.msk.bf16.mxu0 %vm353_vm1, %v953_v7  ;;  %921 = vmatprep.mubr.msk.bf16.mxu1 %vm353_vm1, %v953_v7  ;;  %v956_v11 = vld [vmem:[%s255_s15 + $0x18] sm:$0xff]   ;;  %v957_v12 = vld [vmem:[%s255_s15 + $0x20] sm:$0xff]   ;;  %v958_v13 = vld [vmem:[%s255_s15 + $0x28] sm:$0xff]  }
  0x12   : > { %900 = vmatmul.mubr.msk.bf16.vlgmr.msra.gmra.mrb[0].mxu0 %vm353_vm1, %v954_v9  ;;  %v959_v14 = vld [vmem:[%s255_s15 + $0x30] sm:$0xff]   ;;  %v960_v15 = vld [vmem:[%s255_s15 + $0x38] sm:$0xff]  }
  0x13   : > { %922 = vmatmul.mubr.msk.bf16.vlgmr.msra.gmra.mrb[0].mxu1 %vm353_vm1, %v954_v9  ;;  %903 = vmatprep.mubr.msk.bf16.mxu0 %vm353_vm1, %v955_v10 }
  0x14   : > { %925 = vmatprep.mubr.msk.bf16.mxu1 %vm353_vm1, %v955_v10 }
  0x1a   : > { %904 = vmatmul.mubr.msk.bf16.gmra.mrb[4].mxu0 %vm353_vm1, %v956_v11 }
  0x1b   : > { %926 = vmatmul.mubr.msk.bf16.gmra.mrb[4].mxu1 %vm353_vm1, %v956_v11  ;;  %907 = vmatprep.mubr.msk.bf16.mxu0 %vm353_vm1, %v957_v12 }
  0x1c   : > { %929 = vmatprep.mubr.msk.bf16.mxu1 %vm353_vm1, %v957_v12 }
  0x22   : > { %908 = vmatmul.mubr.msk.bf16.gmra.mrb[8].mxu0 %vm353_vm1, %v958_v13 }
  0x23   : > { %930 = vmatmul.mubr.msk.bf16.gmra.mrb[8].mxu1 %vm353_vm1, %v958_v13  ;;  %911 = vmatprep.mubr.msk.bf16.mxu0 %vm353_vm1, %v959_v14 }
  0x24   : > { %933 = vmatprep.mubr.msk.bf16.mxu1 %vm353_vm1, %v959_v14 }
  0x2a   : > { %912 = vmatmul.mubr.msk.bf16.gmra.mrb[12].mxu0 %vm353_vm1, %v960_v15 }
  0x2b   : > { %934 = vmatmul.mubr.msk.bf16.gmra.mrb[12].mxu1 %vm353_vm1, %v960_v15 }
  0xe5   : > { %v901_v18 = vpop.f32.mrb[0].mxu0 }
  0xe6   : > { %v425_v19 = vadd.f32 %v901_v18, %v1058_v16  ;;  %v923_v20 = vpop.f32.mrb[0].mxu1  ;;  %v416_v21 = vpop.f32.mrb[1].mxu0 }
  0xe7   : > { %v569_v22 = vadd.f32 %v923_v20, %v1063_v17  ;;  %v417_v23 = vadd.f32 %v1058_v16, %v416_v21  ;;  %v560_v24 = vpop.f32.mrb[1].mxu1  ;;  %v902_v25 = vpop.f32.mrb[2].mxu0 }
  0xe8   : > { %482 = vst.msk [vmem:[%s1068_s24 + $0x10] sm:$0xff] %vm479_vm2, %v425_v19  ;;  %v561_v26 = vadd.f32 %v1063_v17, %v560_v24  ;;  %v428_v27 = vadd.f32 %v902_v25, %v1058_v16  ;;  %v924_v28 = vpop.f32.mrb[2].mxu1  ;;  %v419_v29 = vpop.f32.mrb[3].mxu0 }
  0xe9   : > { %v857_v30 = vpack.c.bf16 %v569_v22, %v569_v22  ;;  %480 = vst.msk [vmem:[%s1068_s24] sm:$0xff] %vm479_vm2, %v417_v23  ;;  %v572_v31 = vadd.f32 %v924_v28, %v1063_v17  ;;  %v420_v32 = vadd.f32 %v1058_v16, %v419_v29  ;;  %v563_v33 = vpop.f32.mrb[3].mxu1 }
  0xea   : > { %v855_v34 = vpack.c.bf16 %v561_v26, %v561_v26  ;;  %483 = vst.msk [vmem:[%s1068_s24 + $0x18] sm:$0xff] %vm479_vm2, %v428_v27  ;;  %v564_v35 = vadd.f32 %v1063_v17, %v563_v33 }
  0xeb   : > { %690 = vst.msk [vmem:[%s1078_s28 + $0x8] sm:$0xf] %vm687_vm3, %v857_v30  ;;  %v858_v36 = vpack.c.bf16 %v572_v31, %v572_v31 }
  0xec   : > { %481 = vst.msk [vmem:[%s1068_s24 + $0x8] sm:$0xff] %vm479_vm2, %v420_v32  ;;  %v856_v37 = vpack.c.bf16 %v564_v35, %v564_v35 }
  0xed   : > { %688 = vst.msk [vmem:[%s1078_s28] sm:$0xf] %vm687_vm3, %v855_v34  ;;  %691 = vst.msk [vmem:[%s1078_s28 + $0xc] sm:$0xf] %vm687_vm3, %v858_v36  ;;  %v905_v38 = vpop.f32.mrb[4].mxu0 }
  0xee   : > { %689 = vst.msk [vmem:[%s1078_s28 + $0x4] sm:$0xf] %vm687_vm3, %v856_v37  ;;  %v441_v39 = vadd.f32 %v905_v38, %v1058_v16  ;;  %v927_v40 = vpop.f32.mrb[4].mxu1  ;;  %v432_v41 = vpop.f32.mrb[5].mxu0 }
  0xef   : > { %v585_v42 = vadd.f32 %v927_v40, %v1063_v17  ;;  %v433_v43 = vadd.f32 %v1058_v16, %v432_v41  ;;  %v576_v44 = vpop.f32.mrb[5].mxu1  ;;  %v906_v45 = vpop.f32.mrb[6].mxu0 }
  0xf0   : > { %486 = vst.msk [vmem:[%s1068_s24 + $0x30] sm:$0xff] %vm479_vm2, %v441_v39  ;;  %v577_v46 = vadd.f32 %v1063_v17, %v576_v44  ;;  %v444_v47 = vadd.f32 %v906_v45, %v1058_v16  ;;  %v928_v48 = vpop.f32.mrb[6].mxu1  ;;  %v435_v49 = vpop.f32.mrb[7].mxu0 }
  0xf1   : > { %v861_v50 = vpack.c.bf16 %v585_v42, %v585_v42  ;;  %484 = vst.msk [vmem:[%s1068_s24 + $0x20] sm:$0xff] %vm479_vm2, %v433_v43  ;;  %v588_v51 = vadd.f32 %v928_v48, %v1063_v17  ;;  %v436_v52 = vadd.f32 %v1058_v16, %v435_v49  ;;  %v579_v53 = vpop.f32.mrb[7].mxu1 }
  0xf2   : > { %v859_v54 = vpack.c.bf16 %v577_v46, %v577_v46  ;;  %487 = vst.msk [vmem:[%s1068_s24 + $0x38] sm:$0xff] %vm479_vm2, %v444_v47  ;;  %v580_v55 = vadd.f32 %v1063_v17, %v579_v53 }
  0xf3   : > { %694 = vst.msk [vmem:[%s1078_s28 + $0x18] sm:$0xf] %vm687_vm3, %v861_v50  ;;  %v862_v56 = vpack.c.bf16 %v588_v51, %v588_v51 }
  0xf4   : > { %485 = vst.msk [vmem:[%s1068_s24 + $0x28] sm:$0xff] %vm479_vm2, %v436_v52  ;;  %v860_v57 = vpack.c.bf16 %v580_v55, %v580_v55 }
  0xf5   : > { %692 = vst.msk [vmem:[%s1078_s28 + $0x10] sm:$0xf] %vm687_vm3, %v859_v54  ;;  %695 = vst.msk [vmem:[%s1078_s28 + $0x1c] sm:$0xf] %vm687_vm3, %v862_v56  ;;  %v909_v58 = vpop.f32.mrb[8].mxu0 }
  0xf6   : > { %693 = vst.msk [vmem:[%s1078_s28 + $0x14] sm:$0xf] %vm687_vm3, %v860_v57  ;;  %v457_v59 = vadd.f32 %v909_v58, %v1058_v16  ;;  %v931_v60 = vpop.f32.mrb[8].mxu1  ;;  %v448_v61 = vpop.f32.mrb[9].mxu0 }
  0xf7   : > { %v601_v62 = vadd.f32 %v931_v60, %v1063_v17  ;;  %v449_v63 = vadd.f32 %v1058_v16, %v448_v61  ;;  %v592_v0 = vpop.f32.mrb[9].mxu1  ;;  %v910_v1 = vpop.f32.mrb[10].mxu0 }
  0xf8   : > { %490 = vst.msk [vmem:[%s1068_s24 + $0x50] sm:$0xff] %vm479_vm2, %v457_v59  ;;  %v593_v2 = vadd.f32 %v1063_v17, %v592_v0  ;;  %v460_v3 = vadd.f32 %v910_v1, %v1058_v16  ;;  %v932_v4 = vpop.f32.mrb[10].mxu1  ;;  %v451_v5 = vpop.f32.mrb[11].mxu0 }
  0xf9   : > { %v865_v6 = vpack.c.bf16 %v601_v62, %v601_v62  ;;  %488 = vst.msk [vmem:[%s1068_s24 + $0x40] sm:$0xff] %vm479_vm2, %v449_v63  ;;  %v604_v7 = vadd.f32 %v932_v4, %v1063_v17  ;;  %v452_v8 = vadd.f32 %v1058_v16, %v451_v5  ;;  %v595_v9 = vpop.f32.mrb[11].mxu1 }
  0xfa   : > { %v863_v10 = vpack.c.bf16 %v593_v2, %v593_v2  ;;  %491 = vst.msk [vmem:[%s1068_s24 + $0x58] sm:$0xff] %vm479_vm2, %v460_v3  ;;  %v596_v11 = vadd.f32 %v1063_v17, %v595_v9 }
  0xfb   : > { %698 = vst.msk [vmem:[%s1078_s28 + $0x28] sm:$0xf] %vm687_vm3, %v865_v6  ;;  %v866_v12 = vpack.c.bf16 %v604_v7, %v604_v7 }
  0xfc   : > { %489 = vst.msk [vmem:[%s1068_s24 + $0x48] sm:$0xff] %vm479_vm2, %v452_v8  ;;  %v864_v13 = vpack.c.bf16 %v596_v11, %v596_v11 }
  0xfd   : > { %696 = vst.msk [vmem:[%s1078_s28 + $0x20] sm:$0xf] %vm687_vm3, %v863_v10  ;;  %699 = vst.msk [vmem:[%s1078_s28 + $0x2c] sm:$0xf] %vm687_vm3, %v866_v12  ;;  %v913_v14 = vpop.f32.mrb[12].mxu0 }
  0xfe   : > { %697 = vst.msk [vmem:[%s1078_s28 + $0x24] sm:$0xf] %vm687_vm3, %v864_v13  ;;  %v473_v15 = vadd.f32 %v913_v14, %v1058_v16  ;;  %v935_v18 = vpop.f32.mrb[12].mxu1  ;;  %v464_v19 = vpop.f32.mrb[13].mxu0 }
  0xff   : > { %v617_v20 = vadd.f32 %v935_v18, %v1063_v17  ;;  %v465_v21 = vadd.f32 %v1058_v16, %v464_v19  ;;  %v608_v22 = vpop.f32.mrb[13].mxu1  ;;  %v914_v23 = vpop.f32.mrb[14].mxu0 }
 0x100   : > { %494 = vst.msk [vmem:[%s1068_s24 + $0x70] sm:$0xff] %vm479_vm2, %v473_v15  ;;  %v609_v24 = vadd.f32 %v1063_v17, %v608_v22  ;;  %v476_v25 = vadd.f32 %v914_v23, %v1058_v16  ;;  %v936_v26 = vpop.f32.mrb[14].mxu1  ;;  %v467_v27 = vpop.f32.mrb[15].mxu0 }
 0x101   : > { %v869_v28 = vpack.c.bf16 %v617_v20, %v617_v20  ;;  %492 = vst.msk [vmem:[%s1068_s24 + $0x60] sm:$0xff] %vm479_vm2, %v465_v21  ;;  %v620_v29 = vadd.f32 %v936_v26, %v1063_v17  ;;  %v468_v30 = vadd.f32 %v1058_v16, %v467_v27  ;;  %v611_v31 = vpop.f32.mrb[15].mxu1 }
 0x102   : > { %v867_v32 = vpack.c.bf16 %v609_v24, %v609_v24  ;;  %495 = vst.msk [vmem:[%s1068_s24 + $0x78] sm:$0xff] %vm479_vm2, %v476_v25  ;;  %v612_v33 = vadd.f32 %v1063_v17, %v611_v31 }
 0x103   : > { %702 = vst.msk [vmem:[%s1078_s28 + $0x38] sm:$0xf] %vm687_vm3, %v869_v28  ;;  %v870_v34 = vpack.c.bf16 %v620_v29, %v620_v29 }
 0x104   : > { %493 = vst.msk [vmem:[%s1068_s24 + $0x68] sm:$0xff] %vm479_vm2, %v468_v30  ;;  %v868_v35 = vpack.c.bf16 %v612_v33, %v612_v33 }
 0x105   : > { %700 = vst.msk [vmem:[%s1078_s28 + $0x30] sm:$0xf] %vm687_vm3, %v867_v32  ;;  %703 = vst.msk [vmem:[%s1078_s28 + $0x3c] sm:$0xf] %vm687_vm3, %v870_v34 }
 0x106   : > { %701 = vst.msk [vmem:[%s1078_s28 + $0x34] sm:$0xf] %vm687_vm3, %v868_v35 }
 0x107 PF: > { %s17_s21 = sadd.s32 1, %s967_s21  }
 0x108   : > { %p14_p4 = scmp.ge.s32.totalorder %s17_s21, 6  }
 0x10a   :  { %16 = sbr.rel (!%p14_p4) target bundleno = 1 (0x1), region = 82 }

// kernel: attentive_conv_forward.4
= control target key start
LH: loop header
LB: loop body
LE: loop exit
PB: predicated region body
PF: predicated region fallthrough
CT: control target
= control target key end

     0   :  { %s3507_s6 = smov 0   ;;  %s5106_s0 = inlined_call_operand.vmem [shape: bf16[2,256,20], index: 0, kind: input, shape index: {}]   ;;  %s5107_s1 = inlined_call_operand.vmem [shape: f32[2,2,256,2], index: 1, kind: output, shape index: {}]  }
   0x1 LB: > { %s2580_s7 = sadd.s32 4294967295, %s3490_s6   ;;  %p2584_p0 = scmp.ge.s32.totalorder %s3490_s6, 1  ;;  %s3490_s6 = sphi %s3507_s6, %s11_s6  }
   0x2   : > { %p87_p1 = scmp.lt.s32.totalorder %s3490_s6, 3 }
   0x4   : > { %p88_p2 = pnand %p2584_p0, %p87_p1 }
   0x6   : > { %91 = sbr.rel (%p88_p2) target bundleno = 1815 (0x717), region = 24 }
   0xd   : > { %p107_p3 = scmp.lt.s32.totalorder %s2580_s7, 1  ;;  %vm262_vm0 = vcmask 31744   ;;  %s3492_s12 = smov 120   ;;  %vm1273_vm1 = vcmask 15360  }
   0xe   : > { %s3493_s13 = smov 112   ;;  %s3494_s14 = smov 116  }
   0xf   : > { %s5305_s7 = smov (!%p107_p3, %s2580_s7), 1  ;;  %s3495_s15 = smov 124  }
  0x10   : > { %s2687_s8 = sshll.u32 %s5305_s7, 7  ;;  %s3496_s16 = smov 110  }
  0x11   : > { %s3521_s11 = scalar_lea.vmem %s5106_s0, %s2687_s8  ;;  %s2688_s17 = sshll.u32 %s5305_s7, 9 }
  0x12   : > { %v3524_v0 = vld [vmem:[%s3521_s11] sm:$0xff]   ;;  %v3532_v2 = vld [vmem:[%s3521_s11 + $0x8] sm:$0xff]   ;;  %v3544_v4 = vld [vmem:[%s3521_s11 + $0x10] sm:$0xff]   ;;  %s4398_s20 = scalar_lea.vmem %s5107_s1, %s2688_s17 }
  0x13   : > { %v3527_v1 = vld [vmem:[%s3521_s11 + $0x40] sm:$0xff]   ;;  %230 = vrot.lane.b32.xlu0 %v3524_v0, %s3492_s12  ;;  %2705 = vmatprep.mubr.msk.bf16.mxu0 %vm262_vm0, %v3524_v0  ;;  %v3539_v3 = vld [vmem:[%s3521_s11 + $0x48] sm:$0xff]   ;;  %v3549_v5 = vld [vmem:[%s3521_s11 + $0x50] sm:$0xff]  }
  0x14   : > { %232 = vrot.lane.b32.xlu1 %v3532_v2, %s3492_s12  ;;  %v3554_v6 = vld [vmem:[%s3521_s11 + $0x18] sm:$0xff]   ;;  %v3564_v8 = vld [vmem:[%s3521_s11 + $0x20] sm:$0xff]   ;;  %v3572_v10 = vld [vmem:[%s3521_s11 + $0x28] sm:$0xff]  }
  0x15   : > { %v3559_v7 = vld [vmem:[%s3521_s11 + $0x58] sm:$0xff]   ;;  %v3567_v9 = vld [vmem:[%s3521_s11 + $0x60] sm:$0xff]   ;;  %v3577_v11 = vld [vmem:[%s3521_s11 + $0x68] sm:$0xff]  }
  0x16   : > { %v3582_v12 = vld [vmem:[%s3521_s11 + $0x30] sm:$0xff]   ;;  %v3594_v14 = vld [vmem:[%s3521_s11 + $0x38] sm:$0xff]   ;;  %v3072_v40 = vld [vmem:[%s3521_s11 + $0x40] sm:$0xff]  }
  0x17   : > { %246 = vrot.lane.b32.xlu0 %v3527_v1, %s3492_s12  ;;  %v3587_v13 = vld [vmem:[%s3521_s11 + $0x70] sm:$0xff]   ;;  %v3599_v15 = vld [vmem:[%s3521_s11 + $0x78] sm:$0xff]   ;;  %v3074_v41 = vld [vmem:[%s3521_s11 + $0x48] sm:$0xff]  }
  0x18   : > { %248 = vrot.lane.b32.xlu1 %v3539_v3, %s3492_s12  ;;  %v3076_v42 = vld [vmem:[%s3521_s11 + $0x50] sm:$0xff]   ;;  %v3078_v43 = vld [vmem:[%s3521_s11 + $0x58] sm:$0xff]   ;;  %v3070_v44 = vld [vmem:[%s3521_s11] sm:$0xff]  }
  0x19   : > { %v3071_v45 = vld [vmem:[%s3521_s11 + $0x8] sm:$0xff]   ;;  %v3073_v46 = vld [vmem:[%s3521_s11 + $0x10] sm:$0xff]   ;;  %v3075_v47 = vld [vmem:[%s3521_s11 + $0x18] sm:$0xff]  }
  0x1a   : > { %v3077_v48 = vld [vmem:[%s3521_s11 + $0x20] sm:$0xff]  }
  0x1b   : > { %234 = vrot.lane.b32.xlu0 %v3544_v4, %s3492_s12 }
  0x1c   : > { %250 = vrot.lane.b32.xlu1 %v3549_v5, %s3492_s12 }
  0x1f   : > { %236 = vrot.lane.b32.xlu0 %v3554_v6, %s3492_s12 }
  0x20   : > { %252 = vrot.lane.b32.xlu1 %v3559_v7, %s3492_s12 }
  0x23   : > { %238 = vrot.lane.b32.xlu0 %v3564_v8, %s3492_s12 }
  0x24   : > { %254 = vrot.lane.b32.xlu1 %v3567_v9, %s3492_s12 }
  0x27   : > { %240 = vrot.lane.b32.xlu0 %v3572_v10, %s3492_s12 }
  0x28   : > { %256 = vrot.lane.b32.xlu1 %v3577_v11, %s3492_s12 }
  0x2b   : > { %242 = vrot.lane.b32.xlu0 %v3582_v12, %s3492_s12 }
  0x2c   : > { %258 = vrot.lane.b32.xlu1 %v3587_v13, %s3492_s12 }
  0x2f   : > { %244 = vrot.lane.b32.xlu0 %v3594_v14, %s3492_s12 }
  0x30   : > { %260 = vrot.lane.b32.xlu1 %v3599_v15, %s3492_s12 }
  0x33   : > { %1064 = vrot.lane.b32.xlu0 %v3524_v0, %s3493_s13 }
  0x34   : > { %1080 = vrot.lane.b32.xlu1 %v3527_v1, %s3493_s13 }
  0x37   : > { %1066 = vrot.lane.b32.xlu0 %v3532_v2, %s3493_s13 }
  0x38   : > { %1082 = vrot.lane.b32.xlu1 %v3539_v3, %s3493_s13 }
  0x3b   : > { %1086 = vrot.lane.b32.xlu0 %v3559_v7, %s3493_s13 }
  0x3c   : > { %1084 = vrot.lane.b32.xlu1 %v3549_v5, %s3493_s13 }
  0x3f   : > { %1090 = vrot.lane.b32.xlu0 %v3577_v11, %s3493_s13 }
  0x40   : > { %1068 = vrot.lane.b32.xlu1 %v3544_v4, %s3493_s13 }
  0x43   : > { %1094 = vrot.lane.b32.xlu0 %v3599_v15, %s3493_s13 }
  0x44   : > { %1070 = vrot.lane.b32.xlu1 %v3554_v6, %s3493_s13 }
  0x47   : > { %1466 = vrot.lane.b32.xlu0 %v3072_v40, %s3494_s14 }
  0x48   : > { %1088 = vrot.lane.b32.xlu1 %v3567_v9, %s3493_s13 }
  0x4b   : > { %1468 = vrot.lane.b32.xlu0 %v3074_v41, %s3494_s14 }
  0x4c   : > { %1072 = vrot.lane.b32.xlu1 %v3564_v8, %s3493_s13 }
  0x4f   : > { %1470 = vrot.lane.b32.xlu0 %v3076_v42, %s3494_s14 }
  0x50   : > { %1074 = vrot.lane.b32.xlu1 %v3572_v10, %s3493_s13 }
  0x53   : > { %1472 = vrot.lane.b32.xlu0 %v3078_v43, %s3494_s14 }
  0x54   : > { %1092 = vrot.lane.b32.xlu1 %v3587_v13, %s3493_s13 }
  0x58   : > { %1076 = vrot.lane.b32.xlu1 %v3582_v12, %s3493_s13 }
  0x5c   : > { %1078 = vrot.lane.b32.xlu1 %v3594_v14, %s3493_s13 }
  0x60   : > { %1450 = vrot.lane.b32.xlu1 %v3070_v44, %s3494_s14 }
  0x64   : > { %1452 = vrot.lane.b32.xlu1 %v3071_v45, %s3494_s14 }
  0x68   : > { %1454 = vrot.lane.b32.xlu1 %v3073_v46, %s3494_s14 }
  0x6c   : > { %1456 = vrot.lane.b32.xlu1 %v3075_v47, %s3494_s14 }
  0x70   : > { %1458 = vrot.lane.b32.xlu1 %v3077_v48, %s3494_s14 }
  0x85   : > { %v231_v16 = vpop.permute.xlu0 %230 }
  0x86   : > { %v233_v17 = vpop.permute.xlu1 %232  ;;  %v312_v19 = vsel %vm262_vm0, %v231_v16, 0 }
  0x87   : > { %v315_v22 = vsel %vm262_vm0, %v233_v17, 0 }
  0x89   : > { %v247_v18 = vpop.permute.xlu0 %246 }
  0x8a   : > { %3025 = vmatprep.subr.msk.bf16.mxu0 %vm262_vm0, %v247_v18  ;;  %v249_v20 = vpop.permute.xlu1 %248 }
  0x8b   : > { %2690 = vmatpush3.bf16.xpose.msra.mxu0 %v312_v19 }
  0x8c   : > { %3026 = vmatprep.subr.msk.bf16.mxu0 %vm262_vm0, %v249_v20 }
  0x8d   : > { %v235_v23 = vpop.permute.xlu0 %234 }
  0x8e   : > { %v251_v21 = vpop.permute.xlu1 %250  ;;  %v318_v24 = vsel %vm262_vm0, %v235_v23, 0 }
  0x91   : > { %v237_v26 = vpop.permute.xlu0 %236 }
  0x92   : > { %v253_v25 = vpop.permute.xlu1 %252  ;;  %v321_v27 = vsel %vm262_vm0, %v237_v26, 0 }
  0x93   : > { %2692 = vmatpush3.bf16.xpose.msra.mxu0 %v315_v22 }
  0x94   : > { %3027 = vmatprep.subr.msk.bf16.mxu0 %vm262_vm0, %v251_v21 }
  0x95   : > { %v239_v29 = vpop.permute.xlu0 %238 }
  0x96   : > { %v255_v28 = vpop.permute.xlu1 %254  ;;  %v324_v30 = vsel %vm262_vm0, %v239_v29, 0 }
  0x99   : > { %v241_v32 = vpop.permute.xlu0 %240 }
  0x9a   : > { %v257_v31 = vpop.permute.xlu1 %256  ;;  %v327_v33 = vsel %vm262_vm0, %v241_v32, 0 }
  0x9b   : > { %2694 = vmatpush3.bf16.xpose.msra.mxu0 %v318_v24 }
  0x9c   : > { %3028 = vmatprep.subr.msk.bf16.mxu0 %vm262_vm0, %v253_v25 }
  0x9d   : > { %v243_v35 = vpop.permute.xlu0 %242 }
  0x9e   : > { %v259_v34 = vpop.permute.xlu1 %258  ;;  %v330_v36 = vsel %vm262_vm0, %v243_v35, 0 }
  0xa1   : > { %v245_v38 = vpop.permute.xlu0 %244 }
  0xa2   : > { %v261_v37 = vpop.permute.xlu1 %260  ;;  %v333_v39 = vsel %vm262_vm0, %v245_v38, 0 }
  0xa3   : > { %2696 = vmatpush3.bf16.xpose.msra.mxu0 %v321_v27 }
  0xa4   : > { %3029 = vmatprep.subr.msk.bf16.mxu0 %vm262_vm0, %v255_v28 }
  0xa5   : > { %v1065_v50 = vpop.permute.xlu0 %1064 }
  0xa6   : > { %v1081_v49 = vpop.permute.xlu1 %1080 }
  0xa7   : > { %2737 = vmatprep.subr.bf16.mxu1 %v1081_v49 }
  0xa8   : > { %2738 = vmatpush3.bf16.msra.mxu1 %v1065_v50 }
  0xa9   : > { %v1067_v52 = vpop.permute.xlu0 %1066 }
  0xaa   : > { %v1083_v51 = vpop.permute.xlu1 %1082 }
  0xab   : > { %2698 = vmatpush3.bf16.xpose.msra.mxu0 %v324_v30  ;;  %2739 = vmatprep.subr.bf16.mxu1 %v1083_v51 }
  0xac   : > { %3030 = vmatprep.subr.msk.bf16.mxu0 %vm262_vm0, %v257_v31  ;;  %2740 = vmatpush3.bf16.msra.mxu1 %v1067_v52 }
  0xad   : > { %v1087_v55 = vpop.permute.xlu0 %1086 }
  0xae   : > { %v1085_v53 = vpop.permute.xlu1 %1084 }
  0xaf   : > { %2741 = vmatprep.subr.bf16.mxu1 %v1085_v53 }
  0xb1   : > { %v1091_v59 = vpop.permute.xlu0 %1090 }
  0xb2   : > { %v1069_v54 = vpop.permute.xlu1 %1068 }
  0xb3   : > { %2700 = vmatpush3.bf16.xpose.msra.mxu0 %v327_v33  ;;  %2742 = vmatpush3.bf16.msra.mxu1 %v1069_v54 }
  0xb4   : > { %3031 = vmatprep.subr.msk.bf16.mxu0 %vm262_vm0, %v259_v34  ;;  %2743 = vmatprep.subr.bf16.mxu1 %v1087_v55 }
  0xb5   : > { %v1095_v63 = vpop.permute.xlu0 %1094 }
  0xb6   : > { %v1071_v56 = vpop.permute.xlu1 %1070 }
  0xb7   : > { %2744 = vmatpush3.bf16.msra.mxu1 %v1071_v56 }
  0xba   : > { %v1089_v57 = vpop.permute.xlu1 %1088 }
  0xbb   : > { %2702 = vmatpush3.bf16.xpose.msra.mxu0 %v330_v36  ;;  %2745 = vmatprep.subr.bf16.mxu1 %v1089_v57 }
  0xbc   : > { %3032 = vmatprep.subr.msk.bf16.mxu0 %vm262_vm0, %v261_v37 }
  0xbe   : > { %v1073_v58 = vpop.permute.xlu1 %1072 }
  0xbf   : > { %2746 = vmatpush3.bf16.msra.mxu1 %v1073_v58 }
  0xc0   : > { %2747 = vmatprep.subr.bf16.mxu1 %v1091_v59 }
  0xc2   : > { %v1075_v60 = vpop.permute.xlu1 %1074 }
  0xc3   : > { %2704 = vmatpush3.bf16.xpose.msra.mxu0 %v333_v39  ;;  %2748 = vmatpush3.bf16.msra.mxu1 %v1075_v60 }
  0xc6   : > { %v1093_v61 = vpop.permute.xlu1 %1092 }
  0xc7   : > { %2749 = vmatprep.subr.bf16.mxu1 %v1093_v61 }
  0xca   : > { %2706 = vmatmul.mubr.msk.bf16.vlgmr.msra.gmra.mrb[0].mxu0 %vm262_vm0, %v3524_v0  ;;  %v1077_v62 = vpop.permute.xlu1 %1076 }
  0xcb   : > { %2707 = vmatprep.mubr.msk.bf16.mxu0 %vm262_vm0, %v3532_v2  ;;  %2750 = vmatpush3.bf16.msra.mxu1 %v1077_v62 }
  0xcc   : > { %2751 = vmatprep.subr.bf16.mxu1 %v1095_v63 }
  0xce   : > { %v1079_v0 = vpop.permute.xlu1 %1078 }
  0xcf   : > { %2752 = vmatpush3.bf16.msra.mxu1 %v1079_v0 }
  0xd2   : > { %2708 = vmatmul.mubr.msk.bf16.gmra.mrb[4].mxu0 %vm262_vm0, %v3532_v2 }
  0xd3   : > { %2709 = vmatprep.mubr.msk.bf16.mxu0 %vm262_vm0, %v3544_v4 }
  0xda   : > { %2710 = vmatmul.mubr.msk.bf16.gmra.mrb[8].mxu0 %vm262_vm0, %v3544_v4 }
  0xdb   : > { %2711 = vmatprep.mubr.msk.bf16.mxu0 %vm262_vm0, %v3554_v6 }
  0xe2   : > { %2712 = vmatmul.mubr.msk.bf16.gmra.mrb[12].mxu0 %vm262_vm0, %v3554_v6 }
  0xe3   : > { %2713 = vmatprep.mubr.msk.bf16.mxu0 %vm262_vm0, %v3564_v8 }
  0xea   : > { %2714 = vmatmul.mubr.msk.bf16.gmra.mrb[16].mxu0 %vm262_vm0, %v3564_v8 }
  0xeb   : > { %2715 = vmatprep.mubr.msk.bf16.mxu0 %vm262_vm0, %v3572_v10 }
  0xf2   : > { %2716 = vmatmul.mubr.msk.bf16.gmra.mrb[20].mxu0 %vm262_vm0, %v3572_v10 }
  0xf3   : > { %2717 = vmatprep.mubr.msk.bf16.mxu0 %vm262_vm0, %v3582_v12 }
  0xfa   : > { %2718 = vmatmul.mubr.msk.bf16.gmra.mrb[24].mxu0 %vm262_vm0, %v3582_v12 }
  0xfb   : > { %2719 = vmatprep.mubr.msk.bf16.mxu0 %vm262_vm0, %v3594_v14 }
 0x102   : > { %2720 = vmatmul.mubr.msk.bf16.gmra.mrb[28].mxu0 %vm262_vm0, %v3594_v14 }
 0x103   : > { %2721 = vmatprep.mubr.msk.bf16.mxu0 %vm262_vm0, %v3527_v1 }
 0x10a   : > { %2722 = vmatmul.mubr.msk.bf16.gmra.mrb[32].mxu0 %vm262_vm0, %v3527_v1  ;;  %v1467_v1 = vpop.permute.xlu0 %1466 }
 0x10b   : > { %2723 = vmatprep.mubr.msk.bf16.mxu0 %vm262_vm0, %v3539_v3  ;;  %3033 = vmatprep.subr.msk.bf16.mxu1 %vm262_vm0, %v1467_v1 }
 0x112   : > { %2724 = vmatmul.mubr.msk.bf16.gmra.mrb[36].mxu0 %vm262_vm0, %v3539_v3 }
 0x113   : > { %2725 = vmatprep.mubr.msk.bf16.mxu0 %vm262_vm0, %v3549_v5 }
 0x11a   : > { %2726 = vmatmul.mubr.msk.bf16.gmra.mrb[40].mxu0 %vm262_vm0, %v3549_v5 }
 0x11b   : > { %2727 = vmatprep.mubr.msk.bf16.mxu0 %vm262_vm0, %v3559_v7 }
 0x122   : > { %2728 = vmatmul.mubr.msk.bf16.gmra.mrb[44].mxu0 %vm262_vm0, %v3559_v7 }
 0x123   : > { %2729 = vmatprep.mubr.msk.bf16.mxu0 %vm262_vm0, %v3567_v9 }
 0x12a   : > { %2730 = vmatmul.mubr.msk.bf16.gmra.mrb[48].mxu0 %vm262_vm0, %v3567_v9 }
 0x12b   : > { %2731 = vmatprep.mubr.msk.bf16.mxu0 %vm262_vm0, %v3577_v11 }
 0x132   : > { %2732 = vmatmul.mubr.msk.bf16.gmra.mrb[52].mxu0 %vm262_vm0, %v3577_v11 }
 0x133   : > { %2733 = vmatprep.mubr.msk.bf16.mxu0 %vm262_vm0, %v3587_v13 }
 0x13a   : > { %2734 = vmatmul.mubr.msk.bf16.gmra.mrb[56].mxu0 %vm262_vm0, %v3587_v13 }
 0x13b   : > { %2735 = vmatprep.mubr.msk.bf16.mxu0 %vm262_vm0, %v3599_v15 }
 0x142   : > { %2736 = vmatmul.mubr.msk.bf16.gmra.mrb[60].mxu0 %vm262_vm0, %v3599_v15 }
 0x19d   : > { %v3734_v2 = vpop.f32.mrb[0].mxu0 }
 0x19e   : > { %v3736_v3 = vpop.f32.mrb[1].mxu0 }
 0x19f   : > { %v3738_v4 = vpop.f32.mrb[2].mxu0  ;;  %v552_v5 = vmax.f32 %v3734_v2, %v3736_v3 }
 0x1a0   : > { %v3742_v6 = vpop.f32.mrb[3].mxu0 }
 0x1a1   : > { %553 = vmax.xlane.f32.xlu0 %v552_v5  ;;  %v555_v7 = vmax.f32 %v3738_v4, %v3742_v6 }
 0x1a3   : > { %556 = vmax.xlane.f32.xlu1 %v555_v7 }
 0x1a5   : > { %v3746_v8 = vpop.f32.mrb[4].mxu0 }
 0x1a6   : > { %v3748_v9 = vpop.f32.mrb[5].mxu0 }
 0x1a7   : > { %v3750_v10 = vpop.f32.mrb[6].mxu0  ;;  %v558_v11 = vmax.f32 %v3746_v8, %v3748_v9 }
 0x1a8   : > { %v3754_v12 = vpop.f32.mrb[7].mxu0 }
 0x1a9   : > { %559 = vmax.xlane.f32.xlu0 %v558_v11  ;;  %v561_v13 = vmax.f32 %v3750_v10, %v3754_v12 }
 0x1ad   : > { %562 = vmax.xlane.f32.xlu0 %v561_v13  ;;  %v3758_v14 = vpop.f32.mrb[8].mxu0 }
 0x1ae   : > { %v3760_v15 = vpop.f32.mrb[9].mxu0 }
 0x1af   : > { %v3762_v16 = vpop.f32.mrb[10].mxu0  ;;  %v564_v17 = vmax.f32 %v3758_v14, %v3760_v15 }
 0x1b0   : > { %v3766_v18 = vpop.f32.mrb[11].mxu0 }
 0x1b1   : > { %565 = vmax.xlane.f32.xlu1 %v564_v17  ;;  %v567_v19 = vmax.f32 %v3762_v16, %v3766_v18 }
 0x1b3   : > { %568 = vmax.xlane.f32.xlu0 %v567_v19 }
 0x1b5   : > { %v3770_v20 = vpop.f32.mrb[12].mxu0 }
 0x1b6   : > { %v3772_v21 = vpop.f32.mrb[13].mxu0 }
 0x1b7   : > { %v3774_v22 = vpop.f32.mrb[14].mxu0  ;;  %v570_v23 = vmax.f32 %v3770_v20, %v3772_v21 }
 0x1b8   : > { %v3778_v24 = vpop.f32.mrb[15].mxu0 }
 0x1b9   : > { %571 = vmax.xlane.f32.xlu1 %v570_v23  ;;  %v573_v25 = vmax.f32 %v3774_v22, %v3778_v24 }
 0x1bb   : > { %574 = vmax.xlane.f32.xlu0 %v573_v25 }
 0x1bd   : > { %v3782_v26 = vpop.f32.mrb[16].mxu0 }
 0x1be   : > { %v3784_v27 = vpop.f32.mrb[17].mxu0 }
 0x1bf   : > { %v3786_v28 = vpop.f32.mrb[18].mxu0  ;;  %v576_v29 = vmax.f32 %v3782_v26, %v3784_v27 }
 0x1c0   : > { %v3790_v30 = vpop.f32.mrb[19].mxu0 }
 0x1c1   : > { %577 = vmax.xlane.f32.xlu1 %v576_v29  ;;  %v579_v31 = vmax.f32 %v3786_v28, %v3790_v30 }
 0x1c3   : > { %580 = vmax.xlane.f32.xlu0 %v579_v31 }
 0x1c5   : > { %v3794_v32 = vpop.f32.mrb[20].mxu0 }
 0x1c6   : > { %v3796_v33 = vpop.f32.mrb[21].mxu0 }
 0x1c7   : > { %v3798_v34 = vpop.f32.mrb[22].mxu0  ;;  %v582_v35 = vmax.f32 %v3794_v32, %v3796_v33 }
 0x1c8   : > { %v3802_v36 = vpop.f32.mrb[23].mxu0 }
 0x1c9   : > { %583 = vmax.xlane.f32.xlu1 %v582_v35  ;;  %v585_v37 = vmax.f32 %v3798_v34, %v3802_v36 }
 0x1cb   : > { %586 = vmax.xlane.f32.xlu0 %v585_v37 }
 0x1cd   : > { %v3806_v38 = vpop.f32.mrb[24].mxu0 }
 0x1ce   : > { %v3808_v39 = vpop.f32.mrb[25].mxu0 }
 0x1cf   : > { %v3810_v40 = vpop.f32.mrb[26].mxu0  ;;  %v588_v41 = vmax.f32 %v3806_v38, %v3808_v39 }
 0x1d0   : > { %v3814_v42 = vpop.f32.mrb[27].mxu0 }
 0x1d1   : > { %589 = vmax.xlane.f32.xlu1 %v588_v41  ;;  %v591_v43 = vmax.f32 %v3810_v40, %v3814_v42 }
 0x1d3   : > { %592 = vmax.xlane.f32.xlu0 %v591_v43 }
 0x1d5   : > { %v3818_v44 = vpop.f32.mrb[28].mxu0 }
 0x1d6   : > { %v3820_v45 = vpop.f32.mrb[29].mxu0 }
 0x1d7   : > { %v3822_v46 = vpop.f32.mrb[30].mxu0  ;;  %v594_v47 = vmax.f32 %v3818_v44, %v3820_v45 }
 0x1d8   : > { %v3826_v48 = vpop.f32.mrb[31].mxu0 }
 0x1d9   : > { %595 = vmax.xlane.f32.xlu1 %v594_v47  ;;  %v597_v49 = vmax.f32 %v3822_v46, %v3826_v48 }
 0x1db   : > { %598 = vmax.xlane.f32.xlu0 %v597_v49 }
 0x1dd   : > { %v3830_v50 = vpop.f32.mrb[32].mxu0 }
 0x1de   : > { %v3832_v51 = vpop.f32.mrb[33].mxu0 }
 0x1df   : > { %v3834_v52 = vpop.f32.mrb[34].mxu0  ;;  %v600_v53 = vmax.f32 %v3830_v50, %v3832_v51 }
 0x1e0   : > { %v3838_v54 = vpop.f32.mrb[35].mxu0 }
 0x1e1   : > { %601 = vmax.xlane.f32.xlu1 %v600_v53  ;;  %v603_v55 = vmax.f32 %v3834_v52, %v3838_v54 }
 0x1e3   : > { %604 = vmax.xlane.f32.xlu0 %v603_v55 }
 0x1e5   : > { %v3842_v56 = vpop.f32.mrb[36].mxu0 }
 0x1e6   : > { %v3844_v57 = vpop.f32.mrb[37].mxu0 }
 0x1e7   : > { %v3846_v58 = vpop.f32.mrb[38].mxu0  ;;  %v606_v59 = vmax.f32 %v3842_v56, %v3844_v57 }
 0x1e8   : > { %v3850_v60 = vpop.f32.mrb[39].mxu0 }
 0x1e9   : > { %607 = vmax.xlane.f32.xlu1 %v606_v59  ;;  %v609_v61 = vmax.f32 %v3846_v58, %v3850_v60 }
 0x1eb   : > { %610 = vmax.xlane.f32.xlu0 %v609_v61 }
 0x1ed   : > { %v3854_v62 = vpop.f32.mrb[40].mxu0 }
 0x1ee   : > { %v3856_v63 = vpop.f32.mrb[41].mxu0 }
 0x1ef   : > { %v3858_v0 = vpop.f32.mrb[42].mxu0  ;;  %v612_v1 = vmax.f32 %v3854_v62, %v3856_v63 }
 0x1f0   : > { %v3862_v5 = vpop.f32.mrb[43].mxu0 }
 0x1f1   : > { %613 = vmax.xlane.f32.xlu1 %v612_v1  ;;  %v615_v7 = vmax.f32 %v3858_v0, %v3862_v5 }
 0x1f3   : > { %616 = vmax.xlane.f32.xlu0 %v615_v7 }
 0x1f5   : > { %v3866_v11 = vpop.f32.mrb[44].mxu0 }
 0x1f6   : > { %v3868_v13 = vpop.f32.mrb[45].mxu0 }
 0x1f7   : > { %v3870_v17 = vpop.f32.mrb[46].mxu0  ;;  %v618_v19 = vmax.f32 %v3866_v11, %v3868_v13 }
 0x1f8   : > { %v3874_v23 = vpop.f32.mrb[47].mxu0 }
 0x1f9   : > { %619 = vmax.xlane.f32.xlu0 %v618_v19  ;;  %v621_v25 = vmax.f32 %v3870_v17, %v3874_v23 }
 0x1fd   : > { %622 = vmax.xlane.f32.xlu0 %v621_v25  ;;  %v3878_v29 = vpop.f32.mrb[48].mxu0 }
 0x1fe   : > { %v3880_v31 = vpop.f32.mrb[49].mxu0 }
 0x1ff   : > { %v3882_v35 = vpop.f32.mrb[50].mxu0  ;;  %v624_v37 = vmax.f32 %v3878_v29, %v3880_v31 }
 0x200   : > { %v3886_v41 = vpop.f32.mrb[51].mxu0 }
 0x201   : > { %5168 = vst [vmem:[#allocation2_spill] sm:$0xff] %v3886_v41  ;;  %625 = vmax.xlane.f32.xlu1 %v624_v37  ;;  %v627_v43 = vmax.f32 %v3882_v35, %v3886_v41 }
 0x203   : > { %628 = vmax.xlane.f32.xlu0 %v627_v43 }
 0x205   : > { %v3890_v47 = vpop.f32.mrb[52].mxu0 }
 0x206   : > { %5169 = vst [vmem:[#allocation3_spill] sm:$0xff] %v3890_v47  ;;  %v3892_v49 = vpop.f32.mrb[53].mxu0 }
 0x207   : > { %5170 = vst [vmem:[#allocation4_spill] sm:$0xff] %v3892_v49  ;;  %v3894_v53 = vpop.f32.mrb[54].mxu0  ;;  %v630_v55 = vmax.f32 %v3890_v47, %v3892_v49 }
 0x208   : > { %5171 = vst [vmem:[#allocation5_spill] sm:$0xff] %v3894_v53  ;;  %v3898_v59 = vpop.f32.mrb[55].mxu0 }
 0x209   : > { %5172 = vst [vmem:[#allocation6_spill] sm:$0xff] %v3898_v59  ;;  %631 = vmax.xlane.f32.xlu1 %v630_v55  ;;  %v633_v61 = vmax.f32 %v3894_v53, %v3898_v59  ;;  %v3914_v55 = vpop.permute.xlu1 %1450 }
 0x20a   : > { %5177 = vst [vmem:[#allocation11_spill] sm:$0xff] %v3914_v55 }
 0x20b   : > { %634 = vmax.xlane.f32.xlu0 %v633_v61 }
 0x20d   : > { %v3902_v1 = vpop.f32.mrb[56].mxu0 }
 0x20e   : > { %5173 = vst [vmem:[#allocation7_spill] sm:$0xff] %v3902_v1  ;;  %v3904_v7 = vpop.f32.mrb[57].mxu0 }
 0x20f   : > { %5174 = vst [vmem:[#allocation8_spill] sm:$0xff] %v3904_v7  ;;  %v3906_v19 = vpop.f32.mrb[58].mxu0  ;;  %v636_v25 = vmax.f32 %v3902_v1, %v3904_v7  ;;  %v3928_v7 = vpop.permute.xlu1 %1452 }
 0x210   : > { %5175 = vst [vmem:[#allocation9_spill] sm:$0xff] %v3906_v19  ;;  %v3910_v37 = vpop.f32.mrb[59].mxu0  ;;  %5182 = vst [vmem:[#allocation16_spill] sm:$0xff] %v3928_v7 }
 0x211   : > { %5176 = vst [vmem:[#allocation10_spill] sm:$0xff] %v3910_v37  ;;  %637 = vmax.xlane.f32.xlu1 %v636_v25  ;;  %v639_v43 = vmax.f32 %v3906_v19, %v3910_v37 }
 0x213   : > { %640 = vmax.xlane.f32.xlu0 %v639_v43  ;;  %v3930_v43 = vpop.permute.xlu0 %1468  ;;  %v3932_v55 = vpop.permute.xlu1 %1454 }
 0x214   : > { %5183 = vst [vmem:[#allocation17_spill] sm:$0xff] %v3930_v43  ;;  %5184 = vst [vmem:[#allocation18_spill] sm:$0xff] %v3932_v55 }
 0x215   : > { %v3916_v59 = vpop.f32.mrb[60].mxu0 }
 0x216   : > { %5178 = vst [vmem:[#allocation12_spill] sm:$0xff] %v3916_v59  ;;  %v3918_v61 = vpop.f32.mrb[61].mxu0 }
 0x217   : > { %5179 = vst [vmem:[#allocation13_spill] sm:$0xff] %v3918_v61  ;;  %v3920_v53 = vpop.f32.mrb[62].mxu0  ;;  %v642_v49 = vmax.f32 %v3916_v59, %v3918_v61  ;;  %v3934_v37 = vpop.permute.xlu0 %1470 }
 0x218   : > { %5180 = vst [vmem:[#allocation14_spill] sm:$0xff] %v3920_v53  ;;  %v3924_v47 = vpop.f32.mrb[63].mxu0  ;;  %5185 = vst [vmem:[#allocation19_spill] sm:$0xff] %v3934_v37  ;;  %v3936_v19 = vpop.permute.xlu1 %1456 }
 0x219   : > { %5181 = vst [vmem:[#allocation15_spill] sm:$0xff] %v3924_v47  ;;  %643 = vmax.xlane.f32.xlu1 %v642_v49  ;;  %v645_v25 = vmax.f32 %v3920_v53, %v3924_v47  ;;  %5186 = vst [vmem:[#allocation20_spill] sm:$0xff] %v3936_v19 }
 0x21b   : > { %646 = vmax.xlane.f32.xlu0 %v645_v25  ;;  %v3938_v1 = vpop.permute.xlu0 %1472 }
 0x21c   : > { %5187 = vst [vmem:[#allocation21_spill] sm:$0xff] %v3938_v1  ;;  %v3940_v61 = vpop.permute.xlu1 %1458 }
 0x21d   : > { %5188 = vst [vmem:[#allocation22_spill] sm:$0xff] %v3940_v61 }
 0x22e   : > { %v554_v59 = vpop.xlane.xlu0 %553 }
 0x22f   : > { %v648_v49 = vsub.f32 %v3734_v2, %v554_v59  ;;  %v649_v47 = vsub.f32 %v3736_v3, %v554_v59 }
 0x230   : > { %v557_v53 = vpop.xlane.xlu1 %556 }
 0x231   : > { %v712_v7 = vmul.f32 1.442695, %v648_v49  ;;  %v714_v25 = vmul.f32 1.442695, %v649_v47  ;;  %v650_v43 = vsub.f32 %v3738_v4, %v557_v53  ;;  %v651_v55 = vsub.f32 %v3742_v6, %v557_v53 }
 0x233   : > { %3086 = vpow2.f32 %v712_v7  ;;  %v716_v37 = vmul.f32 1.442695, %v650_v43  ;;  %v718_v41 = vmul.f32 1.442695, %v651_v55 }
 0x234   : > { %3088 = vpow2.f32 %v714_v25 }
 0x235   : > { %3090 = vpow2.f32 %v716_v37 }
 0x236   : > { %3092 = vpow2.f32 %v718_v41  ;;  %v560_v19 = vpop.xlane.xlu0 %559 }
 0x237   : > { %v652_v61 = vsub.f32 %v3746_v8, %v560_v19  ;;  %v653_v2 = vsub.f32 %v3748_v9, %v560_v19 }
 0x239   : > { %v720_v1 = vmul.f32 1.442695, %v652_v61  ;;  %v722_v3 = vmul.f32 1.442695, %v653_v2 }
 0x23a   : > { %v563_v59 = vpop.xlane.xlu0 %562 }
 0x23b   : > { %3094 = vpow2.f32 %v720_v1  ;;  %v654_v47 = vsub.f32 %v3750_v10, %v563_v59  ;;  %v655_v4 = vsub.f32 %v3754_v12, %v563_v59 }
 0x23c   : > { %3096 = vpow2.f32 %v722_v3 }
 0x23d   : > { %v3950_v6 = vpop.eup %3086  ;;  %v724_v53 = vmul.f32 1.442695, %v654_v47  ;;  %v726_v7 = vmul.f32 1.442695, %v655_v4 }
 0x23e   : > { %v3952_v37 = vpop.eup %3088  ;;  %v566_v41 = vpop.xlane.xlu1 %565 }
 0x23f   : > { %v3954_v55 = vpop.eup %3090  ;;  %3098 = vpow2.f32 %v724_v53  ;;  %v656_v8 = vsub.f32 %v3758_v14, %v566_v41  ;;  %v657_v9 = vsub.f32 %v3760_v15, %v566_v41  ;;  %v840_v10 = vadd.f32 %v3952_v37, %v3950_v6 }
 0x240   : > { %v3960_v1 = vpop.eup %3092  ;;  %3100 = vpow2.f32 %v726_v7  ;;  %v569_v12 = vpop.xlane.xlu0 %568 }
 0x241   : > { %v728_v19 = vmul.f32 1.442695, %v656_v8  ;;  %v730_v61 = vmul.f32 1.442695, %v657_v9  ;;  %v658_v43 = vsub.f32 %v3762_v16, %v569_v12  ;;  %v659_v49 = vsub.f32 %v3766_v18, %v569_v12  ;;  %841 = vadd.xlane.f32.xlu1 %v840_v10 }
 0x242   : > { %v843_v25 = vadd.f32 %v3960_v1, %v3954_v55 }
 0x243   : > { %3102 = vpow2.f32 %v728_v19  ;;  %v732_v14 = vmul.f32 1.442695, %v658_v43  ;;  %v734_v15 = vmul.f32 1.442695, %v659_v49 }
 0x244   : > { %3104 = vpow2.f32 %v730_v61  ;;  %844 = vadd.xlane.f32.xlu0 %v843_v25  ;;  %v3998_v25 = vld [vmem:[%s3521_s11 + $0x68] sm:$0xff]  }
 0x245   : > { %v3966_v2 = vpop.eup %3094  ;;  %3106 = vpow2.f32 %v732_v14  ;;  %5190 = vst [vmem:[#allocation24_spill] sm:$0xff] %v3998_v25 }
 0x246   : > { %v3968_v3 = vpop.eup %3096  ;;  %3108 = vpow2.f32 %v734_v15  ;;  %v572_v59 = vpop.xlane.xlu1 %571 }
 0x247   : > { %v660_v16 = vsub.f32 %v3770_v20, %v572_v59  ;;  %v661_v18 = vsub.f32 %v3772_v21, %v572_v59  ;;  %v846_v47 = vadd.f32 %v3968_v3, %v3966_v2 }
 0x248   : > { %v575_v4 = vpop.xlane.xlu0 %574 }
 0x249   : > { %v3974_v53 = vpop.eup %3098  ;;  %v736_v7 = vmul.f32 1.442695, %v660_v16  ;;  %v738_v41 = vmul.f32 1.442695, %v661_v18  ;;  %v662_v8 = vsub.f32 %v3774_v22, %v575_v4  ;;  %v663_v9 = vsub.f32 %v3778_v24, %v575_v4  ;;  %847 = vadd.xlane.f32.xlu0 %v846_v47  ;;  %v3987_v22 = vld [vmem:[%s3521_s11 + $0x28] sm:$0xff]  }
 0x24a   : > { %v3978_v10 = vpop.eup %3100  ;;  %5189 = vst [vmem:[#allocation23_spill] sm:$0xff] %v3987_v22 }
 0x24b   : > { %3110 = vpow2.f32 %v736_v7  ;;  %v740_v20 = vmul.f32 1.442695, %v662_v8  ;;  %v742_v21 = vmul.f32 1.442695, %v663_v9  ;;  %v849_v12 = vadd.f32 %v3978_v10, %v3974_v53 }
 0x24c   : > { %3112 = vpow2.f32 %v738_v41 }
 0x24d   : > { %v3982_v19 = vpop.eup %3102  ;;  %3114 = vpow2.f32 %v740_v20  ;;  %850 = vadd.xlane.f32.xlu0 %v849_v12 }
 0x24e   : > { %v3984_v61 = vpop.eup %3104  ;;  %3116 = vpow2.f32 %v742_v21  ;;  %v578_v7 = vpop.xlane.xlu1 %577 }
 0x24f   : > { %v3989_v24 = vpop.eup %3106  ;;  %v852_v43 = vadd.f32 %v3984_v61, %v3982_v19  ;;  %v664_v41 = vsub.f32 %v3782_v26, %v578_v7  ;;  %v665_v8 = vsub.f32 %v3784_v27, %v578_v7 }
 0x250   : > { %v3993_v49 = vpop.eup %3108  ;;  %v581_v9 = vpop.xlane.xlu0 %580 }
 0x251   : > { %853 = vadd.xlane.f32.xlu0 %v852_v43  ;;  %v855_v14 = vadd.f32 %v3993_v49, %v3989_v24  ;;  %v744_v20 = vmul.f32 1.442695, %v664_v41  ;;  %v666_v21 = vsub.f32 %v3786_v28, %v581_v9  ;;  %v746_v12 = vmul.f32 1.442695, %v665_v8 }
 0x252   : > { %1460 = vrot.lane.b32.xlu1 %v3987_v22, %s3494_s14  ;;  %v667_v43 = vsub.f32 %v3790_v30, %v581_v9  ;;  %v4025_v9 = vld [vmem:[%s3521_s11 + $0x60] sm:$0xff]  }
 0x253   : > { %3118 = vpow2.f32 %v744_v20 }
 0x254   : > { %3120 = vpow2.f32 %v746_v12 }
 0x255   : > { %v4002_v15 = vpop.eup %3110  ;;  %856 = vadd.xlane.f32.xlu0 %v855_v14 }
 0x256   : > { %v4004_v59 = vpop.eup %3112  ;;  %1476 = vrot.lane.b32.xlu1 %v3998_v25, %s3494_s14  ;;  %v584_v14 = vpop.xlane.xlu1 %583 }
 0x257   : > { %v4008_v16 = vpop.eup %3114  ;;  %v858_v18 = vadd.f32 %v4004_v59, %v4002_v15  ;;  %v668_v25 = vsub.f32 %v3794_v32, %v584_v14  ;;  %v669_v22 = vsub.f32 %v3796_v33, %v584_v14 }
 0x258   : > { %v4012_v47 = vpop.eup %3116  ;;  %v587_v7 = vpop.xlane.xlu0 %586 }
 0x259   : > { %859 = vadd.xlane.f32.xlu0 %v858_v18  ;;  %v861_v4 = vadd.f32 %v4012_v47, %v4008_v16  ;;  %v748_v18 = vmul.f32 1.442695, %v666_v21  ;;  %v752_v27 = vmul.f32 1.442695, %v668_v25  ;;  %v754_v28 = vmul.f32 1.442695, %v669_v22 }
 0x25b   : > { %3122 = vpow2.f32 %v748_v18 }
 0x25d   : > { %862 = vadd.xlane.f32.xlu0 %v861_v4  ;;  %v750_v4 = vmul.f32 1.442695, %v667_v43 }
 0x25e   : > { %v590_v26 = vpop.xlane.xlu1 %589 }
 0x25f   : > { %v672_v41 = vsub.f32 %v3806_v38, %v590_v26  ;;  %3124 = vpow2.f32 %v750_v4  ;;  %v673_v30 = vsub.f32 %v3808_v39, %v590_v26  ;;  %v4031_v38 = vpop.eup %3118 }
 0x260   : > { %3126 = vpow2.f32 %v752_v27  ;;  %v593_v32 = vpop.xlane.xlu0 %592  ;;  %v4033_v22 = vpop.eup %3120 }
 0x261   : > { %v760_v20 = vmul.f32 1.442695, %v672_v41  ;;  %3128 = vpow2.f32 %v754_v28  ;;  %v762_v33 = vmul.f32 1.442695, %v673_v30  ;;  %v864_v27 = vadd.f32 %v4033_v22, %v4031_v38 }
 0x262   : > { %v671_v28 = vsub.f32 %v3802_v36, %v587_v7 }
 0x263   : > { %3130 = vpow2.f32 %v760_v20 }
 0x264   : > { %3132 = vpow2.f32 %v762_v33  ;;  %v674_v33 = vsub.f32 %v3810_v40, %v593_v32 }
 0x265   : > { %v4037_v26 = vpop.eup %3122 }
 0x266   : > { %v596_v8 = vpop.xlane.xlu1 %595 }
 0x267   : > { %v676_v21 = vsub.f32 %v3818_v44, %v596_v8  ;;  %v677_v12 = vsub.f32 %v3820_v45, %v596_v8  ;;  %v670_v45 = vsub.f32 %v3798_v34, %v587_v7  ;;  %v758_v7 = vmul.f32 1.442695, %v671_v28 }
 0x268   : > { %v599_v43 = vpop.xlane.xlu0 %598 }
 0x269   : > { %v768_v39 = vmul.f32 1.442695, %v676_v21  ;;  %v770_v18 = vmul.f32 1.442695, %v677_v12  ;;  %v4042_v41 = vpop.eup %3124  ;;  %v756_v34 = vmul.f32 1.442695, %v670_v45  ;;  %v679_v28 = vsub.f32 %v3826_v48, %v599_v43 }
 0x26a   : > { %v4049_v21 = vpop.eup %3126  ;;  %v867_v12 = vadd.f32 %v4042_v41, %v4037_v26 }
 0x26b   : > { %3134 = vpow2.f32 %v768_v39  ;;  %v4054_v36 = vpop.eup %3128 }
 0x26c   : > { %3136 = vpow2.f32 %v770_v18  ;;  %v870_v45 = vadd.f32 %v4054_v36, %v4049_v21 }
 0x26d   : > { %v4059_v40 = vpop.eup %3130 }
 0x26e   : > { %v602_v25 = vpop.xlane.xlu1 %601 }
 0x26f   : > { %v680_v14 = vsub.f32 %v3830_v50, %v602_v25  ;;  %v681_v44 = vsub.f32 %v3832_v51, %v602_v25  ;;  %v675_v25 = vsub.f32 %v3814_v42, %v593_v32  ;;  %v678_v32 = vsub.f32 %v3822_v46, %v599_v43 }
 0x270   : > { %v4045_v8 = vpop.xlane.xlu0 %604 }
 0x271   : > { %v776_v30 = vmul.f32 1.442695, %v680_v14  ;;  %v778_v51 = vmul.f32 1.442695, %v681_v44  ;;  %v766_v42 = vmul.f32 1.442695, %v675_v25  ;;  %v682_v46 = vsub.f32 %v3834_v52, %v4045_v8 }
 0x272   : > { %v683_v43 = vsub.f32 %v3838_v54, %v4045_v8 }
 0x273   : > { %1474 = vrot.lane.b32.xlu0 %v4025_v9, %s3494_s14  ;;  %3138 = vpow2.f32 %v776_v30  ;;  %v780_v54 = vmul.f32 1.442695, %v682_v46 }
 0x274   : > { %3140 = vpow2.f32 %v778_v51  ;;  %v782_v8 = vmul.f32 1.442695, %v683_v43 }
 0x275   : > { %3142 = vpow2.f32 %v756_v34  ;;  %v772_v34 = vmul.f32 1.442695, %v678_v32 }
 0x276   : > { %v608_v4 = vpop.xlane.xlu1 %607  ;;  %3144 = vpow2.f32 %v758_v7 }
 0x277   : > { %v684_v50 = vsub.f32 %v3842_v56, %v608_v4  ;;  %v685_v20 = vsub.f32 %v3844_v57, %v608_v4  ;;  %v764_v4 = vmul.f32 1.442695, %v674_v33  ;;  %v774_v33 = vmul.f32 1.442695, %v679_v28 }
 0x278   : > { %v611_v39 = vpop.xlane.xlu0 %610 }
 0x279   : > { %v784_v56 = vmul.f32 1.442695, %v684_v50  ;;  %v786_v57 = vmul.f32 1.442695, %v685_v20 }
 0x27a   : > { %865 = vadd.xlane.f32.xlu1 %v864_v27  ;;  %v4063_v27 = vpop.eup %3132 }
 0x27b   : > { %3146 = vpow2.f32 %v784_v56  ;;  %v4067_v50 = vpop.eup %3134  ;;  %v876_v51 = vadd.f32 %v4063_v27, %v4059_v40  ;;  %v686_v56 = vsub.f32 %v3846_v58, %v611_v39 }
 0x27c   : > { %3148 = vpow2.f32 %v786_v57  ;;  %v4071_v20 = vpop.eup %3136 }
 0x27d   : > { %3150 = vpow2.f32 %v764_v4  ;;  %v4079_v25 = vpop.eup %3138  ;;  %v788_v4 = vmul.f32 1.442695, %v686_v56 }
 0x27e   : > { %868 = vadd.xlane.f32.xlu1 %v867_v12  ;;  %v614_v14 = vpop.xlane.xlu1 %613  ;;  %3152 = vpow2.f32 %v766_v42  ;;  %v4084_v57 = vpop.eup %3140 }
 0x27f   : > { %v688_v18 = vsub.f32 %v3854_v62, %v614_v14  ;;  %v689_v44 = vsub.f32 %v3856_v63, %v614_v14  ;;  %v882_v14 = vadd.f32 %v4071_v20, %v4067_v50 }
 0x280   : > { %v617_v62 = vpop.xlane.xlu0 %616 }
 0x281   : > { %v792_v30 = vmul.f32 1.442695, %v688_v18  ;;  %v794_v63 = vmul.f32 1.442695, %v689_v44  ;;  %v4086_v44 = vpop.eup %3142  ;;  %v690_v32 = vsub.f32 %v3858_v0, %v617_v62 }
 0x282   : > { %871 = vadd.xlane.f32.xlu1 %v870_v45  ;;  %v888_v45 = vadd.f32 %v4084_v57, %v4079_v25 }
 0x283   : > { %3154 = vpow2.f32 %v792_v30 }
 0x284   : > { %3156 = vpow2.f32 %v794_v63 }
 0x285   : > { %3158 = vpow2.f32 %v772_v34 }
 0x286   : > { %877 = vadd.xlane.f32.xlu1 %v876_v51  ;;  %v620_v48 = vpop.xlane.xlu0 %619  ;;  %3160 = vpow2.f32 %v774_v33 }
 0x287   : > { %v692_v12 = vsub.f32 %v3866_v11, %v620_v48  ;;  %v693_v7 = vsub.f32 %v3868_v13, %v620_v48  ;;  %v687_v11 = vsub.f32 %v3850_v60, %v611_v39  ;;  %v4089_v13 = vpop.eup %3144  ;;  %v691_v39 = vsub.f32 %v3862_v5, %v617_v62 }
 0x288   : > { %v4091_v58 = vpop.eup %3146  ;;  %v873_v48 = vadd.f32 %v4089_v13, %v4086_v44  ;;  %v796_v62 = vmul.f32 1.442695, %v690_v32  ;;  %v5194_v32 = vld [vmem:[#allocation2_spill] sm:$0xff] }
 0x289   : > { %v800_v52 = vmul.f32 1.442695, %v692_v12  ;;  %v802_v18 = vmul.f32 1.442695, %v693_v7  ;;  %v4095_v42 = vpop.eup %3148  ;;  %v790_v60 = vmul.f32 1.442695, %v687_v11 }
 0x28a   : > { %883 = vadd.xlane.f32.xlu1 %v882_v14  ;;  %v4098_v28 = vpop.eup %3150  ;;  %v623_v30 = vpop.xlane.xlu0 %622  ;;  %v894_v0 = vadd.f32 %v4095_v42, %v4091_v58 }
 0x28b   : > { %3162 = vpow2.f32 %v800_v52  ;;  %v4101_v51 = vpop.eup %3152  ;;  %v694_v43 = vsub.f32 %v3870_v17, %v623_v30 }
 0x28c   : > { %3164 = vpow2.f32 %v802_v18  ;;  %v879_v17 = vadd.f32 %v4101_v51, %v4098_v28 }
 0x28d   : > { %3166 = vpow2.f32 %v780_v54  ;;  %v4105_v46 = vpop.eup %3154  ;;  %v804_v11 = vmul.f32 1.442695, %v694_v43 }
 0x28e   : > { %889 = vadd.xlane.f32.xlu1 %v888_v45  ;;  %v626_v63 = vpop.xlane.xlu1 %625  ;;  %3168 = vpow2.f32 %v782_v8  ;;  %5191 = vst [vmem:[#allocation25_spill] sm:$0xff] %v4105_v46  ;;  %v4111_v5 = vpop.eup %3156 }
 0x28f   : > { %v696_v34 = vsub.f32 %v3878_v29, %v626_v63  ;;  %v697_v33 = vsub.f32 %v3880_v31, %v626_v63  ;;  %3170 = vpow2.f32 %v788_v4  ;;  %v798_v29 = vmul.f32 1.442695, %v691_v39  ;;  %v4115_v56 = vpop.eup %3158  ;;  %v5195_v39 = vld [vmem:[#allocation3_spill] sm:$0xff]  ;;  %v5196_v63 = vld [vmem:[#allocation4_spill] sm:$0xff] }
 0x290   : > { %3172 = vpow2.f32 %v790_v60  ;;  %v695_v31 = vsub.f32 %v3874_v23, %v623_v30  ;;  %v629_v14 = vpop.xlane.xlu0 %628  ;;  %v4117_v52 = vpop.eup %3160  ;;  %v900_v18 = vadd.f32 %v4111_v5, %v4105_v46 }
 0x291   : > { %v808_v12 = vmul.f32 1.442695, %v696_v34  ;;  %v810_v7 = vmul.f32 1.442695, %v697_v33  ;;  %v698_v4 = vsub.f32 %v3882_v35, %v629_v14  ;;  %v699_v60 = vsub.f32 %v5194_v32, %v629_v14 }
 0x292   : > { %895 = vadd.xlane.f32.xlu1 %v894_v0  ;;  %874 = vadd.xlane.f32.xlu0 %v873_v48  ;;  %v806_v8 = vmul.f32 1.442695, %v695_v31 }
 0x293   : > { %3174 = vpow2.f32 %v808_v12  ;;  %v812_v14 = vmul.f32 1.442695, %v698_v4 }
 0x294   : > { %3176 = vpow2.f32 %v810_v7  ;;  %v5197_v7 = vld [vmem:[#allocation5_spill] sm:$0xff] }
 0x295   : > { %v4123_v54 = vpop.eup %3162  ;;  %3178 = vpow2.f32 %v796_v62  ;;  %v885_v62 = vadd.f32 %v4117_v52, %v4115_v56 }
 0x296   : > { %5192 = vst [vmem:[#allocation26_spill] sm:$0xff] %v4123_v54  ;;  %v4125_v23 = vpop.eup %3164  ;;  %3180 = vpow2.f32 %v798_v29  ;;  %901 = vadd.xlane.f32.xlu1 %v900_v18  ;;  %880 = vadd.xlane.f32.xlu0 %v879_v17  ;;  %v632_v45 = vpop.xlane.xlu1 %631  ;;  %v5198_v18 = vld [vmem:[#allocation6_spill] sm:$0xff] }
 0x297   : > { %5193 = vst [vmem:[#allocation27_spill] sm:$0xff] %v4125_v23  ;;  %v700_v30 = vsub.f32 %v5195_v39, %v632_v45  ;;  %v701_v34 = vsub.f32 %v5196_v63, %v632_v45  ;;  %v906_v33 = vadd.f32 %v4125_v23, %v4123_v54  ;;  %v4133_v0 = vpop.eup %3166  ;;  %3182 = vpow2.f32 %v804_v11  ;;  %v5204_v54 = vld [vmem:[#allocation10_spill] sm:$0xff] }
 0x298   : > { %v635_v48 = vpop.xlane.xlu0 %634  ;;  %v4137_v43 = vpop.eup %3168  ;;  %3184 = vpow2.f32 %v806_v8  ;;  %v814_v45 = vmul.f32 1.442695, %v699_v60  ;;  %v5201_v60 = vld [vmem:[#allocation7_spill] sm:$0xff] }
 0x299   : > { %v816_v35 = vmul.f32 1.442695, %v700_v30  ;;  %v818_v12 = vmul.f32 1.442695, %v701_v34  ;;  %v702_v29 = vsub.f32 %v5197_v7, %v635_v48  ;;  %v4140_v31 = vpop.eup %3170  ;;  %v703_v17 = vsub.f32 %v5198_v18, %v635_v48  ;;  %v5202_v48 = vld [vmem:[#allocation8_spill] sm:$0xff] }
 0x29a   : > { %907 = vadd.xlane.f32.xlu1 %v906_v33  ;;  %886 = vadd.xlane.f32.xlu0 %v885_v62  ;;  %v4143_v32 = vpop.eup %3172  ;;  %v891_v11 = vadd.f32 %v4137_v43, %v4133_v0 }
 0x29b   : > { %3186 = vpow2.f32 %v816_v35  ;;  %v820_v39 = vmul.f32 1.442695, %v702_v29  ;;  %v822_v8 = vmul.f32 1.442695, %v703_v17  ;;  %v897_v29 = vadd.f32 %v4143_v32, %v4140_v31  ;;  %v5203_v17 = vld [vmem:[#allocation9_spill] sm:$0xff] }
 0x29c   : > { %3188 = vpow2.f32 %v818_v12 }
 0x29d   : > { %v4147_v30 = vpop.eup %3174  ;;  %3190 = vpow2.f32 %v812_v14 }
 0x29e   : > { %5199 = vst [vmem:[#allocation2_spill] sm:$0xff] %v4147_v30  ;;  %v4149_v63 = vpop.eup %3176  ;;  %892 = vadd.xlane.f32.xlu0 %v891_v11  ;;  %v638_v4 = vpop.xlane.xlu1 %637  ;;  %3192 = vpow2.f32 %v814_v45 }
 0x29f   : > { %5200 = vst [vmem:[#allocation3_spill] sm:$0xff] %v4149_v63  ;;  %v4151_v34 = vpop.eup %3178  ;;  %v704_v33 = vsub.f32 %v5201_v60, %v638_v4  ;;  %v705_v62 = vsub.f32 %v5202_v48, %v638_v4  ;;  %v912_v35 = vadd.f32 %v4149_v63, %v4147_v30  ;;  %3194 = vpow2.f32 %v820_v39  ;;  %v5220_v63 = vld [vmem:[#allocation15_spill] sm:$0xff] }
 0x2a0   : > { %v4157_v12 = vpop.eup %3180  ;;  %v641_v7 = vpop.xlane.xlu0 %640  ;;  %3196 = vpow2.f32 %v822_v8 }
 0x2a1   : > { %v824_v14 = vmul.f32 1.442695, %v704_v33  ;;  %v826_v18 = vmul.f32 1.442695, %v705_v62  ;;  %v706_v11 = vsub.f32 %v5203_v17, %v641_v7  ;;  %v707_v45 = vsub.f32 %v5204_v54, %v641_v7  ;;  %913 = vadd.xlane.f32.xlu1 %v912_v35  ;;  %v4163_v4 = vpop.eup %3182 }
 0x2a2   : > { %898 = vadd.xlane.f32.xlu0 %v897_v29  ;;  %5205 = vst [vmem:[#allocation4_spill] sm:$0xff] %v4163_v4  ;;  %v4165_v30 = vpop.eup %3184  ;;  %v903_v39 = vadd.f32 %v4157_v12, %v4151_v34 }
 0x2a3   : > { %3198 = vpow2.f32 %v824_v14  ;;  %v828_v60 = vmul.f32 1.442695, %v706_v11  ;;  %v830_v48 = vmul.f32 1.442695, %v707_v45  ;;  %5206 = vst [vmem:[#allocation5_spill] sm:$0xff] %v4165_v30  ;;  %v909_v35 = vadd.f32 %v4165_v30, %v4163_v4 }
 0x2a4   : > { %3200 = vpow2.f32 %v826_v18 }
 0x2a5   : > { %v4169_v33 = vpop.eup %3186  ;;  %3202 = vpow2.f32 %v828_v60 }
 0x2a6   : > { %5207 = vst [vmem:[#allocation6_spill] sm:$0xff] %v4169_v33  ;;  %v4171_v62 = vpop.eup %3188  ;;  %904 = vadd.xlane.f32.xlu0 %v903_v39  ;;  %3204 = vpow2.f32 %v830_v48 }
 0x2a7   : > { %5208 = vst [vmem:[#allocation7_spill] sm:$0xff] %v4171_v62  ;;  %v918_v54 = vadd.f32 %v4171_v62, %v4169_v33  ;;  %v4175_v8 = vpop.eup %3190  ;;  %v5217_v33 = vld [vmem:[#allocation12_spill] sm:$0xff] }
 0x2a8   : > { %5209 = vst [vmem:[#allocation8_spill] sm:$0xff] %v4175_v8  ;;  %v4179_v7 = vpop.eup %3192 }
 0x2a9   : > { %5210 = vst [vmem:[#allocation9_spill] sm:$0xff] %v4179_v7  ;;  %919 = vadd.xlane.f32.xlu1 %v918_v54  ;;  %v4181_v29 = vpop.eup %3194  ;;  %v915_v18 = vadd.f32 %v4179_v7, %v4175_v8 }
 0x2aa   : > { %5211 = vst [vmem:[#allocation10_spill] sm:$0xff] %v4181_v29  ;;  %910 = vadd.xlane.f32.xlu0 %v909_v35  ;;  %v4183_v14 = vpop.eup %3196  ;;  %v4202_v35 = vld [vmem:[%s3521_s11 + $0x70] sm:$0xff]  }
 0x2ab   : > { %5212 = vst [vmem:[#allocation28_spill] sm:$0xff] %v4183_v14  ;;  %v921_v48 = vadd.f32 %v4183_v14, %v4181_v29 }
 0x2ad   : > { %v4187_v17 = vpop.eup %3198 }
 0x2ae   : > { %5213 = vst [vmem:[#allocation29_spill] sm:$0xff] %v4187_v17  ;;  %v4189_v11 = vpop.eup %3200  ;;  %916 = vadd.xlane.f32.xlu0 %v915_v18  ;;  %v4207_v18 = vld [vmem:[%s3521_s11 + $0x30] sm:$0xff]  }
 0x2af   : > { %5214 = vst [vmem:[#allocation30_spill] sm:$0xff] %v4189_v11  ;;  %v924_v45 = vadd.f32 %v4189_v11, %v4187_v17  ;;  %v4193_v60 = vpop.eup %3202  ;;  %v644_v17 = vpop.xlane.xlu1 %643 }
 0x2b0   : > { %5215 = vst [vmem:[#allocation31_spill] sm:$0xff] %v4193_v60  ;;  %v4197_v39 = vpop.eup %3204  ;;  %v647_v11 = vpop.xlane.xlu0 %646  ;;  %v708_v29 = vsub.f32 %v5217_v33, %v644_v17 }
 0x2b1   : > { %5216 = vst [vmem:[#allocation32_spill] sm:$0xff] %v4197_v39  ;;  %925 = vadd.xlane.f32.xlu1 %v924_v45  ;;  %v927_v54 = vadd.f32 %v4197_v39, %v4193_v60  ;;  %v5219_v39 = vld [vmem:[#allocation14_spill] sm:$0xff]  ;;  %v711_v7 = vsub.f32 %v5220_v63, %v647_v11 }
 0x2b2   : > { %922 = vadd.xlane.f32.xlu0 %v921_v48  ;;  %v5218_v48 = vld [vmem:[#allocation13_spill] sm:$0xff]  ;;  %v710_v14 = vsub.f32 %v5219_v39, %v647_v11 }
 0x2b3   : > { %v709_v62 = vsub.f32 %v5218_v48, %v644_v17  ;;  %v838_v46 = vmul.f32 1.442695, %v711_v7 }
 0x2b4   : > { %v836_v4 = vmul.f32 1.442695, %v710_v14 }
 0x2b5   : > { %v834_v8 = vmul.f32 1.442695, %v709_v62 }
 0x2b6   : > { %928 = vadd.xlane.f32.xlu0 %v927_v54  ;;  %v832_v54 = vmul.f32 1.442695, %v708_v29 }
 0x2c2   : > { %1478 = vrot.lane.b32.xlu1 %v4202_v35, %s3494_s14 }
 0x2cc   : > { %1462 = vrot.lane.b32.xlu0 %v4207_v18, %s3494_s14 }
 0x2ce   : > { %v842_v45 = vpop.xlane.xlu1 %841 }
 0x2cf   : > { %3206 = vrcp.f32 %v842_v45 }
 0x2d1   : > { %v845_v60 = vpop.xlane.xlu0 %844 }
 0x2d2   : > { %3208 = vrcp.f32 %v845_v60 }
 0x2d3   : > { %3210 = vpow2.f32 %v832_v54 }
 0x2d4   : > { %3212 = vpow2.f32 %v834_v8 }
 0x2d6   : > { %v848_v23 = vpop.xlane.xlu0 %847 }
 0x2d7   : > { %3214 = vrcp.f32 %v848_v23 }
 0x2d8   : > { %3216 = vpow2.f32 %v836_v4  ;;  %v5221_v4 = vld [vmem:[#allocation11_spill] sm:$0xff] }
 0x2d9   : > { %v3207_v30 = vpop.eup %3206 }
 0x2da   : > { %v851_v33 = vpop.xlane.xlu0 %850  ;;  %v969_v29 = vmul.f32 %v3207_v30, %v3952_v37  ;;  %v968_v62 = vmul.f32 %v3207_v30, %v3950_v6 }
 0x2db   : > { %3218 = vrcp.f32 %v851_v33 }
 0x2dc   : > { %v3209_v17 = vpop.eup %3208  ;;  %3220 = vpow2.f32 %v838_v46  ;;  %v1531_v46 = vsel %vm262_vm0, %v5221_v4, 0 }
 0x2dd   : > { %v971_v39 = vmul.f32 %v3209_v17, %v3960_v1  ;;  %v970_v63 = vmul.f32 %v3209_v17, %v3954_v55  ;;  %v4219_v8 = vpop.eup %3210  ;;  %v5222_v55 = vld [vmem:[#allocation17_spill] sm:$0xff] }
 0x2de   : > { %v854_v11 = vpop.xlane.xlu0 %853  ;;  %v4221_v23 = vpop.eup %3212 }
 0x2df   : > { %v1033_v14 = vpack.c.bf16 %v971_v39, %v969_v29  ;;  %v1032_v60 = vpack.c.bf16 %v970_v63, %v968_v62  ;;  %3222 = vrcp.f32 %v854_v11  ;;  %v930_v1 = vadd.f32 %v4221_v23, %v4219_v8  ;;  %v5223_v11 = vld [vmem:[#allocation16_spill] sm:$0xff] }
 0x2e1   : > { %1144 = vmatprep.mubr.bf16.mxu1 %v1033_v14  ;;  %v3215_v7 = vpop.eup %3214  ;;  %v1534_v14 = vsel %vm262_vm0, %v5223_v11, 0 }
 0x2e2   : > { %1145 = vmatmul.mubr.bf16.vlgmr.msra.gmra.mrb[0].mxu1 %v1032_v60  ;;  %v857_v37 = vpop.xlane.xlu0 %856  ;;  %v4225_v6 = vpop.eup %3216  ;;  %v973_v54 = vmul.f32 %v3215_v7, %v3968_v3  ;;  %v972_v17 = vmul.f32 %v3215_v7, %v3966_v2  ;;  %v5224_v3 = vld [vmem:[#allocation19_spill] sm:$0xff] }
 0x2e3   : > { %2850 = vmatpush3.bf16.xpose.msra.mxu1 %v1531_v46  ;;  %3224 = vrcp.f32 %v857_v37 }
 0x2e4   : > { %3034 = vmatprep.subr.msk.bf16.mxu1 %vm262_vm0, %v5222_v55 }
 0x2e5   : > { %v3219_v30 = vpop.eup %3218 }
 0x2e6   : > { %v4231_v45 = vpop.eup %3220  ;;  %931 = vadd.xlane.f32.xlu1 %v930_v1  ;;  %v860_v48 = vpop.xlane.xlu0 %859  ;;  %v975_v33 = vmul.f32 %v3219_v30, %v3978_v10  ;;  %v974_v29 = vmul.f32 %v3219_v30, %v3974_v53  ;;  %v5225_v1 = vld [vmem:[#allocation18_spill] sm:$0xff] }
 0x2e7   : > { %3226 = vrcp.f32 %v860_v48  ;;  %v933_v63 = vadd.f32 %v4231_v45, %v4225_v6  ;;  %v1537_v30 = vsel %vm262_vm0, %v5225_v1, 0 }
 0x2e8   : > { %v1035_v39 = vpack.c.bf16 %v975_v33, %v973_v54  ;;  %v1034_v62 = vpack.c.bf16 %v974_v29, %v972_v17  ;;  %v3084_v54 = vld [vmem:[%s3521_s11 + $0x78] sm:$0xff]   ;;  %v5226_v33 = vld [vmem:[#allocation21_spill] sm:$0xff] }
 0x2e9   : > { %v3223_v4 = vpop.eup %3222 }
 0x2ea   : > { %1152 = vmatprep.mubr.bf16.mxu1 %v1035_v39  ;;  %v863_v60 = vpop.xlane.xlu0 %862  ;;  %v977_v53 = vmul.f32 %v3223_v4, %v3984_v61  ;;  %v976_v46 = vmul.f32 %v3223_v4, %v3982_v19 }
 0x2eb   : > { %2852 = vmatpush3.bf16.xpose.msra.mxu1 %v1534_v14  ;;  %3228 = vrcp.f32 %v863_v60  ;;  %934 = vadd.xlane.f32.xlu0 %v933_v63  ;;  %v5228_v14 = vld [vmem:[#allocation22_spill] sm:$0xff] }
 0x2ec   : > { %3035 = vmatprep.subr.msk.bf16.mxu1 %vm262_vm0, %v5224_v3  ;;  %1153 = vmatmul.mubr.bf16.gmra.mrb[4].mxu1 %v1034_v62  ;;  %v5227_v62 = vld [vmem:[#allocation20_spill] sm:$0xff]  ;;  %v1543_v60 = vsel %vm262_vm0, %v5228_v14, 0  ;;  %v5229_v3 = vld [vmem:[#allocation23_spill] sm:$0xff] }
 0x2ed   : > { %v3225_v2 = vpop.eup %3224  ;;  %v1540_v63 = vsel %vm262_vm0, %v5227_v62, 0 }
 0x2ee   : > { %v979_v10 = vmul.f32 %v3225_v2, %v3993_v49  ;;  %v978_v37 = vmul.f32 %v3225_v2, %v3989_v24  ;;  %v1475_v11 = vpop.permute.xlu0 %1474  ;;  %v4278_v2 = vld [vmem:[%s3521_s11] sm:$0xff]  }
 0x2f0   : > { %v1037_v7 = vpack.c.bf16 %v979_v10, %v977_v53  ;;  %v1036_v55 = vpack.c.bf16 %v978_v37, %v976_v46  ;;  %v4284_v10 = vld [vmem:[%s3521_s11 + $0x10] sm:$0xff]  }
 0x2f1   : > { %v3227_v48 = vpop.eup %3226 }
 0x2f2   : > { %1160 = vmatprep.mubr.bf16.mxu1 %v1037_v7  ;;  %v981_v49 = vmul.f32 %v3227_v48, %v4004_v59  ;;  %v980_v24 = vmul.f32 %v3227_v48, %v4002_v15  ;;  %v4260_v59 = vld [vmem:[%s3521_s11 + $0x8] sm:$0xff]   ;;  %v1461_v15 = vpop.permute.xlu1 %1460  ;;  %v5230_v48 = vld [vmem:[#allocation24_spill] sm:$0xff] }
 0x2f3   : > { %2854 = vmatpush3.bf16.xpose.msra.mxu1 %v1537_v30  ;;  %v1546_v46 = vsel %vm262_vm0, %v1461_v15, 0  ;;  %v4290_v7 = vld [vmem:[%s3521_s11 + $0x48] sm:$0xff]   ;;  %v4300_v30 = vld [vmem:[%s3521_s11 + $0x58] sm:$0xff]  }
 0x2f4   : > { %3036 = vmatprep.subr.msk.bf16.mxu1 %vm262_vm0, %v5226_v33  ;;  %1161 = vmatmul.mubr.bf16.gmra.mrb[8].mxu1 %v1036_v55  ;;  %v4295_v55 = vld [vmem:[%s3521_s11 + $0x20] sm:$0xff]  }
 0x2f5   : > { %v3229_v61 = vpop.eup %3228 }
 0x2f6   : > { %v983_v19 = vmul.f32 %v3229_v61, %v4012_v47  ;;  %v982_v17 = vmul.f32 %v3229_v61, %v4008_v16  ;;  %v3085_v16 = vld [vmem:[%s3521_s11 + $0x38] sm:$0xff]   ;;  %v1477_v4 = vpop.permute.xlu1 %1476 }
 0x2f7   : > { %1480 = vrot.lane.b32.xlu1 %v3084_v54, %s3494_s14  ;;  %v4267_v47 = vld [vmem:[%s3521_s11 + $0x18] sm:$0xff]  }
 0x2f8   : > { %v1039_v29 = vpack.c.bf16 %v983_v19, %v981_v49  ;;  %v1038_v39 = vpack.c.bf16 %v982_v17, %v980_v24  ;;  %v4309_v49 = vld [vmem:[%s3521_s11 + $0x40] sm:$0xff]  }
 0x2fa   : > { %1168 = vmatprep.mubr.bf16.mxu1 %v1039_v29 }
 0x2fb   : > { %2856 = vmatpush3.bf16.xpose.msra.mxu1 %v1540_v63  ;;  %1420 = vrot.lane.b32.xlu1 %v4260_v59, %s3495_s15 }
 0x2fc   : > { %3037 = vmatprep.subr.msk.bf16.mxu1 %vm262_vm0, %v1475_v11  ;;  %1169 = vmatmul.mubr.bf16.gmra.mrb[12].mxu1 %v1038_v39  ;;  %v4319_v11 = vld [vmem:[%s3521_s11 + $0x50] sm:$0xff]  }
 0x2ff   : > { %1424 = vrot.lane.b32.xlu1 %v4267_v47, %s3495_s15 }
 0x301   : > { %1464 = vrot.lane.b32.xlu0 %v3085_v16, %s3494_s14 }
 0x303   : > { %2858 = vmatpush3.bf16.xpose.msra.mxu1 %v1543_v60  ;;  %1428 = vrot.lane.b32.xlu1 %v5229_v3, %s3495_s15 }
 0x304   : > { %3038 = vmatprep.subr.msk.bf16.mxu1 %vm262_vm0, %v1477_v4 }
 0x305   : > { %1418 = vrot.lane.b32.xlu0 %v4278_v2, %s3495_s15 }
 0x307   : > { %v866_v53 = vpop.xlane.xlu1 %865  ;;  %1432 = vrot.lane.b32.xlu1 %v3085_v16, %s3495_s15 }
 0x308   : > { %3230 = vrcp.f32 %v866_v53 }
 0x309   : > { %1422 = vrot.lane.b32.xlu0 %v4284_v10, %s3495_s15 }
 0x30b   : > { %2860 = vmatpush3.bf16.xpose.msra.mxu1 %v1546_v46  ;;  %v869_v37 = vpop.xlane.xlu1 %868  ;;  %1436 = vrot.lane.b32.xlu1 %v4290_v7, %s3495_s15 }
 0x30c   : > { %3232 = vrcp.f32 %v869_v37 }
 0x30d   : > { %1426 = vrot.lane.b32.xlu0 %v4295_v55, %s3495_s15 }
 0x30f   : > { %v872_v1 = vpop.xlane.xlu1 %871  ;;  %1440 = vrot.lane.b32.xlu1 %v4300_v30, %s3495_s15 }
 0x310   : > { %3234 = vrcp.f32 %v872_v1 }
 0x311   : > { %1430 = vrot.lane.b32.xlu0 %v4207_v18, %s3495_s15 }
 0x312   : > { %v3231_v33 = vpop.eup %3230 }
 0x313   : > { %1444 = vrot.lane.b32.xlu1 %v5230_v48, %s3495_s15  ;;  %v878_v61 = vpop.xlane.xlu1 %877  ;;  %v985_v24 = vmul.f32 %v3231_v33, %v4033_v22  ;;  %v984_v29 = vmul.f32 %v3231_v33, %v4031_v38 }
 0x315   : > { %1434 = vrot.lane.b32.xlu0 %v4309_v49, %s3495_s15 }
 0x316   : > { %v3233_v19 = vpop.eup %3232 }
 0x317   : > { %v987_v17 = vmul.f32 %v3233_v19, %v4042_v41  ;;  %v986_v39 = vmul.f32 %v3233_v19, %v4037_v26  ;;  %1448 = vrot.lane.b32.xlu1 %v3084_v54, %s3495_s15  ;;  %v884_v15 = vpop.xlane.xlu1 %883 }
 0x319   : > { %v1041_v62 = vpack.c.bf16 %v987_v17, %v985_v24  ;;  %v1040_v63 = vpack.c.bf16 %v986_v39, %v984_v29  ;;  %1438 = vrot.lane.b32.xlu0 %v4319_v11, %s3495_s15 }
 0x31a   : > { %v3235_v16 = vpop.eup %3234 }
 0x31b   : > { %1176 = vmatprep.mubr.bf16.mxu1 %v1041_v62  ;;  %v890_v38 = vpop.xlane.xlu1 %889  ;;  %v988_v53 = vmul.f32 %v3235_v16, %v4049_v21  ;;  %2299 = vrot.lane.b32.xlu1 %v4309_v49, %s3496_s16 }
 0x31c   : > { %1177 = vmatmul.mubr.bf16.gmra.mrb[16].mxu1 %v1040_v63 }
 0x31d   : > { %1442 = vrot.lane.b32.xlu0 %v4025_v9, %s3495_s15  ;;  %v989_v9 = vmul.f32 %v3235_v16, %v4054_v36 }
 0x31f   : > { %v875_v22 = vpop.xlane.xlu0 %874  ;;  %v896_v41 = vpop.xlane.xlu1 %895  ;;  %2301 = vrot.lane.b32.xlu1 %v4290_v7, %s3496_s16 }
 0x320   : > { %3236 = vrcp.f32 %v875_v22 }
 0x321   : > { %1446 = vrot.lane.b32.xlu0 %v4202_v35, %s3495_s15  ;;  %3238 = vrcp.f32 %v878_v61 }
 0x323   : > { %v881_v26 = vpop.xlane.xlu0 %880  ;;  %v902_v4 = vpop.xlane.xlu1 %901  ;;  %2303 = vrot.lane.b32.xlu1 %v4319_v11, %s3496_s16 }
 0x324   : > { %3240 = vrcp.f32 %v881_v26 }
 0x325   : > { %3242 = vrcp.f32 %v884_v15  ;;  %2283 = vrot.lane.b32.xlu0 %v4278_v2, %s3496_s16 }
 0x327   : > { %v887_v54 = vpop.xlane.xlu0 %886  ;;  %v908_v17 = vpop.xlane.xlu1 %907  ;;  %2305 = vrot.lane.b32.xlu1 %v4300_v30, %s3496_s16 }
 0x328   : > { %3244 = vrcp.f32 %v887_v54 }
 0x329   : > { %2285 = vrot.lane.b32.xlu0 %v4260_v59, %s3496_s16 }
 0x32a   : > { %v3237_v14 = vpop.eup %3236 }
 0x32b   : > { %v893_v60 = vpop.xlane.xlu0 %892  ;;  %v991_v3 = vmul.f32 %v3237_v14, %v4089_v13  ;;  %v990_v46 = vmul.f32 %v3237_v14, %v4086_v44  ;;  %v3239_v37 = vpop.eup %3238 }
 0x32c   : > { %3246 = vrcp.f32 %v893_v60  ;;  %v993_v19 = vmul.f32 %v3239_v37, %v4063_v27  ;;  %v992_v62 = vmul.f32 %v3239_v37, %v4059_v40 }
 0x32d   : > { %v1043_v1 = vpack.c.bf16 %v991_v3, %v989_v9  ;;  %v1042_v48 = vpack.c.bf16 %v990_v46, %v988_v53  ;;  %3248 = vrcp.f32 %v890_v38  ;;  %2287 = vrot.lane.b32.xlu0 %v4284_v10, %s3496_s16 }
 0x32e   : > { %v3241_v33 = vpop.eup %3240  ;;  %v914_v63 = vpop.xlane.xlu1 %913 }
 0x32f   : > { %v899_v61 = vpop.xlane.xlu0 %898  ;;  %1184 = vmatprep.mubr.bf16.mxu1 %v1043_v1  ;;  %v995_v24 = vmul.f32 %v3241_v33, %v4101_v51  ;;  %v3243_v36 = vpop.eup %3242  ;;  %v994_v44 = vmul.f32 %v3241_v33, %v4098_v28 }
 0x330   : > { %1185 = vmatmul.mubr.bf16.gmra.mrb[20].mxu1 %v1042_v48  ;;  %v997_v15 = vmul.f32 %v3243_v36, %v4071_v20  ;;  %3250 = vrcp.f32 %v899_v61  ;;  %v996_v40 = vmul.f32 %v3243_v36, %v4067_v50 }
 0x331   : > { %v1045_v13 = vpack.c.bf16 %v995_v24, %v993_v19  ;;  %v1044_v51 = vpack.c.bf16 %v994_v44, %v992_v62  ;;  %3252 = vrcp.f32 %v896_v41  ;;  %v5233_v62 = vld [vmem:[#allocation27_spill] sm:$0xff]  ;;  %2289 = vrot.lane.b32.xlu0 %v4267_v47, %s3496_s16 }
 0x332   : > { %v3245_v29 = vpop.eup %3244 }
 0x333   : > { %v905_v21 = vpop.xlane.xlu0 %904  ;;  %1192 = vmatprep.mubr.bf16.mxu1 %v1045_v13  ;;  %v999_v39 = vmul.f32 %v3245_v29, %v4117_v52  ;;  %v998_v28 = vmul.f32 %v3245_v29, %v4115_v56 }
 0x334   : > { %3254 = vrcp.f32 %v905_v21  ;;  %v5231_v21 = vld [vmem:[#allocation5_spill] sm:$0xff] }
 0x335   : > { %v1047_v22 = vpack.c.bf16 %v999_v39, %v997_v15  ;;  %v1046_v9 = vpack.c.bf16 %v998_v28, %v996_v40  ;;  %3256 = vrcp.f32 %v902_v4  ;;  %v5232_v39 = vld [vmem:[#allocation25_spill] sm:$0xff] }
 0x336   : > { %v3247_v38 = vpop.eup %3246  ;;  %v920_v26 = vpop.xlane.xlu1 %919 }
 0x337   : > { %v911_v27 = vpop.xlane.xlu0 %910  ;;  %v3249_v54 = vpop.eup %3248  ;;  %v1003_v52 = vmul.f32 %v3247_v38, %v4137_v43  ;;  %v1002_v43 = vmul.f32 %v3247_v38, %v4133_v0 }
 0x338   : > { %1193 = vmatmul.mubr.bf16.gmra.mrb[24].mxu1 %v1044_v51  ;;  %v1001_v20 = vmul.f32 %v3249_v54, %v4084_v57  ;;  %v1000_v37 = vmul.f32 %v3249_v54, %v4079_v25  ;;  %3258 = vrcp.f32 %v911_v27  ;;  %v5236_v54 = vld [vmem:[#allocation26_spill] sm:$0xff] }
 0x339   : > { %1200 = vmatprep.mubr.bf16.mxu1 %v1047_v22  ;;  %3260 = vrcp.f32 %v908_v17  ;;  %v5235_v22 = vld [vmem:[#allocation9_spill] sm:$0xff] }
 0x33a   : > { %v1049_v3 = vpack.c.bf16 %v1003_v52, %v1001_v20  ;;  %v3251_v53 = vpop.eup %3250  ;;  %v1048_v48 = vpack.c.bf16 %v1002_v43, %v1000_v37  ;;  %v5241_v43 = vld [vmem:[#allocation7_spill] sm:$0xff] }
 0x33b   : > { %v917_v16 = vpop.xlane.xlu0 %916  ;;  %v3253_v46 = vpop.eup %3252  ;;  %v1007_v50 = vmul.f32 %v3251_v53, %v4143_v32  ;;  %v1006_v0 = vmul.f32 %v3251_v53, %v4140_v31 }
 0x33c   : > { %v1005_v57 = vmul.f32 %v3253_v46, %v4095_v42  ;;  %v1004_v25 = vmul.f32 %v3253_v46, %v4091_v58  ;;  %3262 = vrcp.f32 %v917_v16  ;;  %v5237_v16 = vld [vmem:[#allocation3_spill] sm:$0xff] }
 0x33d   : > { %3264 = vrcp.f32 %v914_v63  ;;  %v5234_v63 = vld [vmem:[#allocation4_spill] sm:$0xff] }
 0x33e   : > { %v926_v14 = vpop.xlane.xlu1 %925  ;;  %v1051_v33 = vpack.c.bf16 %v1007_v50, %v1005_v57  ;;  %v3255_v61 = vpop.eup %3254  ;;  %v1050_v24 = vpack.c.bf16 %v1006_v0, %v1004_v25  ;;  %v5245_v0 = vld [vmem:[#allocation30_spill] sm:$0xff] }
 0x33f   : > { %v923_v60 = vpop.xlane.xlu0 %922  ;;  %v3257_v19 = vpop.eup %3256  ;;  %v1011_v32 = vmul.f32 %v3255_v61, %v4157_v12  ;;  %v1010_v29 = vmul.f32 %v3255_v61, %v4151_v34  ;;  %v5244_v61 = vld [vmem:[#allocation6_spill] sm:$0xff] }
 0x340   : > { %1201 = vmatmul.mubr.bf16.gmra.mrb[28].mxu1 %v1046_v9  ;;  %v1009_v42 = vmul.f32 %v3257_v19, %v4111_v5  ;;  %v1008_v31 = vmul.f32 %v3257_v19, %v5232_v39  ;;  %3266 = vrcp.f32 %v923_v60 }
 0x341   : > { %1208 = vmatprep.mubr.bf16.mxu1 %v1049_v3  ;;  %3268 = vrcp.f32 %v920_v26  ;;  %v5238_v26 = vld [vmem:[#allocation8_spill] sm:$0xff] }
 0x342   : > { %v1479_v41 = vpop.permute.xlu1 %1478  ;;  %v1053_v36 = vpack.c.bf16 %v1011_v32, %v1009_v42  ;;  %v3259_v13 = vpop.eup %3258  ;;  %v1052_v58 = vpack.c.bf16 %v1010_v29, %v1008_v31  ;;  %v5239_v3 = vld [vmem:[#allocation28_spill] sm:$0xff] }
 0x343   : > { %3039 = vmatprep.subr.msk.bf16.mxu1 %vm262_vm0, %v1479_v41  ;;  %v929_v56 = vpop.xlane.xlu0 %928  ;;  %v3261_v17 = vpop.eup %3260  ;;  %v1015_v44 = vmul.f32 %v3259_v13, %v5231_v21  ;;  %v1014_v51 = vmul.f32 %v3259_v13, %v5234_v63  ;;  %v5240_v41 = vld [vmem:[#allocation2_spill] sm:$0xff] }
 0x344   : > { %v1013_v12 = vmul.f32 %v3261_v17, %v5233_v62  ;;  %v1012_v34 = vmul.f32 %v3261_v17, %v5236_v54  ;;  %3270 = vrcp.f32 %v929_v56  ;;  %v5247_v17 = vld [vmem:[#allocation29_spill] sm:$0xff] }
 0x345   : > { %3272 = vrcp.f32 %v926_v14  ;;  %v5243_v14 = vld [vmem:[#allocation32_spill] sm:$0xff] }
 0x346   : > { %v1055_v15 = vpack.c.bf16 %v1015_v44, %v1013_v12  ;;  %v3263_v5 = vpop.eup %3262  ;;  %v1054_v52 = vpack.c.bf16 %v1014_v51, %v1012_v34 }
 0x347   : > { %v1463_v1 = vpop.permute.xlu0 %1462  ;;  %v3265_v27 = vpop.eup %3264  ;;  %v1019_v38 = vmul.f32 %v3263_v5, %v5235_v22  ;;  %v1018_v9 = vmul.f32 %v3263_v5, %v5238_v26 }
 0x348   : > { %v1549_v4 = vsel %vm262_vm0, %v1463_v1, 0  ;;  %1209 = vmatmul.mubr.bf16.gmra.mrb[32].mxu1 %v1048_v48  ;;  %v1017_v28 = vmul.f32 %v3265_v27, %v5237_v16  ;;  %v1016_v46 = vmul.f32 %v3265_v27, %v5240_v41  ;;  %v5242_v48 = vld [vmem:[#allocation10_spill] sm:$0xff] }
 0x349   : > { %1216 = vmatprep.mubr.bf16.mxu1 %v1051_v33  ;;  %2862 = vmatpush3.bf16.xpose.msra.mxu1 %v1549_v4 }
 0x34a   : > { %v1057_v40 = vpack.c.bf16 %v1019_v38, %v1017_v28  ;;  %v3267_v20 = vpop.eup %3266  ;;  %v1056_v37 = vpack.c.bf16 %v1018_v9, %v1016_v46 }
 0x34b   : > { %v3269_v60 = vpop.eup %3268  ;;  %v1023_v53 = vmul.f32 %v3267_v20, %v5239_v3  ;;  %v1022_v4 = vmul.f32 %v3267_v20, %v5242_v48 }
 0x34c   : > { %v1021_v50 = vmul.f32 %v3269_v60, %v5241_v43  ;;  %v1020_v19 = vmul.f32 %v3269_v60, %v5244_v61 }
 0x34e   : > { %v1059_v57 = vpack.c.bf16 %v1023_v53, %v1021_v50  ;;  %v3271_v1 = vpop.eup %3270  ;;  %v1058_v25 = vpack.c.bf16 %v1022_v4, %v1020_v19  ;;  %v3481_v53 = vld [vmem:[%s3521_s11 + $0x28] sm:$0xff]  }
 0x34f   : > { %v3273_v56 = vpop.eup %3272  ;;  %v1027_v33 = vmul.f32 %v3271_v1, %v5243_v14 }
 0x350   : > { %1217 = vmatmul.mubr.bf16.gmra.mrb[36].mxu1 %v1050_v24  ;;  %v1025_v32 = vmul.f32 %v3273_v56, %v5245_v0  ;;  %v1024_v29 = vmul.f32 %v3273_v56, %v5247_v17 }
 0x351   : > { %1224 = vmatprep.mubr.bf16.mxu1 %v1053_v36  ;;  %v5246_v36 = vld [vmem:[#allocation31_spill] sm:$0xff] }
 0x352   : > { %v1061_v42 = vpack.c.bf16 %v1027_v33, %v1025_v32  ;;  %v1026_v13 = vmul.f32 %v3271_v1, %v5246_v36 }
 0x354   : > { %v1060_v21 = vpack.c.bf16 %v1026_v13, %v1024_v29 }
 0x358   : > { %1225 = vmatmul.mubr.bf16.gmra.mrb[40].mxu1 %v1052_v58 }
 0x359   : > { %1232 = vmatprep.mubr.bf16.mxu1 %v1055_v15 }
 0x360   : > { %1233 = vmatmul.mubr.bf16.gmra.mrb[44].mxu1 %v1054_v52  ;;  %v3479_v52 = vld [vmem:[%s3521_s11 + $0x60] sm:$0xff]  }
 0x361   : > { %1240 = vmatprep.mubr.bf16.mxu1 %v1057_v40  ;;  %2307 = vrot.lane.b32.xlu0 %v3479_v52, %s3496_s16  ;;  %v3480_v40 = vld [vmem:[%s3521_s11 + $0x68] sm:$0xff]  }
 0x362   : > { %2309 = vrot.lane.b32.xlu1 %v3480_v40, %s3496_s16 }
 0x365   : > { %2291 = vrot.lane.b32.xlu0 %v4295_v55, %s3496_s16 }
 0x366   : > { %2295 = vrot.lane.b32.xlu1 %v4207_v18, %s3496_s16 }
 0x368   : > { %1241 = vmatmul.mubr.bf16.gmra.mrb[48].mxu1 %v1056_v37 }
 0x369   : > { %1248 = vmatprep.mubr.bf16.mxu1 %v1059_v57  ;;  %2293 = vrot.lane.b32.xlu0 %v3481_v53, %s3496_s16 }
 0x36d   : > { %2311 = vrot.lane.b32.xlu0 %v4202_v35, %s3496_s16 }
 0x370   : > { %1249 = vmatmul.mubr.bf16.gmra.mrb[52].mxu1 %v1058_v25 }
 0x371   : > { %1256 = vmatprep.mubr.bf16.mxu1 %v1061_v42 }
 0x373   : > { %v932_v24 = vpop.xlane.xlu1 %931 }
 0x374   : > { %3274 = vrcp.f32 %v932_v24 }
 0x377   : > { %v1481_v44 = vpop.permute.xlu1 %1480 }
 0x378   : > { %v935_v39 = vpop.xlane.xlu0 %934  ;;  %3040 = vmatprep.subr.msk.bf16.mxu1 %vm262_vm0, %v1481_v44  ;;  %1257 = vmatmul.mubr.bf16.gmra.mrb[56].mxu1 %v1060_v21 }
 0x379   : > { %3276 = vrcp.f32 %v935_v39 }
 0x37b   : > { %v1421_v54 = vpop.permute.xlu1 %1420 }
 0x37c   : > { %v1465_v31 = vpop.permute.xlu0 %1464 }
 0x37d   : > { %v1552_v62 = vsel %vm262_vm0, %v1465_v31, 0 }
 0x37e   : > { %2864 = vmatpush3.bf16.xpose.msra.mxu1 %v1552_v62  ;;  %v3275_v12 = vpop.eup %3274 }
 0x37f   : > { %v1029_v15 = vmul.f32 %v3275_v12, %v4221_v23  ;;  %v1028_v27 = vmul.f32 %v3275_v12, %v4219_v8  ;;  %v1425_v8 = vpop.permute.xlu1 %1424 }
 0x380   : > { %v1419_v38 = vpop.permute.xlu0 %1418 }
 0x383   : > { %v3277_v58 = vpop.eup %3276 }
 0x384   : > { %v1031_v5 = vmul.f32 %v3277_v58, %v4231_v45  ;;  %v1030_v63 = vmul.f32 %v3277_v58, %v4225_v6  ;;  %v1423_v23 = vpop.permute.xlu0 %1422  ;;  %v1429_v45 = vpop.permute.xlu1 %1428 }
 0x386   : > { %v1063_v51 = vpack.c.bf16 %v1031_v5, %v1029_v15  ;;  %v1062_v22 = vpack.c.bf16 %v1030_v63, %v1028_v27 }
 0x388   : > { %1264 = vmatprep.mubr.bf16.mxu1 %v1063_v51  ;;  %v1427_v6 = vpop.permute.xlu0 %1426  ;;  %v1433_v11 = vpop.permute.xlu1 %1432 }
 0x389   : > { %1265 = vmatmul.mubr.bf16.gmra.mrb[60].mxu1 %v1062_v22 }
 0x38a   : > { %2865 = vmatprep.mubr.msk.bf16.mxu1 %vm262_vm0, %v1419_v38 }
 0x38c   : > { %v1431_v28 = vpop.permute.xlu0 %1430  ;;  %v1437_v37 = vpop.permute.xlu1 %1436 }
 0x390   : > { %v1435_v3 = vpop.permute.xlu0 %1434  ;;  %v1441_v35 = vpop.permute.xlu1 %1440 }
 0x391   : > { %2866 = vmatmul.mubr.msk.bf16.vlgmr.msra.gmra.mrb[64].mxu1 %vm262_vm0, %v1419_v38 }
 0x392   : > { %2867 = vmatprep.mubr.msk.bf16.mxu1 %vm262_vm0, %v1421_v54 }
 0x394   : > { %v1439_v14 = vpop.permute.xlu0 %1438  ;;  %v1445_v19 = vpop.permute.xlu1 %1444 }
 0x398   : > { %v1443_v33 = vpop.permute.xlu0 %1442  ;;  %v1449_v13 = vpop.permute.xlu1 %1448 }
 0x399   : > { %2868 = vmatmul.mubr.msk.bf16.gmra.mrb[68].mxu1 %vm262_vm0, %v1421_v54 }
 0x39a   : > { %2869 = vmatprep.mubr.msk.bf16.mxu1 %vm262_vm0, %v1423_v23 }
 0x39c   : > { %v1447_v36 = vpop.permute.xlu0 %1446 }
 0x3a1   : > { %2870 = vmatmul.mubr.msk.bf16.gmra.mrb[72].mxu1 %vm262_vm0, %v1423_v23 }
 0x3a2   : > { %2871 = vmatprep.mubr.msk.bf16.mxu1 %vm262_vm0, %v1425_v8 }
 0x3a9   : > { %2872 = vmatmul.mubr.msk.bf16.gmra.mrb[76].mxu1 %vm262_vm0, %v1425_v8 }
 0x3aa   : > { %2873 = vmatprep.mubr.msk.bf16.mxu1 %vm262_vm0, %v1427_v6 }
 0x3b1   : > { %2874 = vmatmul.mubr.msk.bf16.gmra.mrb[80].mxu1 %vm262_vm0, %v1427_v6 }
 0x3b2   : > { %2875 = vmatprep.mubr.msk.bf16.mxu1 %vm262_vm0, %v1429_v45 }
 0x3b5   : > { %v2753_v34 = vpop.f32.mrb[0].mxu1 }
 0x3b6   : > { %v2754_v2 = vpop.f32.mrb[1].mxu1 }
 0x3b7   : > { %v2755_v49 = vadd.f32 %v2754_v2, %v2753_v34  ;;  %v2756_v16 = vpop.f32.mrb[2].mxu1 }
 0x3b8   : > { %v2757_v59 = vpop.f32.mrb[3].mxu1 }
 0x3b9   : > { %1274 = vst.msk [vmem:[%s4398_s20] sm:$0xff] %vm1273_vm1, %v2755_v49  ;;  %v2758_v7 = vadd.f32 %v2757_v59, %v2756_v16  ;;  %2876 = vmatmul.mubr.msk.bf16.gmra.mrb[84].mxu1 %vm262_vm0, %v1429_v45  ;;  %v2300_v16 = vpop.permute.xlu1 %2299 }
 0x3ba   : > { %2877 = vmatprep.mubr.msk.bf16.mxu1 %vm262_vm0, %v1431_v28  ;;  %2897 = vmatprep.subr.bf16.mxu0 %v2300_v16 }
 0x3bb   : > { %1275 = vst.msk [vmem:[%s4398_s20 + $0x8] sm:$0xff] %vm1273_vm1, %v2758_v7  ;;  %3009 = vmatprep.subr.bf16.mxu1 %v2300_v16 }
 0x3bf   : > { %v2759_v10 = vpop.f32.mrb[4].mxu1 }
 0x3c0   : > { %v2760_v20 = vpop.f32.mrb[5].mxu1 }
 0x3c1   : > { %v2761_v60 = vadd.f32 %v2760_v20, %v2759_v10  ;;  %v2762_v26 = vpop.f32.mrb[6].mxu1  ;;  %2878 = vmatmul.mubr.msk.bf16.gmra.mrb[88].mxu1 %vm262_vm0, %v1431_v28  ;;  %v2302_v20 = vpop.permute.xlu1 %2301 }
 0x3c2   : > { %v2763_v9 = vpop.f32.mrb[7].mxu1  ;;  %2879 = vmatprep.mubr.msk.bf16.mxu1 %vm262_vm0, %v1433_v11 }
 0x3c3   : > { %1276 = vst.msk [vmem:[%s4398_s20 + $0x10] sm:$0xff] %vm1273_vm1, %v2761_v60  ;;  %v2764_v47 = vadd.f32 %v2763_v9, %v2762_v26 }
 0x3c5   : > { %1277 = vst.msk [vmem:[%s4398_s20 + $0x18] sm:$0xff] %vm1273_vm1, %v2764_v47  ;;  %v2304_v9 = vpop.permute.xlu1 %2303 }
 0x3c7   : > { %v2765_v30 = vpop.f32.mrb[8].mxu1 }
 0x3c8   : > { %v2766_v41 = vpop.f32.mrb[9].mxu1 }
 0x3c9   : > { %v2767_v46 = vadd.f32 %v2766_v41, %v2765_v30  ;;  %v2768_v43 = vpop.f32.mrb[10].mxu1  ;;  %2880 = vmatmul.mubr.msk.bf16.gmra.mrb[92].mxu1 %vm262_vm0, %v1433_v11  ;;  %v2284_v11 = vpop.permute.xlu0 %2283 }
 0x3ca   : > { %v2769_v50 = vpop.f32.mrb[11].mxu1  ;;  %2881 = vmatprep.mubr.msk.bf16.mxu1 %vm262_vm0, %v1435_v3  ;;  %2898 = vmatpush3.bf16.msra.mxu0 %v2284_v11 }
 0x3cb   : > { %1278 = vst.msk [vmem:[%s4398_s20 + $0x20] sm:$0xff] %vm1273_vm1, %v2767_v46  ;;  %v2770_v18 = vadd.f32 %v2769_v50, %v2768_v43  ;;  %3017 = vmatpush3.bf16.msra.mxu1 %v2284_v11  ;;  %2899 = vmatprep.subr.bf16.mxu0 %v2302_v20  ;;  %v2306_v43 = vpop.permute.xlu1 %2305 }
 0x3cc   : > { %3010 = vmatprep.subr.bf16.mxu1 %v2302_v20 }
 0x3cd   : > { %1279 = vst.msk [vmem:[%s4398_s20 + $0x28] sm:$0xff] %vm1273_vm1, %v2770_v18  ;;  %v2286_v60 = vpop.permute.xlu0 %2285 }
 0x3ce   : > { %2900 = vmatpush3.bf16.msra.mxu0 %v2286_v60 }
 0x3cf   : > { %v2771_v55 = vpop.f32.mrb[12].mxu1  ;;  %3018 = vmatpush3.bf16.msra.mxu1 %v2286_v60  ;;  %2901 = vmatprep.subr.bf16.mxu0 %v2304_v9 }
 0x3d0   : > { %v2772_v57 = vpop.f32.mrb[13].mxu1  ;;  %3011 = vmatprep.subr.bf16.mxu1 %v2304_v9 }
 0x3d1   : > { %v2773_v1 = vadd.f32 %v2772_v57, %v2771_v55  ;;  %v2774_v56 = vpop.f32.mrb[14].mxu1  ;;  %2882 = vmatmul.mubr.msk.bf16.gmra.mrb[96].mxu1 %vm262_vm0, %v1435_v3  ;;  %v2288_v53 = vpop.permute.xlu0 %2287 }
 0x3d2   : > { %v2775_v48 = vpop.f32.mrb[15].mxu1  ;;  %2883 = vmatprep.mubr.msk.bf16.mxu1 %vm262_vm0, %v1437_v37  ;;  %2902 = vmatpush3.bf16.msra.mxu0 %v2288_v53 }
 0x3d3   : > { %1280 = vst.msk [vmem:[%s4398_s20 + $0x30] sm:$0xff] %vm1273_vm1, %v2773_v1  ;;  %v2776_v4 = vadd.f32 %v2775_v48, %v2774_v56  ;;  %3019 = vmatpush3.bf16.msra.mxu1 %v2288_v53  ;;  %2903 = vmatprep.subr.bf16.mxu0 %v2306_v43 }
 0x3d4   : > { %3012 = vmatprep.subr.bf16.mxu1 %v2306_v43 }
 0x3d5   : > { %1281 = vst.msk [vmem:[%s4398_s20 + $0x38] sm:$0xff] %vm1273_vm1, %v2776_v4  ;;  %v2290_v50 = vpop.permute.xlu0 %2289 }
 0x3d6   : > { %2904 = vmatpush3.bf16.msra.mxu0 %v2290_v50 }
 0x3d7   : > { %3020 = vmatpush3.bf16.msra.mxu1 %v2290_v50 }
 0x3d9   : > { %2884 = vmatmul.mubr.msk.bf16.gmra.mrb[100].mxu1 %vm262_vm0, %v1437_v37  ;;  %v2308_v1 = vpop.permute.xlu0 %2307 }
 0x3da   : > { %2885 = vmatprep.mubr.msk.bf16.mxu1 %vm262_vm0, %v1439_v14  ;;  %2905 = vmatprep.subr.bf16.mxu0 %v2308_v1 }
 0x3db   : > { %3013 = vmatprep.subr.bf16.mxu1 %v2308_v1 }
 0x3dd   : > { %v2292_v4 = vpop.permute.xlu0 %2291 }
 0x3de   : > { %2906 = vmatpush3.bf16.msra.mxu0 %v2292_v4  ;;  %3021 = vmatpush3.bf16.msra.mxu1 %v2292_v4 }
 0x3e1   : > { %2886 = vmatmul.mubr.msk.bf16.gmra.mrb[104].mxu1 %vm262_vm0, %v1439_v14  ;;  %v2310_v14 = vpop.permute.xlu1 %2309 }
 0x3e2   : > { %2887 = vmatprep.mubr.msk.bf16.mxu1 %vm262_vm0, %v1441_v35  ;;  %2907 = vmatprep.subr.bf16.mxu0 %v2310_v14 }
 0x3e3   : > { %3014 = vmatprep.subr.bf16.mxu1 %v2310_v14 }
 0x3e9   : > { %2888 = vmatmul.mubr.msk.bf16.gmra.mrb[108].mxu1 %vm262_vm0, %v1441_v35 }
 0x3ea   : > { %2889 = vmatprep.mubr.msk.bf16.mxu1 %vm262_vm0, %v1443_v33 }
 0x3ef   : > { %v2777_v61 = vpop.f32.mrb[16].mxu1 }
 0x3f0   : > { %v2778_v0 = vpop.f32.mrb[17].mxu1 }
 0x3f1   : > { %v2779_v32 = vadd.f32 %v2778_v0, %v2777_v61  ;;  %v2780_v25 = vpop.f32.mrb[18].mxu1  ;;  %2890 = vmatmul.mubr.msk.bf16.gmra.mrb[112].mxu1 %vm262_vm0, %v1443_v33  ;;  %v2294_v0 = vpop.permute.xlu0 %2293 }
 0x3f2   : > { %v2781_v42 = vpop.f32.mrb[19].mxu1  ;;  %2891 = vmatprep.mubr.msk.bf16.mxu1 %vm262_vm0, %v1445_v19  ;;  %2908 = vmatpush3.bf16.msra.mxu0 %v2294_v0 }
 0x3f3   : > { %1282 = vst.msk [vmem:[%s4398_s20 + $0x40] sm:$0xff] %vm1273_vm1, %v2779_v32  ;;  %v2782_v24 = vadd.f32 %v2781_v42, %v2780_v25  ;;  %3022 = vmatpush3.bf16.msra.mxu1 %v2294_v0  ;;  %v2296_v42 = vpop.permute.xlu1 %2295 }
 0x3f5   : > { %1283 = vst.msk [vmem:[%s4398_s20 + $0x48] sm:$0xff] %vm1273_vm1, %v2782_v24  ;;  %v2312_v24 = vpop.permute.xlu0 %2311 }
 0x3f6   : > { %2909 = vmatprep.subr.bf16.mxu0 %v2312_v24  ;;  %3015 = vmatprep.subr.bf16.mxu1 %v2312_v24 }
 0x3f7   : > { %2910 = vmatpush3.bf16.msra.mxu0 %v2296_v42  ;;  %3023 = vmatpush3.bf16.msra.mxu1 %v2296_v42 }
 0x3f9   : > { %2892 = vmatmul.mubr.msk.bf16.gmra.mrb[116].mxu1 %vm262_vm0, %v1445_v19 }
 0x3fa   : > { %2893 = vmatprep.mubr.msk.bf16.mxu1 %vm262_vm0, %v1447_v36 }
 0x401   : > { %2894 = vmatmul.mubr.msk.bf16.gmra.mrb[120].mxu1 %vm262_vm0, %v1447_v36 }
 0x402   : > { %2895 = vmatprep.mubr.msk.bf16.mxu1 %vm262_vm0, %v1449_v13 }
 0x403   : > { %v2783_v17 = vpop.f32.mrb[20].mxu1 }
 0x404   : > { %v2784_v29 = vpop.f32.mrb[21].mxu1 }
 0x405   : > { %v2785_v21 = vadd.f32 %v2784_v29, %v2783_v17  ;;  %v2786_v44 = vpop.f32.mrb[22].mxu1 }
 0x406   : > { %v2787_v39 = vpop.f32.mrb[23].mxu1 }
 0x407   : > { %1284 = vst.msk [vmem:[%s4398_s20 + $0x50] sm:$0xff] %vm1273_vm1, %v2785_v21  ;;  %v2788_v31 = vadd.f32 %v2787_v39, %v2786_v44 }
 0x409   : > { %2896 = vmatmul.mubr.msk.bf16.gmra.mrb[124].mxu1 %vm262_vm0, %v1449_v13  ;;  %1285 = vst.msk [vmem:[%s4398_s20 + $0x58] sm:$0xff] %vm1273_vm1, %v2788_v31 }
 0x40b   : > { %v2789_v62 = vpop.f32.mrb[24].mxu1 }
 0x40c   : > { %v2790_v12 = vpop.f32.mrb[25].mxu1 }
 0x40d   : > { %v2791_v58 = vadd.f32 %v2790_v12, %v2789_v62  ;;  %v2792_v15 = vpop.f32.mrb[26].mxu1 }
 0x40e   : > { %v2793_v5 = vpop.f32.mrb[27].mxu1 }
 0x40f   : > { %1286 = vst.msk [vmem:[%s4398_s20 + $0x60] sm:$0xff] %vm1273_vm1, %v2791_v58  ;;  %v2794_v27 = vadd.f32 %v2793_v5, %v2792_v15 }
 0x411   : > { %1287 = vst.msk [vmem:[%s4398_s20 + $0x68] sm:$0xff] %vm1273_vm1, %v2794_v27 }
 0x413   : > { %v2795_v63 = vpop.f32.mrb[28].mxu1 }
 0x414   : > { %v2796_v51 = vpop.f32.mrb[29].mxu1 }
 0x415   : > { %v2797_v22 = vadd.f32 %v2796_v51, %v2795_v63  ;;  %v2798_v38 = vpop.f32.mrb[30].mxu1 }
 0x416   : > { %v2799_v54 = vpop.f32.mrb[31].mxu1 }
 0x417   : > { %1288 = vst.msk [vmem:[%s4398_s20 + $0x70] sm:$0xff] %vm1273_vm1, %v2797_v22  ;;  %v2800_v23 = vadd.f32 %v2799_v54, %v2798_v38 }
 0x419   : > { %1289 = vst.msk [vmem:[%s4398_s20 + $0x78] sm:$0xff] %vm1273_vm1, %v2800_v23 }
 0x41b   : > { %v2801_v8 = vpop.f32.mrb[32].mxu1 }
 0x41c   : > { %v2802_v6 = vpop.f32.mrb[33].mxu1 }
 0x41d   : > { %v2803_v45 = vadd.f32 %v2802_v6, %v2801_v8  ;;  %v2804_v34 = vpop.f32.mrb[34].mxu1 }
 0x41e   : > { %v2805_v2 = vpop.f32.mrb[35].mxu1 }
 0x41f   : > { %1290 = vst.msk [vmem:[%s4398_s20 + $0x80] sm:$0xff] %vm1273_vm1, %v2803_v45  ;;  %v2806_v49 = vadd.f32 %v2805_v2, %v2804_v34 }
 0x421   : > { %1291 = vst.msk [vmem:[%s4398_s20 + $0x88] sm:$0xff] %vm1273_vm1, %v2806_v49 }
 0x423   : > { %v2807_v28 = vpop.f32.mrb[36].mxu1 }
 0x424   : > { %v2808_v59 = vpop.f32.mrb[37].mxu1 }
 0x425   : > { %v2809_v7 = vadd.f32 %v2808_v59, %v2807_v28  ;;  %v2810_v10 = vpop.f32.mrb[38].mxu1 }
 0x426   : > { %v2811_v52 = vpop.f32.mrb[39].mxu1 }
 0x427   : > { %1292 = vst.msk [vmem:[%s4398_s20 + $0x90] sm:$0xff] %vm1273_vm1, %v2809_v7  ;;  %v2812_v40 = vadd.f32 %v2811_v52, %v2810_v10 }
 0x429   : > { %1293 = vst.msk [vmem:[%s4398_s20 + $0x98] sm:$0xff] %vm1273_vm1, %v2812_v40 }
 0x42b   : > { %v2813_v26 = vpop.f32.mrb[40].mxu1 }
 0x42c   : > { %v2814_v47 = vpop.f32.mrb[41].mxu1 }
 0x42d   : > { %v2815_v30 = vadd.f32 %v2814_v47, %v2813_v26  ;;  %v2816_v3 = vpop.f32.mrb[42].mxu1 }
 0x42e   : > { %v2817_v41 = vpop.f32.mrb[43].mxu1 }
 0x42f   : > { %1294 = vst.msk [vmem:[%s4398_s20 + $0xa0] sm:$0xff] %vm1273_vm1, %v2815_v30  ;;  %v2818_v46 = vadd.f32 %v2817_v41, %v2816_v3 }
 0x431   : > { %1295 = vst.msk [vmem:[%s4398_s20 + $0xa8] sm:$0xff] %vm1273_vm1, %v2818_v46 }
 0x433   : > { %v2819_v18 = vpop.f32.mrb[44].mxu1 }
 0x434   : > { %v2820_v55 = vpop.f32.mrb[45].mxu1 }
 0x435   : > { %v2821_v37 = vadd.f32 %v2820_v55, %v2819_v18  ;;  %v2822_v57 = vpop.f32.mrb[46].mxu1 }
 0x436   : > { %v2823_v56 = vpop.f32.mrb[47].mxu1 }
 0x437   : > { %1296 = vst.msk [vmem:[%s4398_s20 + $0xb0] sm:$0xff] %vm1273_vm1, %v2821_v37  ;;  %v2824_v48 = vadd.f32 %v2823_v56, %v2822_v57 }
 0x439   : > { %1297 = vst.msk [vmem:[%s4398_s20 + $0xb8] sm:$0xff] %vm1273_vm1, %v2824_v48 }
 0x43b   : > { %v2825_v35 = vpop.f32.mrb[48].mxu1 }
 0x43c   : > { %v2826_v33 = vpop.f32.mrb[49].mxu1 }
 0x43d   : > { %v2827_v61 = vadd.f32 %v2826_v33, %v2825_v35  ;;  %v2828_v19 = vpop.f32.mrb[50].mxu1 }
 0x43e   : > { %v2829_v32 = vpop.f32.mrb[51].mxu1 }
 0x43f   : > { %1298 = vst.msk [vmem:[%s4398_s20 + $0xc0] sm:$0xff] %vm1273_vm1, %v2827_v61  ;;  %v2830_v25 = vadd.f32 %v2829_v32, %v2828_v19 }
 0x441   : > { %1299 = vst.msk [vmem:[%s4398_s20 + $0xc8] sm:$0xff] %vm1273_vm1, %v2830_v25 }
 0x443   : > { %v2831_v36 = vpop.f32.mrb[52].mxu1 }
 0x444   : > { %v2832_v13 = vpop.f32.mrb[53].mxu1 }
 0x445   : > { %v2833_v17 = vadd.f32 %v2832_v13, %v2831_v36  ;;  %v2834_v29 = vpop.f32.mrb[54].mxu1 }
 0x446   : > { %v2835_v21 = vpop.f32.mrb[55].mxu1 }
 0x447   : > { %1300 = vst.msk [vmem:[%s4398_s20 + $0xd0] sm:$0xff] %vm1273_vm1, %v2833_v17  ;;  %v2836_v44 = vadd.f32 %v2835_v21, %v2834_v29 }
 0x449   : > { %1301 = vst.msk [vmem:[%s4398_s20 + $0xd8] sm:$0xff] %vm1273_vm1, %v2836_v44 }
 0x44b   : > { %v2837_v39 = vpop.f32.mrb[56].mxu1 }
 0x44c   : > { %v2838_v31 = vpop.f32.mrb[57].mxu1 }
 0x44d   : > { %v2839_v62 = vadd.f32 %v2838_v31, %v2837_v39  ;;  %v2840_v12 = vpop.f32.mrb[58].mxu1 }
 0x44e   : > { %v2841_v58 = vpop.f32.mrb[59].mxu1 }
 0x44f   : > { %1302 = vst.msk [vmem:[%s4398_s20 + $0xe0] sm:$0xff] %vm1273_vm1, %v2839_v62  ;;  %v2842_v15 = vadd.f32 %v2841_v58, %v2840_v12 }
 0x451   : > { %1303 = vst.msk [vmem:[%s4398_s20 + $0xe8] sm:$0xff] %vm1273_vm1, %v2842_v15 }
 0x45c   : > { %v2843_v5 = vpop.f32.mrb[60].mxu1 }
 0x45d   : > { %v2844_v27 = vpop.f32.mrb[61].mxu1 }
 0x45e   : > { %v2845_v63 = vadd.f32 %v2844_v27, %v2843_v5  ;;  %v2846_v51 = vpop.f32.mrb[62].mxu1 }
 0x45f   : > { %v2847_v22 = vpop.f32.mrb[63].mxu1 }
 0x460   : > { %1304 = vst.msk [vmem:[%s4398_s20 + $0xf0] sm:$0xff] %vm1273_vm1, %v2845_v63  ;;  %v2848_v38 = vadd.f32 %v2847_v22, %v2846_v51 }
 0x462   : > { %1305 = vst.msk [vmem:[%s4398_s20 + $0xf8] sm:$0xff] %vm1273_vm1, %v2848_v38 }
 0x464   : > { %v4505_v54 = vpop.f32.mrb[64].mxu1 }
 0x465   : > { %v4507_v23 = vpop.f32.mrb[65].mxu1 }
 0x466   : > { %v1771_v8 = vmax.f32 %v4505_v54, %v4507_v23  ;;  %v4511_v6 = vpop.f32.mrb[66].mxu1 }
 0x467   : > { %v4513_v45 = vpop.f32.mrb[67].mxu1 }
 0x468   : > { %v1774_v34 = vmax.f32 %v4511_v6, %v4513_v45  ;;  %1772 = vmax.xlane.f32.xlu0 %v1771_v8 }
 0x46a   : > { %1775 = vmax.xlane.f32.xlu1 %v1774_v34 }
 0x46c   : > { %v4517_v2 = vpop.f32.mrb[68].mxu1 }
 0x46d   : > { %v4519_v49 = vpop.f32.mrb[69].mxu1 }
 0x46e   : > { %v1777_v16 = vmax.f32 %v4517_v2, %v4519_v49  ;;  %v4523_v28 = vpop.f32.mrb[70].mxu1 }
 0x46f   : > { %v4525_v59 = vpop.f32.mrb[71].mxu1 }
 0x470   : > { %v1780_v7 = vmax.f32 %v4523_v28, %v4525_v59  ;;  %1778 = vmax.xlane.f32.xlu0 %v1777_v16 }
 0x474   : > { %1781 = vmax.xlane.f32.xlu0 %v1780_v7  ;;  %v4529_v10 = vpop.f32.mrb[72].mxu1 }
 0x475   : > { %v4531_v11 = vpop.f32.mrb[73].mxu1 }
 0x476   : > { %v1783_v52 = vmax.f32 %v4529_v10, %v4531_v11  ;;  %v4535_v40 = vpop.f32.mrb[74].mxu1 }
 0x477   : > { %v4537_v20 = vpop.f32.mrb[75].mxu1 }
 0x478   : > { %v1786_v60 = vmax.f32 %v4535_v40, %v4537_v20  ;;  %1784 = vmax.xlane.f32.xlu1 %v1783_v52 }
 0x47a   : > { %1787 = vmax.xlane.f32.xlu0 %v1786_v60 }
 0x47c   : > { %v4541_v26 = vpop.f32.mrb[76].mxu1 }
 0x47d   : > { %v4543_v9 = vpop.f32.mrb[77].mxu1 }
 0x47e   : > { %v1789_v47 = vmax.f32 %v4541_v26, %v4543_v9  ;;  %v4547_v30 = vpop.f32.mrb[78].mxu1 }
 0x47f   : > { %v4549_v3 = vpop.f32.mrb[79].mxu1 }
 0x480   : > { %v1792_v53 = vmax.f32 %v4547_v30, %v4549_v3  ;;  %1790 = vmax.xlane.f32.xlu1 %v1789_v47 }
 0x482   : > { %1793 = vmax.xlane.f32.xlu0 %v1792_v53 }
 0x484   : > { %v4553_v41 = vpop.f32.mrb[80].mxu1 }
 0x485   : > { %v4555_v46 = vpop.f32.mrb[81].mxu1 }
 0x486   : > { %v1795_v43 = vmax.f32 %v4553_v41, %v4555_v46  ;;  %v4559_v50 = vpop.f32.mrb[82].mxu1 }
 0x487   : > { %v4561_v18 = vpop.f32.mrb[83].mxu1 }
 0x488   : > { %v1798_v55 = vmax.f32 %v4559_v50, %v4561_v18  ;;  %1796 = vmax.xlane.f32.xlu1 %v1795_v43 }
 0x48a   : > { %1799 = vmax.xlane.f32.xlu0 %v1798_v55 }
 0x48c   : > { %v4565_v37 = vpop.f32.mrb[84].mxu1 }
 0x48d   : > { %v4567_v57 = vpop.f32.mrb[85].mxu1 }
 0x48e   : > { %v1801_v1 = vmax.f32 %v4565_v37, %v4567_v57  ;;  %v4571_v56 = vpop.f32.mrb[86].mxu1 }
 0x48f   : > { %v4573_v48 = vpop.f32.mrb[87].mxu1 }
 0x490   : > { %v1804_v4 = vmax.f32 %v4571_v56, %v4573_v48  ;;  %1802 = vmax.xlane.f32.xlu1 %v1801_v1 }
 0x492   : > { %1805 = vmax.xlane.f32.xlu0 %v1804_v4 }
 0x494   : > { %v4577_v14 = vpop.f32.mrb[88].mxu1 }
 0x495   : > { %v4579_v35 = vpop.f32.mrb[89].mxu1 }
 0x496   : > { %v1807_v33 = vmax.f32 %v4577_v14, %v4579_v35  ;;  %v4583_v61 = vpop.f32.mrb[90].mxu1 }
 0x497   : > { %v4585_v19 = vpop.f32.mrb[91].mxu1 }
 0x498   : > { %v1810_v0 = vmax.f32 %v4583_v61, %v4585_v19  ;;  %1808 = vmax.xlane.f32.xlu1 %v1807_v33 }
 0x49a   : > { %1811 = vmax.xlane.f32.xlu0 %v1810_v0 }
 0x49c   : > { %v4589_v32 = vpop.f32.mrb[92].mxu1 }
 0x49d   : > { %v4591_v25 = vpop.f32.mrb[93].mxu1 }
 0x49e   : > { %v1813_v42 = vmax.f32 %v4589_v32, %v4591_v25  ;;  %v4595_v24 = vpop.f32.mrb[94].mxu1 }
 0x49f   : > { %v4597_v36 = vpop.f32.mrb[95].mxu1 }
 0x4a0   : > { %v1816_v13 = vmax.f32 %v4595_v24, %v4597_v36  ;;  %1814 = vmax.xlane.f32.xlu1 %v1813_v42 }
 0x4a2   : > { %1817 = vmax.xlane.f32.xlu0 %v1816_v13 }
 0x4a4   : > { %v4601_v17 = vpop.f32.mrb[96].mxu1 }
 0x4a5   : > { %v4603_v29 = vpop.f32.mrb[97].mxu1 }
 0x4a6   : > { %v1819_v21 = vmax.f32 %v4601_v17, %v4603_v29  ;;  %v4607_v44 = vpop.f32.mrb[98].mxu1 }
 0x4a7   : > { %v4609_v39 = vpop.f32.mrb[99].mxu1 }
 0x4a8   : > { %v1822_v31 = vmax.f32 %v4607_v44, %v4609_v39  ;;  %1820 = vmax.xlane.f32.xlu1 %v1819_v21 }
 0x4aa   : > { %1823 = vmax.xlane.f32.xlu0 %v1822_v31 }
 0x4ac   : > { %v4613_v62 = vpop.f32.mrb[100].mxu1 }
 0x4ad   : > { %v4615_v12 = vpop.f32.mrb[101].mxu1 }
 0x4ae   : > { %v1825_v58 = vmax.f32 %v4613_v62, %v4615_v12  ;;  %v4619_v15 = vpop.f32.mrb[102].mxu1 }
 0x4af   : > { %v4621_v5 = vpop.f32.mrb[103].mxu1 }
 0x4b0   : > { %v1828_v27 = vmax.f32 %v4619_v15, %v4621_v5  ;;  %1826 = vmax.xlane.f32.xlu1 %v1825_v58 }
 0x4b2   : > { %1829 = vmax.xlane.f32.xlu0 %v1828_v27 }
 0x4b4   : > { %v4625_v63 = vpop.f32.mrb[104].mxu1 }
 0x4b5   : > { %v4627_v51 = vpop.f32.mrb[105].mxu1 }
 0x4b6   : > { %v1831_v22 = vmax.f32 %v4625_v63, %v4627_v51  ;;  %v4631_v38 = vpop.f32.mrb[106].mxu1 }
 0x4b7   : > { %v4633_v8 = vpop.f32.mrb[107].mxu1 }
 0x4b8   : > { %v1834_v34 = vmax.f32 %v4631_v38, %v4633_v8  ;;  %1832 = vmax.xlane.f32.xlu1 %v1831_v22 }
 0x4ba   : > { %1835 = vmax.xlane.f32.xlu0 %v1834_v34 }
 0x4bc   : > { %v4637_v16 = vpop.f32.mrb[108].mxu1 }
 0x4bd   : > { %v4639_v7 = vpop.f32.mrb[109].mxu1 }
 0x4be   : > { %v1837_v52 = vmax.f32 %v4637_v16, %v4639_v7  ;;  %v4643_v60 = vpop.f32.mrb[110].mxu1 }
 0x4bf   : > { %v4645_v47 = vpop.f32.mrb[111].mxu1 }
 0x4c0   : > { %1838 = vmax.xlane.f32.xlu0 %v1837_v52  ;;  %v1840_v53 = vmax.f32 %v4643_v60, %v4645_v47 }
 0x4c4   : > { %1841 = vmax.xlane.f32.xlu0 %v1840_v53  ;;  %v4649_v43 = vpop.f32.mrb[112].mxu1 }
 0x4c5   : > { %v4651_v55 = vpop.f32.mrb[113].mxu1 }
 0x4c6   : > { %v1843_v1 = vmax.f32 %v4649_v43, %v4651_v55  ;;  %v4655_v4 = vpop.f32.mrb[114].mxu1 }
 0x4c7   : > { %5248 = vst [vmem:[#allocation12_spill] sm:$0xff] %v4655_v4  ;;  %v4657_v33 = vpop.f32.mrb[115].mxu1 }
 0x4c8   : > { %5249 = vst [vmem:[#allocation13_spill] sm:$0xff] %v4657_v33  ;;  %v1846_v0 = vmax.f32 %v4655_v4, %v4657_v33  ;;  %1844 = vmax.xlane.f32.xlu1 %v1843_v1 }
 0x4ca   : > { %1847 = vmax.xlane.f32.xlu0 %v1846_v0 }
 0x4cc   : > { %v4661_v42 = vpop.f32.mrb[116].mxu1 }
 0x4cd   : > { %5250 = vst [vmem:[#allocation14_spill] sm:$0xff] %v4661_v42  ;;  %v4663_v13 = vpop.f32.mrb[117].mxu1 }
 0x4ce   : > { %5251 = vst [vmem:[#allocation15_spill] sm:$0xff] %v4663_v13  ;;  %v1849_v21 = vmax.f32 %v4661_v42, %v4663_v13  ;;  %v4667_v31 = vpop.f32.mrb[118].mxu1 }
 0x4cf   : > { %5252 = vst [vmem:[#allocation11_spill] sm:$0xff] %v4667_v31  ;;  %v4669_v58 = vpop.f32.mrb[119].mxu1 }
 0x4d0   : > { %5253 = vst [vmem:[#allocation17_spill] sm:$0xff] %v4669_v58  ;;  %v1852_v27 = vmax.f32 %v4667_v31, %v4669_v58  ;;  %1850 = vmax.xlane.f32.xlu1 %v1849_v21 }
 0x4d2   : > { %1853 = vmax.xlane.f32.xlu0 %v1852_v27 }
 0x4d4   : > { %v4673_v22 = vpop.f32.mrb[120].mxu1 }
 0x4d5   : > { %5254 = vst [vmem:[#allocation16_spill] sm:$0xff] %v4673_v22  ;;  %v4675_v34 = vpop.f32.mrb[121].mxu1 }
 0x4d6   : > { %5255 = vst [vmem:[#allocation19_spill] sm:$0xff] %v4675_v34  ;;  %v1855_v52 = vmax.f32 %v4673_v22, %v4675_v34  ;;  %v4679_v53 = vpop.f32.mrb[122].mxu1 }
 0x4d7   : > { %5256 = vst [vmem:[#allocation18_spill] sm:$0xff] %v4679_v53  ;;  %v4681_v1 = vpop.f32.mrb[123].mxu1 }
 0x4d8   : > { %5257 = vst [vmem:[#allocation21_spill] sm:$0xff] %v4681_v1  ;;  %1856 = vmax.xlane.f32.xlu1 %v1855_v52  ;;  %v1858_v0 = vmax.f32 %v4679_v53, %v4681_v1 }
 0x4dc   : > { %1859 = vmax.xlane.f32.xlu1 %v1858_v0  ;;  %v4685_v13 = vpop.f32.mrb[124].mxu1 }
 0x4dd   : > { %5258 = vst [vmem:[#allocation20_spill] sm:$0xff] %v4685_v13  ;;  %v4687_v21 = vpop.f32.mrb[125].mxu1 }
 0x4de   : > { %5259 = vst [vmem:[#allocation22_spill] sm:$0xff] %v4687_v21  ;;  %v1861_v27 = vmax.f32 %v4685_v13, %v4687_v21  ;;  %v4691_v58 = vpop.f32.mrb[126].mxu1 }
 0x4df   : > { %v4693_v31 = vpop.f32.mrb[127].mxu1 }
 0x4e0   : > { %5260 = vst [vmem:[#allocation23_spill] sm:$0xff] %v4693_v31  ;;  %v1864_v34 = vmax.f32 %v4691_v58, %v4693_v31  ;;  %1862 = vmax.xlane.f32.xlu0 %v1861_v27 }
 0x4e2   : > { %1865 = vmax.xlane.f32.xlu1 %v1864_v34 }
 0x4f5   : > { %v1773_v52 = vpop.xlane.xlu0 %1772 }
 0x4f6   : > { %v1867_v1 = vsub.f32 %v4505_v54, %v1773_v52  ;;  %v1868_v0 = vsub.f32 %v4507_v23, %v1773_v52 }
 0x4f7   : > { %v1776_v53 = vpop.xlane.xlu1 %1775 }
 0x4f8   : > { %v1931_v22 = vmul.f32 1.442695, %v1867_v1  ;;  %v1933_v42 = vmul.f32 1.442695, %v1868_v0  ;;  %v1869_v33 = vsub.f32 %v4511_v6, %v1776_v53  ;;  %v1870_v21 = vsub.f32 %v4513_v45, %v1776_v53 }
 0x4fa   : > { %3278 = vpow2.f32 %v1931_v22  ;;  %v1935_v13 = vmul.f32 1.442695, %v1869_v33  ;;  %v1937_v4 = vmul.f32 1.442695, %v1870_v21 }
 0x4fb   : > { %3280 = vpow2.f32 %v1933_v42 }
 0x4fc   : > { %3282 = vpow2.f32 %v1935_v13 }
 0x4fd   : > { %3284 = vpow2.f32 %v1937_v4  ;;  %v1779_v27 = vpop.xlane.xlu0 %1778 }
 0x4fe   : > { %v1871_v34 = vsub.f32 %v4517_v2, %v1779_v27  ;;  %v1872_v54 = vsub.f32 %v4519_v49, %v1779_v27 }
 0x500   : > { %v1939_v31 = vmul.f32 1.442695, %v1871_v34  ;;  %v1941_v23 = vmul.f32 1.442695, %v1872_v54 }
 0x501   : > { %v1782_v52 = vpop.xlane.xlu0 %1781 }
 0x502   : > { %3286 = vpow2.f32 %v1939_v31  ;;  %v1873_v1 = vsub.f32 %v4523_v28, %v1782_v52  ;;  %v1874_v6 = vsub.f32 %v4525_v59, %v1782_v52 }
 0x503   : > { %3288 = vpow2.f32 %v1941_v23 }
 0x504   : > { %v4705_v45 = vpop.eup %3278  ;;  %v1943_v33 = vmul.f32 1.442695, %v1873_v1  ;;  %v1945_v42 = vmul.f32 1.442695, %v1874_v6 }
 0x505   : > { %v4707_v13 = vpop.eup %3280  ;;  %v1785_v4 = vpop.xlane.xlu1 %1784 }
 0x506   : > { %v4709_v22 = vpop.eup %3282  ;;  %3290 = vpow2.f32 %v1943_v33  ;;  %v1875_v2 = vsub.f32 %v4529_v10, %v1785_v4  ;;  %v1876_v49 = vsub.f32 %v4531_v11, %v1785_v4  ;;  %v2059_v28 = vadd.f32 %v4707_v13, %v4705_v45 }
 0x507   : > { %v4715_v31 = vpop.eup %3284  ;;  %3292 = vpow2.f32 %v1945_v42  ;;  %v1788_v59 = vpop.xlane.xlu0 %1787 }
 0x508   : > { %v1947_v53 = vmul.f32 1.442695, %v1875_v2  ;;  %v1949_v21 = vmul.f32 1.442695, %v1876_v49  ;;  %2060 = vadd.xlane.f32.xlu1 %v2059_v28  ;;  %v1877_v0 = vsub.f32 %v4535_v40, %v1788_v59  ;;  %v1878_v27 = vsub.f32 %v4537_v20, %v1788_v59 }
 0x509   : > { %v2062_v34 = vadd.f32 %v4715_v31, %v4709_v22 }
 0x50a   : > { %3294 = vpow2.f32 %v1947_v53  ;;  %v1951_v10 = vmul.f32 1.442695, %v1877_v0  ;;  %v1953_v11 = vmul.f32 1.442695, %v1878_v27 }
 0x50b   : > { %3296 = vpow2.f32 %v1949_v21  ;;  %2063 = vadd.xlane.f32.xlu0 %v2062_v34 }
 0x50c   : > { %v4721_v54 = vpop.eup %3286  ;;  %3298 = vpow2.f32 %v1951_v10 }
 0x50d   : > { %v4723_v23 = vpop.eup %3288  ;;  %3300 = vpow2.f32 %v1953_v11  ;;  %v1791_v52 = vpop.xlane.xlu1 %1790 }
 0x50e   : > { %v1879_v1 = vsub.f32 %v4541_v26, %v1791_v52  ;;  %v1880_v40 = vsub.f32 %v4543_v9, %v1791_v52  ;;  %v2065_v20 = vadd.f32 %v4723_v23, %v4721_v54 }
 0x50f   : > { %v1794_v6 = vpop.xlane.xlu0 %1793 }
 0x510   : > { %v4729_v33 = vpop.eup %3290  ;;  %v1955_v42 = vmul.f32 1.442695, %v1879_v1  ;;  %v1957_v4 = vmul.f32 1.442695, %v1880_v40  ;;  %2066 = vadd.xlane.f32.xlu1 %v2065_v20  ;;  %v1881_v2 = vsub.f32 %v4547_v30, %v1794_v6  ;;  %v1882_v49 = vsub.f32 %v4549_v3, %v1794_v6  ;;  %v3482_v20 = vld [vmem:[%s3521_s11 + $0x38] sm:$0xff]  }
 0x511   : > { %v4733_v28 = vpop.eup %3292 }
 0x512   : > { %3302 = vpow2.f32 %v1955_v42  ;;  %v1959_v59 = vmul.f32 1.442695, %v1881_v2  ;;  %v1961_v26 = vmul.f32 1.442695, %v1882_v49  ;;  %v2068_v9 = vadd.f32 %v4733_v28, %v4729_v33  ;;  %v3483_v42 = vld [vmem:[%s3521_s11 + $0x78] sm:$0xff]  }
 0x513   : > { %3304 = vpow2.f32 %v1957_v4 }
 0x514   : > { %v4737_v53 = vpop.eup %3294  ;;  %3306 = vpow2.f32 %v1959_v59  ;;  %2069 = vadd.xlane.f32.xlu1 %v2068_v9 }
 0x515   : > { %5261 = vst [vmem:[#allocation24_spill] sm:$0xff] %v4737_v53  ;;  %v4739_v21 = vpop.eup %3296  ;;  %3308 = vpow2.f32 %v1961_v26  ;;  %v1797_v4 = vpop.xlane.xlu1 %1796 }
 0x516   : > { %v4741_v30 = vpop.eup %3298  ;;  %v2071_v3 = vadd.f32 %v4739_v21, %v4737_v53  ;;  %v1883_v49 = vsub.f32 %v4553_v41, %v1797_v4  ;;  %v1884_v26 = vsub.f32 %v4555_v46, %v1797_v4 }
 0x517   : > { %v4745_v0 = vpop.eup %3300  ;;  %v1800_v6 = vpop.xlane.xlu0 %1799 }
 0x518   : > { %2072 = vadd.xlane.f32.xlu1 %v2071_v3  ;;  %v2074_v27 = vadd.f32 %v4745_v0, %v4741_v30  ;;  %v1885_v3 = vsub.f32 %v4559_v50, %v1800_v6 }
 0x51c   : > { %v4749_v34 = vpop.eup %3302  ;;  %2075 = vadd.xlane.f32.xlu1 %v2074_v27  ;;  %v1886_v27 = vsub.f32 %v4561_v18, %v1800_v6 }
 0x51d   : > { %5262 = vst [vmem:[#allocation5_spill] sm:$0xff] %v4749_v34  ;;  %v4751_v10 = vpop.eup %3304  ;;  %v1803_v59 = vpop.xlane.xlu1 %1802 }
 0x51e   : > { %5263 = vst [vmem:[#allocation25_spill] sm:$0xff] %v4751_v10  ;;  %v4753_v11 = vpop.eup %3306  ;;  %v2077_v52 = vadd.f32 %v4751_v10, %v4749_v34  ;;  %v1965_v34 = vmul.f32 1.442695, %v1884_v26  ;;  %v1967_v10 = vmul.f32 1.442695, %v1885_v3 }
 0x51f   : > { %5264 = vst [vmem:[#allocation27_spill] sm:$0xff] %v4753_v11  ;;  %v4757_v1 = vpop.eup %3308  ;;  %v1806_v2 = vpop.xlane.xlu0 %1805  ;;  %v1969_v41 = vmul.f32 1.442695, %v1886_v27 }
 0x520   : > { %5265 = vst [vmem:[#allocation4_spill] sm:$0xff] %v4757_v1  ;;  %2078 = vadd.xlane.f32.xlu0 %v2077_v52  ;;  %v2080_v40 = vadd.f32 %v4757_v1, %v4753_v11  ;;  %v1963_v52 = vmul.f32 1.442695, %v1883_v49  ;;  %v1888_v11 = vsub.f32 %v4567_v57, %v1803_v59  ;;  %v1889_v53 = vsub.f32 %v4571_v56, %v1806_v2 }
 0x522   : > { %2081 = vadd.xlane.f32.xlu1 %v2080_v40  ;;  %v1887_v40 = vsub.f32 %v4565_v37, %v1803_v59  ;;  %3310 = vpow2.f32 %v1963_v52  ;;  %v1973_v18 = vmul.f32 1.442695, %v1888_v11  ;;  %v1890_v37 = vsub.f32 %v4573_v48, %v1806_v2 }
 0x523   : > { %3312 = vpow2.f32 %v1965_v34  ;;  %v1975_v57 = vmul.f32 1.442695, %v1889_v53 }
 0x524   : > { %v1971_v46 = vmul.f32 1.442695, %v1887_v40  ;;  %3314 = vpow2.f32 %v1967_v10  ;;  %v1977_v34 = vmul.f32 1.442695, %v1890_v37 }
 0x525   : > { %3316 = vpow2.f32 %v1969_v41 }
 0x526   : > { %3318 = vpow2.f32 %v1971_v46 }
 0x527   : > { %v1812_v9 = vpop.xlane.xlu0 %1811  ;;  %3320 = vpow2.f32 %v1973_v18 }
 0x528   : > { %v1893_v49 = vsub.f32 %v4583_v61, %v1812_v9  ;;  %v1894_v11 = vsub.f32 %v4585_v19, %v1812_v9  ;;  %3322 = vpow2.f32 %v1975_v57 }
 0x52a   : > { %v1983_v10 = vmul.f32 1.442695, %v1893_v49  ;;  %v1985_v3 = vmul.f32 1.442695, %v1894_v11 }
 0x52c   : > { %v4789_v9 = vpop.eup %3310 }
 0x52d   : > { %v4793_v40 = vpop.eup %3312 }
 0x52e   : > { %v2083_v57 = vadd.f32 %v4793_v40, %v4789_v9 }
 0x533   : > { %2297 = vrot.lane.b32.xlu1 %v3482_v20, %s3496_s16  ;;  %v1809_v20 = vpop.xlane.xlu1 %1808 }
 0x534   : > { %v1891_v1 = vsub.f32 %v4577_v14, %v1809_v20  ;;  %v1892_v50 = vsub.f32 %v4579_v35, %v1809_v20  ;;  %v4796_v20 = vpop.eup %3314 }
 0x535   : > { %v4799_v46 = vpop.eup %3316 }
 0x536   : > { %2313 = vrot.lane.b32.xlu0 %v3483_v42, %s3496_s16  ;;  %v1818_v42 = vpop.xlane.xlu0 %1817  ;;  %v1979_v56 = vmul.f32 1.442695, %v1891_v1  ;;  %v1981_v14 = vmul.f32 1.442695, %v1892_v50  ;;  %v4803_v18 = vpop.eup %3318 }
 0x537   : > { %v1815_v4 = vpop.xlane.xlu1 %1814  ;;  %v1897_v53 = vsub.f32 %v4595_v24, %v1818_v42  ;;  %v1898_v27 = vsub.f32 %v4597_v36, %v1818_v42 }
 0x538   : > { %v1895_v59 = vsub.f32 %v4589_v32, %v1815_v4  ;;  %v1896_v26 = vsub.f32 %v4591_v25, %v1815_v4  ;;  %3324 = vpow2.f32 %v1979_v56 }
 0x539   : > { %3326 = vpow2.f32 %v1981_v14  ;;  %v1991_v52 = vmul.f32 1.442695, %v1897_v53  ;;  %v1993_v50 = vmul.f32 1.442695, %v1898_v27 }
 0x53a   : > { %v4775_v6 = vpop.xlane.xlu0 %1823  ;;  %v1987_v61 = vmul.f32 1.442695, %v1895_v59  ;;  %v1989_v32 = vmul.f32 1.442695, %v1896_v26  ;;  %3328 = vpow2.f32 %v1977_v34 }
 0x53b   : > { %v1821_v35 = vpop.xlane.xlu1 %1820  ;;  %3330 = vpow2.f32 %v1983_v10  ;;  %v1901_v24 = vsub.f32 %v4607_v44, %v4775_v6  ;;  %v1902_v44 = vsub.f32 %v4609_v39, %v4775_v6 }
 0x53c   : > { %v1899_v1 = vsub.f32 %v4601_v17, %v1821_v35  ;;  %v1900_v2 = vsub.f32 %v4603_v29, %v1821_v35  ;;  %3332 = vpow2.f32 %v1987_v61  ;;  %v2086_v35 = vadd.f32 %v4799_v46, %v4796_v20 }
 0x53d   : > { %3334 = vpow2.f32 %v1989_v32  ;;  %v1999_v37 = vmul.f32 1.442695, %v1901_v24 }
 0x53e   : > { %v1995_v17 = vmul.f32 1.442695, %v1899_v1  ;;  %v1997_v41 = vmul.f32 1.442695, %v1900_v2  ;;  %3336 = vpow2.f32 %v1985_v3 }
 0x53f   : > { %v4781_v48 = vpop.xlane.xlu0 %1829  ;;  %v1827_v25 = vpop.xlane.xlu1 %1826  ;;  %3338 = vpow2.f32 %v1991_v52 }
 0x540   : > { %v1903_v29 = vsub.f32 %v4613_v62, %v1827_v25  ;;  %v1904_v36 = vsub.f32 %v4615_v12, %v1827_v25  ;;  %v1905_v62 = vsub.f32 %v4619_v15, %v4781_v48  ;;  %v4809_v12 = vpop.eup %3320  ;;  %3340 = vpow2.f32 %v1995_v17 }
 0x541   : > { %v4812_v59 = vpop.eup %3322  ;;  %3342 = vpow2.f32 %v1997_v41  ;;  %v2001_v15 = vmul.f32 1.442695, %v1902_v44  ;;  %v1906_v26 = vsub.f32 %v4621_v5, %v4781_v48 }
 0x542   : > { %v2003_v49 = vmul.f32 1.442695, %v1903_v29  ;;  %v2005_v39 = vmul.f32 1.442695, %v1904_v36  ;;  %v4815_v14 = vpop.eup %3324  ;;  %3344 = vpow2.f32 %v1993_v50 }
 0x543   : > { %v4821_v34 = vpop.eup %3326  ;;  %3346 = vpow2.f32 %v1999_v37  ;;  %v2009_v25 = vmul.f32 1.442695, %v1906_v26 }
 0x544   : > { %v4827_v10 = vpop.eup %3328  ;;  %3348 = vpow2.f32 %v2003_v49 }
 0x545   : > { %v1833_v42 = vpop.xlane.xlu1 %1832  ;;  %v4830_v48 = vpop.eup %3330  ;;  %3350 = vpow2.f32 %v2005_v39 }
 0x546   : > { %v1907_v56 = vsub.f32 %v4625_v63, %v1833_v42  ;;  %v1908_v6 = vsub.f32 %v4627_v51, %v1833_v42  ;;  %v2007_v63 = vmul.f32 1.442695, %v1905_v62  ;;  %v2089_v51 = vadd.f32 %v4809_v12, %v4803_v18 }
 0x547   : > { %v4787_v19 = vpop.xlane.xlu0 %1835  ;;  %3352 = vpow2.f32 %v2001_v15 }
 0x548   : > { %v1909_v11 = vsub.f32 %v4631_v38, %v4787_v19  ;;  %v2011_v53 = vmul.f32 1.442695, %v1907_v56  ;;  %v2013_v1 = vmul.f32 1.442695, %v1908_v6  ;;  %v4833_v38 = vpop.eup %3332  ;;  %v1910_v3 = vsub.f32 %v4633_v8, %v4787_v19  ;;  %v5267_v6 = vld [vmem:[#allocation13_spill] sm:$0xff] }
 0x549   : > { %v4839_v27 = vpop.eup %3334  ;;  %3354 = vpow2.f32 %v2007_v63 }
 0x54a   : > { %v2015_v52 = vmul.f32 1.442695, %v1909_v11  ;;  %v4844_v17 = vpop.eup %3336  ;;  %3356 = vpow2.f32 %v2011_v53  ;;  %v2101_v37 = vadd.f32 %v4839_v27, %v4833_v38 }
 0x54b   : > { %v4847_v8 = vpop.eup %3338  ;;  %3358 = vpow2.f32 %v2013_v1 }
 0x54c   : > { %v4850_v50 = vpop.eup %3340  ;;  %3360 = vpow2.f32 %v2009_v25 }
 0x54d   : > { %v1839_v4 = vpop.xlane.xlu0 %1838  ;;  %3362 = vpow2.f32 %v2015_v52 }
 0x54e   : > { %v1911_v61 = vsub.f32 %v4637_v16, %v1839_v4  ;;  %v1912_v32 = vsub.f32 %v4639_v7, %v1839_v4  ;;  %v2095_v16 = vadd.f32 %v4821_v34, %v4815_v14  ;;  %v2092_v7 = vadd.f32 %v4827_v10, %v4812_v59 }
 0x550   : > { %v2019_v29 = vmul.f32 1.442695, %v1911_v61  ;;  %v2021_v19 = vmul.f32 1.442695, %v1912_v32 }
 0x551   : > { %v1842_v5 = vpop.xlane.xlu0 %1841 }
 0x552   : > { %v1913_v24 = vsub.f32 %v4643_v60, %v1842_v5  ;;  %v2017_v60 = vmul.f32 1.442695, %v1910_v3  ;;  %v1914_v44 = vsub.f32 %v4645_v47, %v1842_v5  ;;  %3364 = vpow2.f32 %v2019_v29  ;;  %v5269_v3 = vld [vmem:[#allocation15_spill] sm:$0xff] }
 0x553   : > { %3366 = vpow2.f32 %v2021_v19  ;;  %v5271_v19 = vld [vmem:[#allocation16_spill] sm:$0xff] }
 0x554   : > { %v2023_v62 = vmul.f32 1.442695, %v1913_v24  ;;  %3368 = vpow2.f32 %v2017_v60  ;;  %v5272_v60 = vld [vmem:[#allocation19_spill] sm:$0xff] }
 0x555   : > { %2084 = vadd.xlane.f32.xlu0 %v2083_v57  ;;  %v1845_v2 = vpop.xlane.xlu1 %1844  ;;  %v5266_v57 = vld [vmem:[#allocation12_spill] sm:$0xff] }
 0x556   : > { %v1915_v41 = vsub.f32 %v4649_v43, %v1845_v2  ;;  %v1916_v42 = vsub.f32 %v4651_v55, %v1845_v2  ;;  %v4855_v43 = vpop.eup %3342  ;;  %v2098_v55 = vadd.f32 %v4844_v17, %v4830_v48  ;;  %3370 = vpow2.f32 %v2023_v62 }
 0x557   : > { %2087 = vadd.xlane.f32.xlu1 %v2086_v35  ;;  %v1848_v36 = vpop.xlane.xlu0 %1847  ;;  %v4860_v56 = vpop.eup %3344  ;;  %v5268_v35 = vld [vmem:[#allocation14_spill] sm:$0xff]  ;;  %v2107_v61 = vadd.f32 %v4855_v43, %v4850_v50 }
 0x558   : > { %v1917_v49 = vsub.f32 %v5266_v57, %v1848_v36  ;;  %v2027_v39 = vmul.f32 1.442695, %v1915_v41  ;;  %v1918_v15 = vsub.f32 %v5267_v6, %v1848_v36  ;;  %v4863_v47 = vpop.eup %3346  ;;  %v2029_v26 = vmul.f32 1.442695, %v1916_v42 }
 0x559   : > { %2090 = vadd.xlane.f32.xlu0 %v2089_v51  ;;  %v4866_v11 = vpop.eup %3348  ;;  %v2025_v51 = vmul.f32 1.442695, %v1914_v44  ;;  %v2104_v32 = vadd.f32 %v4860_v56, %v4847_v8 }
 0x55a   : > { %v4870_v5 = vpop.eup %3350  ;;  %v2031_v1 = vmul.f32 1.442695, %v1917_v49  ;;  %3372 = vpow2.f32 %v2027_v39  ;;  %v2033_v25 = vmul.f32 1.442695, %v1918_v15  ;;  %v5273_v15 = vld [vmem:[#allocation17_spill] sm:$0xff] }
 0x55b   : > { %2096 = vadd.xlane.f32.xlu1 %v2095_v16  ;;  %v4874_v2 = vpop.eup %3352  ;;  %3374 = vpow2.f32 %v2029_v26 }
 0x55c   : > { %v4877_v52 = vpop.eup %3354  ;;  %3376 = vpow2.f32 %v2025_v51  ;;  %v2110_v62 = vadd.f32 %v4874_v2, %v4863_v47 }
 0x55d   : > { %2093 = vadd.xlane.f32.xlu0 %v2092_v7  ;;  %v1851_v4 = vpop.xlane.xlu1 %1850  ;;  %v5270_v7 = vld [vmem:[#allocation11_spill] sm:$0xff]  ;;  %v4880_v36 = vpop.eup %3356  ;;  %3378 = vpow2.f32 %v2031_v1 }
 0x55e   : > { %v1919_v63 = vsub.f32 %v5268_v35, %v1851_v4  ;;  %v1920_v16 = vsub.f32 %v5269_v3, %v1851_v4  ;;  %v4886_v4 = vpop.eup %3358  ;;  %3380 = vpow2.f32 %v2033_v25 }
 0x55f   : > { %2102 = vadd.xlane.f32.xlu1 %v2101_v37  ;;  %v1854_v53 = vpop.xlane.xlu0 %1853  ;;  %v2113_v37 = vadd.f32 %v4870_v5, %v4866_v11  ;;  %v4890_v57 = vpop.eup %3360  ;;  %v2119_v25 = vadd.f32 %v4886_v4, %v4880_v36 }
 0x560   : > { %v2035_v24 = vmul.f32 1.442695, %v1919_v63  ;;  %v1921_v29 = vsub.f32 %v5270_v7, %v1854_v53  ;;  %v2037_v49 = vmul.f32 1.442695, %v1920_v16  ;;  %v4892_v6 = vpop.eup %3362  ;;  %v1922_v26 = vsub.f32 %v5273_v15, %v1854_v53 }
 0x561   : > { %2099 = vadd.xlane.f32.xlu0 %v2098_v55  ;;  %v4895_v51 = vpop.eup %3364 }
 0x562   : > { %3382 = vpow2.f32 %v2035_v24  ;;  %v2039_v35 = vmul.f32 1.442695, %v1921_v29  ;;  %5274 = vst [vmem:[#allocation9_spill] sm:$0xff] %v4895_v51  ;;  %v4901_v16 = vpop.eup %3366  ;;  %v2116_v24 = vadd.f32 %v4890_v57, %v4877_v52 }
 0x563   : > { %2108 = vadd.xlane.f32.xlu1 %v2107_v61  ;;  %v5275_v61 = vld [vmem:[#allocation18_spill] sm:$0xff]  ;;  %v4905_v53 = vpop.eup %3368 }
 0x565   : > { %2105 = vadd.xlane.f32.xlu0 %v2104_v32  ;;  %v1857_v41 = vpop.xlane.xlu1 %1856  ;;  %v5276_v32 = vld [vmem:[#allocation21_spill] sm:$0xff] }
 0x566   : > { %v1923_v42 = vsub.f32 %v5271_v19, %v1857_v41  ;;  %v1924_v44 = vsub.f32 %v5272_v60, %v1857_v41  ;;  %v4907_v41 = vpop.eup %3370  ;;  %v2041_v19 = vmul.f32 1.442695, %v1922_v26 }
 0x567   : > { %2114 = vadd.xlane.f32.xlu1 %v2113_v37  ;;  %5277 = vst [vmem:[#allocation26_spill] sm:$0xff] %v4907_v41  ;;  %v4909_v60 = vpop.eup %3372 }
 0x568   : > { %v2043_v55 = vmul.f32 1.442695, %v1923_v42  ;;  %v2045_v39 = vmul.f32 1.442695, %v1924_v44  ;;  %5278 = vst [vmem:[#allocation3_spill] sm:$0xff] %v4909_v60  ;;  %v5279_v44 = vld [vmem:[#allocation20_spill] sm:$0xff] }
 0x569   : > { %2111 = vadd.xlane.f32.xlu0 %v2110_v62  ;;  %v1860_v63 = vpop.xlane.xlu1 %1859  ;;  %v5280_v62 = vld [vmem:[#allocation22_spill] sm:$0xff] }
 0x56a   : > { %3384 = vpow2.f32 %v2043_v55  ;;  %v1925_v1 = vsub.f32 %v5275_v61, %v1860_v63  ;;  %v1926_v3 = vsub.f32 %v5276_v32, %v1860_v63  ;;  %v5282_v32 = vld [vmem:[#allocation23_spill] sm:$0xff] }
 0x56b   : > { %3386 = vpow2.f32 %v2045_v39  ;;  %2120 = vadd.xlane.f32.xlu1 %v2119_v25  ;;  %v2125_v39 = vadd.f32 %v4901_v16, %v4895_v51 }
 0x56c   : > { %3388 = vpow2.f32 %v2037_v49  ;;  %v2047_v7 = vmul.f32 1.442695, %v1925_v1  ;;  %v2049_v29 = vmul.f32 1.442695, %v1926_v3  ;;  %v4915_v49 = vpop.eup %3374 }
 0x56d   : > { %3390 = vpow2.f32 %v2039_v35  ;;  %2117 = vadd.xlane.f32.xlu0 %v2116_v24  ;;  %v1863_v42 = vpop.xlane.xlu0 %1862  ;;  %5281 = vst [vmem:[#allocation8_spill] sm:$0xff] %v4915_v49  ;;  %v2122_v35 = vadd.f32 %v4905_v53, %v4892_v6  ;;  %v4919_v26 = vpop.eup %3376 }
 0x56e   : > { %3392 = vpow2.f32 %v2047_v7  ;;  %v1927_v37 = vsub.f32 %v5279_v44, %v1863_v42  ;;  %v1928_v55 = vsub.f32 %v5280_v62, %v1863_v42  ;;  %v4923_v25 = vpop.eup %3378  ;;  %v2131_v42 = vadd.f32 %v4915_v49, %v4909_v60 }
 0x56f   : > { %3394 = vpow2.f32 %v2049_v29  ;;  %v1866_v15 = vpop.xlane.xlu1 %1865  ;;  %2126 = vadd.xlane.f32.xlu1 %v2125_v39  ;;  %5283 = vst [vmem:[#allocation28_spill] sm:$0xff] %v4923_v25  ;;  %v4925_v24 = vpop.eup %3380 }
 0x570   : > { %v2051_v63 = vmul.f32 1.442695, %v1927_v37  ;;  %v2053_v61 = vmul.f32 1.442695, %v1928_v55  ;;  %v1929_v1 = vsub.f32 %v4691_v58, %v1866_v15  ;;  %v1930_v3 = vsub.f32 %v5282_v32, %v1866_v15  ;;  %5284 = vst [vmem:[#allocation2_spill] sm:$0xff] %v4925_v24  ;;  %v4929_v44 = vpop.eup %3382 }
 0x571   : > { %3396 = vpow2.f32 %v2041_v19  ;;  %2123 = vadd.xlane.f32.xlu0 %v2122_v35  ;;  %5285 = vst [vmem:[#allocation7_spill] sm:$0xff] %v4929_v44  ;;  %v2128_v58 = vadd.f32 %v4919_v26, %v4907_v41  ;;  %v2134_v15 = vadd.f32 %v4925_v24, %v4923_v25 }
 0x572   : > { %3398 = vpow2.f32 %v2051_v63  ;;  %v2055_v7 = vmul.f32 1.442695, %v1929_v1  ;;  %v2057_v29 = vmul.f32 1.442695, %v1930_v3 }
 0x573   : > { %3400 = vpow2.f32 %v2053_v61  ;;  %2132 = vadd.xlane.f32.xlu1 %v2131_v42 }
 0x574   : > { %v4933_v37 = vpop.eup %3384  ;;  %3402 = vpow2.f32 %v2055_v7 }
 0x575   : > { %v4935_v62 = vpop.eup %3386  ;;  %2129 = vadd.xlane.f32.xlu0 %v2128_v58  ;;  %3404 = vpow2.f32 %v2057_v29 }
 0x576   : > { %v4937_v19 = vpop.eup %3388  ;;  %v2143_v55 = vadd.f32 %v4935_v62, %v4933_v37 }
 0x577   : > { %5286 = vst [vmem:[#allocation10_spill] sm:$0xff] %v4937_v19  ;;  %v4941_v39 = vpop.eup %3390  ;;  %v2137_v61 = vadd.f32 %v4937_v19, %v4929_v44 }
 0x578   : > { %5287 = vst [vmem:[#allocation32_spill] sm:$0xff] %v4941_v39  ;;  %v4945_v35 = vpop.eup %3392  ;;  %2144 = vadd.xlane.f32.xlu1 %v2143_v55 }
 0x579   : > { %v4947_v63 = vpop.eup %3394  ;;  %2135 = vadd.xlane.f32.xlu0 %v2134_v15 }
 0x57a   : > { %v2146_v1 = vadd.f32 %v4947_v63, %v4945_v35 }
 0x57b   : > { %v4953_v32 = vpop.eup %3396 }
 0x57c   : > { %5288 = vst [vmem:[#allocation6_spill] sm:$0xff] %v4953_v32  ;;  %v4955_v3 = vpop.eup %3398  ;;  %2138 = vadd.xlane.f32.xlu1 %v2137_v61  ;;  %v2140_v58 = vadd.f32 %v4953_v32, %v4941_v39 }
 0x57d   : > { %v4957_v7 = vpop.eup %3400  ;;  %2147 = vadd.xlane.f32.xlu0 %v2146_v1 }
 0x57e   : > { %v2149_v29 = vadd.f32 %v4957_v7, %v4955_v3  ;;  %v4961_v42 = vpop.eup %3402 }
 0x57f   : > { %v4965_v55 = vpop.eup %3404 }
 0x580   : > { %2150 = vadd.xlane.f32.xlu1 %v2149_v29  ;;  %v2152_v15 = vadd.f32 %v4965_v55, %v4961_v42 }
 0x581   : > { %2141 = vadd.xlane.f32.xlu0 %v2140_v58 }
 0x585   : > { %2153 = vadd.xlane.f32.xlu0 %v2152_v15 }
 0x595   : > { %v2061_v61 = vpop.xlane.xlu1 %2060 }
 0x596   : > { %3406 = vrcp.f32 %v2061_v61 }
 0x598   : > { %v2064_v44 = vpop.xlane.xlu0 %2063 }
 0x599   : > { %3408 = vrcp.f32 %v2064_v44 }
 0x59d   : > { %v2067_v1 = vpop.xlane.xlu1 %2066 }
 0x5a0   : > { %v3407_v19 = vpop.eup %3406 }
 0x5a1   : > { %v2070_v60 = vpop.xlane.xlu1 %2069  ;;  %v2188_v49 = vmul.f32 %v3407_v19, %v4707_v13 }
 0x5a2   : > { %3410 = vrcp.f32 %v2070_v60 }
 0x5a3   : > { %v3409_v25 = vpop.eup %3408  ;;  %3412 = vrcp.f32 %v2067_v1 }
 0x5a4   : > { %v2190_v39 = vmul.f32 %v3409_v25, %v4715_v31  ;;  %v2189_v41 = vmul.f32 %v3409_v25, %v4709_v22  ;;  %v2187_v31 = vmul.f32 %v3407_v19, %v4705_v45 }
 0x5a5   : > { %v2073_v32 = vpop.xlane.xlu1 %2072 }
 0x5a6   : > { %v2252_v29 = vpack.c.bf16 %v2190_v39, %v2188_v49  ;;  %v2251_v39 = vpack.c.bf16 %v2189_v41, %v2187_v31 }
 0x5a8   : > { %2363 = vmatprep.mubr.bf16.mxu0 %v2252_v29 }
 0x5a9   : > { %v2076_v58 = vpop.xlane.xlu1 %2075 }
 0x5aa   : > { %3414 = vrcp.f32 %v2076_v58 }
 0x5ab   : > { %3416 = vrcp.f32 %v2073_v32 }
 0x5ac   : > { %v3411_v15 = vpop.eup %3410 }
 0x5ad   : > { %v2079_v51 = vpop.xlane.xlu0 %2078  ;;  %v3413_v24 = vpop.eup %3412  ;;  %v2194_v13 = vmul.f32 %v3411_v15, %v4733_v28  ;;  %v2193_v22 = vmul.f32 %v3411_v15, %v4729_v33 }
 0x5ae   : > { %v2192_v49 = vmul.f32 %v3413_v24, %v4723_v23  ;;  %v2191_v28 = vmul.f32 %v3413_v24, %v4721_v54  ;;  %v5292_v54 = vld [vmem:[#allocation27_spill] sm:$0xff]  ;;  %v5293_v24 = vld [vmem:[#allocation5_spill] sm:$0xff] }
 0x5af   : > { %v2082_v61 = vpop.xlane.xlu1 %2081 }
 0x5b0   : > { %3418 = vrcp.f32 %v2082_v61  ;;  %v2254_v1 = vpack.c.bf16 %v2194_v13, %v2192_v49  ;;  %v2253_v19 = vpack.c.bf16 %v2193_v22, %v2191_v28  ;;  %v5290_v13 = vld [vmem:[#allocation24_spill] sm:$0xff] }
 0x5b1   : > { %v2314_v44 = vpop.permute.xlu0 %2313  ;;  %3420 = vrcp.f32 %v2079_v51  ;;  %v5289_v51 = vld [vmem:[#allocation4_spill] sm:$0xff] }
 0x5b2   : > { %2911 = vmatprep.subr.bf16.mxu0 %v2314_v44  ;;  %3016 = vmatprep.subr.bf16.mxu1 %v2314_v44 }
 0x5b3   : > { %v2298_v60 = vpop.permute.xlu1 %2297 }
 0x5b4   : > { %2912 = vmatpush3.bf16.msra.mxu0 %v2298_v60  ;;  %3024 = vmatpush3.bf16.msra.mxu1 %v2298_v60  ;;  %v3415_v32 = vpop.eup %3414  ;;  %v5291_v60 = vld [vmem:[#allocation25_spill] sm:$0xff] }
 0x5b5   : > { %v3417_v29 = vpop.eup %3416  ;;  %v2198_v25 = vmul.f32 %v3415_v32, %v4745_v0  ;;  %v2197_v41 = vmul.f32 %v3415_v32, %v4741_v30 }
 0x5b6   : > { %v2196_v45 = vmul.f32 %v3417_v29, %v4739_v21  ;;  %v2195_v31 = vmul.f32 %v3417_v29, %v5290_v13 }
 0x5b7   : > { %2364 = vmatmul.mubr.bf16.vlgmr.msra.gmra.mrb[64].mxu0 %v2251_v39 }
 0x5b8   : > { %2371 = vmatprep.mubr.bf16.mxu0 %v2254_v1  ;;  %v2256_v58 = vpack.c.bf16 %v2198_v25, %v2196_v45  ;;  %v2255_v15 = vpack.c.bf16 %v2197_v41, %v2195_v31 }
 0x5ba   : > { %v3419_v44 = vpop.eup %3418 }
 0x5bb   : > { %v3421_v23 = vpop.eup %3420  ;;  %v2202_v61 = vmul.f32 %v3419_v44, %v5289_v51  ;;  %v2201_v21 = vmul.f32 %v3419_v44, %v5292_v54 }
 0x5bc   : > { %v2200_v33 = vmul.f32 %v3421_v23, %v5291_v60  ;;  %v2199_v49 = vmul.f32 %v3421_v23, %v5293_v24 }
 0x5be   : > { %v2258_v0 = vpack.c.bf16 %v2202_v61, %v2200_v33  ;;  %v2257_v39 = vpack.c.bf16 %v2201_v21, %v2199_v49 }
 0x5bf   : > { %2372 = vmatmul.mubr.bf16.gmra.mrb[68].mxu0 %v2253_v19 }
 0x5c0   : > { %2379 = vmatprep.mubr.bf16.mxu0 %v2256_v58 }
 0x5c7   : > { %2380 = vmatmul.mubr.bf16.gmra.mrb[72].mxu0 %v2255_v15 }
 0x5c8   : > { %2387 = vmatprep.mubr.bf16.mxu0 %v2258_v0 }
 0x5cf   : > { %2388 = vmatmul.mubr.bf16.gmra.mrb[76].mxu0 %v2257_v39 }
 0x5e2   : > { %v2085_v1 = vpop.xlane.xlu0 %2084 }
 0x5e3   : > { %3422 = vrcp.f32 %v2085_v1 }
 0x5e4   : > { %v2088_v22 = vpop.xlane.xlu1 %2087 }
 0x5e5   : > { %3424 = vrcp.f32 %v2088_v22 }
 0x5e6   : > { %v2091_v30 = vpop.xlane.xlu0 %2090 }
 0x5e7   : > { %3426 = vrcp.f32 %v2091_v30 }
 0x5e8   : > { %v2097_v32 = vpop.xlane.xlu1 %2096 }
 0x5ea   : > { %v2094_v29 = vpop.xlane.xlu0 %2093 }
 0x5eb   : > { %3428 = vrcp.f32 %v2094_v29 }
 0x5ec   : > { %3430 = vrcp.f32 %v2097_v32  ;;  %v2103_v25 = vpop.xlane.xlu1 %2102 }
 0x5ed   : > { %v3423_v28 = vpop.eup %3422 }
 0x5ee   : > { %v2100_v45 = vpop.xlane.xlu0 %2099  ;;  %v2204_v44 = vmul.f32 %v3423_v28, %v4793_v40  ;;  %v2203_v41 = vmul.f32 %v3423_v28, %v4789_v9 }
 0x5ef   : > { %3432 = vrcp.f32 %v2100_v45  ;;  %v3425_v19 = vpop.eup %3424 }
 0x5f0   : > { %v2109_v58 = vpop.xlane.xlu1 %2108  ;;  %v2206_v23 = vmul.f32 %v3425_v19, %v4799_v46  ;;  %v2205_v51 = vmul.f32 %v3425_v19, %v4796_v20 }
 0x5f1   : > { %v3427_v13 = vpop.eup %3426 }
 0x5f2   : > { %v2106_v61 = vpop.xlane.xlu0 %2105  ;;  %v2260_v31 = vpack.c.bf16 %v2206_v23, %v2204_v44  ;;  %v2259_v60 = vpack.c.bf16 %v2205_v51, %v2203_v41  ;;  %v2208_v54 = vmul.f32 %v3427_v13, %v4809_v12  ;;  %v2207_v39 = vmul.f32 %v3427_v13, %v4803_v18 }
 0x5f3   : > { %3434 = vrcp.f32 %v2106_v61 }
 0x5f4   : > { %v2115_v15 = vpop.xlane.xlu1 %2114  ;;  %2395 = vmatprep.mubr.bf16.mxu0 %v2260_v31  ;;  %3436 = vrcp.f32 %v2103_v25 }
 0x5f5   : > { %v3429_v33 = vpop.eup %3428  ;;  %2396 = vmatmul.mubr.bf16.gmra.mrb[80].mxu0 %v2259_v60 }
 0x5f6   : > { %v2112_v0 = vpop.xlane.xlu0 %2111  ;;  %v2210_v40 = vmul.f32 %v3429_v33, %v4827_v10  ;;  %v3431_v46 = vpop.eup %3430  ;;  %v2209_v9 = vmul.f32 %v3429_v33, %v4812_v59 }
 0x5f7   : > { %v2212_v1 = vmul.f32 %v3431_v46, %v4821_v34  ;;  %3438 = vrcp.f32 %v2112_v0  ;;  %v2211_v34 = vmul.f32 %v3431_v46, %v4815_v14 }
 0x5f8   : > { %v2262_v21 = vpack.c.bf16 %v2210_v40, %v2208_v54  ;;  %v2121_v24 = vpop.xlane.xlu1 %2120  ;;  %v2261_v30 = vpack.c.bf16 %v2209_v9, %v2207_v39  ;;  %3440 = vrcp.f32 %v2109_v58 }
 0x5f9   : > { %v3433_v20 = vpop.eup %3432 }
 0x5fa   : > { %2403 = vmatprep.mubr.bf16.mxu0 %v2262_v21  ;;  %v2118_v49 = vpop.xlane.xlu0 %2117  ;;  %v2214_v22 = vmul.f32 %v3433_v20, %v4844_v17  ;;  %v2213_v25 = vmul.f32 %v3433_v20, %v4830_v48 }
 0x5fb   : > { %3442 = vrcp.f32 %v2118_v49 }
 0x5fc   : > { %v2264_v32 = vpack.c.bf16 %v2214_v22, %v2212_v1  ;;  %v2127_v12 = vpop.xlane.xlu1 %2126  ;;  %v2263_v19 = vpack.c.bf16 %v2213_v25, %v2211_v34  ;;  %3444 = vrcp.f32 %v2115_v15 }
 0x5fd   : > { %v3435_v29 = vpop.eup %3434  ;;  %2404 = vmatmul.mubr.bf16.gmra.mrb[84].mxu0 %v2261_v30 }
 0x5fe   : > { %v2124_v10 = vpop.xlane.xlu0 %2123  ;;  %2411 = vmatprep.mubr.bf16.mxu0 %v2264_v32  ;;  %v3437_v59 = vpop.eup %3436  ;;  %v2218_v18 = vmul.f32 %v3435_v29, %v4860_v56  ;;  %v2217_v48 = vmul.f32 %v3435_v29, %v4847_v8 }
 0x5ff   : > { %v2216_v17 = vmul.f32 %v3437_v59, %v4839_v27  ;;  %v2215_v27 = vmul.f32 %v3437_v59, %v4833_v38 }
 0x600   : > { %v4996_v28 = vpop.xlane.xlu1 %2132 }
 0x601   : > { %v2266_v23 = vpack.c.bf16 %v2218_v18, %v2216_v17  ;;  %v3439_v58 = vpop.eup %3438  ;;  %v2265_v31 = vpack.c.bf16 %v2217_v48, %v2215_v27  ;;  %v5294_v17 = vld [vmem:[#allocation26_spill] sm:$0xff] }
 0x602   : > { %v2130_v45 = vpop.xlane.xlu0 %2129  ;;  %v3441_v51 = vpop.eup %3440  ;;  %v2222_v56 = vmul.f32 %v3439_v58, %v4874_v2  ;;  %v2221_v54 = vmul.f32 %v3439_v58, %v4863_v47  ;;  %v5297_v58 = vld [vmem:[#allocation8_spill] sm:$0xff] }
 0x603   : > { %v2220_v13 = vmul.f32 %v3441_v51, %v4855_v43  ;;  %v2219_v38 = vmul.f32 %v3441_v51, %v4850_v50 }
 0x605   : > { %v2145_v44 = vpop.xlane.xlu1 %2144  ;;  %2412 = vmatmul.mubr.bf16.gmra.mrb[88].mxu0 %v2263_v19  ;;  %v2268_v60 = vpack.c.bf16 %v2222_v56, %v2220_v13  ;;  %v3443_v33 = vpop.eup %3442  ;;  %v2267_v21 = vpack.c.bf16 %v2221_v54, %v2219_v38  ;;  %v5298_v56 = vld [vmem:[#allocation28_spill] sm:$0xff]  ;;  %v5300_v13 = vld [vmem:[#allocation3_spill] sm:$0xff] }
 0x606   : > { %v2136_v41 = vpop.xlane.xlu0 %2135  ;;  %2419 = vmatprep.mubr.bf16.mxu0 %v2266_v23  ;;  %3446 = vrcp.f32 %v2145_v44  ;;  %v3445_v8 = vpop.eup %3444  ;;  %v2226_v2 = vmul.f32 %v3443_v33, %v4890_v57 }
 0x607   : > { %v2224_v43 = vmul.f32 %v3445_v8, %v4870_v5  ;;  %v2225_v5 = vmul.f32 %v3443_v33, %v4877_v52  ;;  %v2223_v32 = vmul.f32 %v3445_v8, %v4866_v11  ;;  %v5302_v8 = vld [vmem:[#allocation32_spill] sm:$0xff] }
 0x609   : > { %v5002_v61 = vpop.xlane.xlu1 %2138  ;;  %v2270_v20 = vpack.c.bf16 %v2226_v2, %v2224_v43  ;;  %v5303_v2 = vld [vmem:[#allocation7_spill] sm:$0xff] }
 0x60a   : > { %v2148_v14 = vpop.xlane.xlu0 %2147 }
 0x60b   : > { %3448 = vrcp.f32 %v2148_v14 }
 0x60c   : > { %3450 = vrcp.f32 %v2124_v10 }
 0x60d   : > { %3452 = vrcp.f32 %v2121_v24  ;;  %v2151_v15 = vpop.xlane.xlu1 %2150  ;;  %2420 = vmatmul.mubr.bf16.gmra.mrb[92].mxu0 %v2265_v31 }
 0x60e   : > { %v2142_v0 = vpop.xlane.xlu0 %2141  ;;  %2427 = vmatprep.mubr.bf16.mxu0 %v2268_v60  ;;  %3454 = vrcp.f32 %v2151_v15  ;;  %v5301_v60 = vld [vmem:[#allocation10_spill] sm:$0xff] }
 0x610   : > { %v3447_v46 = vpop.eup %3446 }
 0x611   : > { %v2243_v49 = vmul.f32 %v3447_v46, %v4933_v37  ;;  %v2244_v57 = vmul.f32 %v3447_v46, %v4935_v62 }
 0x612   : > { %v2154_v40 = vpop.xlane.xlu0 %2153 }
 0x613   : > { %3456 = vrcp.f32 %v2154_v40 }
 0x614   : > { %3458 = vrcp.f32 %v2130_v45 }
 0x615   : > { %v3449_v9 = vpop.eup %3448  ;;  %3460 = vrcp.f32 %v2127_v12  ;;  %2428 = vmatmul.mubr.bf16.gmra.mrb[96].mxu0 %v2267_v21 }
 0x616   : > { %v3451_v24 = vpop.eup %3450  ;;  %v2245_v47 = vmul.f32 %v3449_v9, %v4945_v35  ;;  %v2246_v39 = vmul.f32 %v3449_v9, %v4947_v63  ;;  %2435 = vmatprep.mubr.bf16.mxu0 %v2270_v20  ;;  %3462 = vrcp.f32 %v2136_v41  ;;  %v2269_v35 = vpack.c.bf16 %v2225_v5, %v2223_v32 }
 0x617   : > { %v3453_v50 = vpop.eup %3452  ;;  %v2230_v30 = vmul.f32 %v3451_v24, %v4905_v53  ;;  %3464 = vrcp.f32 %v4996_v28  ;;  %v2229_v18 = vmul.f32 %v3451_v24, %v4892_v6  ;;  %v5295_v6 = vld [vmem:[#allocation2_spill] sm:$0xff] }
 0x618   : > { %v2280_v1 = vpack.c.bf16 %v2246_v39, %v2244_v57  ;;  %v2279_v22 = vpack.c.bf16 %v2245_v47, %v2243_v49  ;;  %v3455_v12 = vpop.eup %3454  ;;  %v2228_v37 = vmul.f32 %v3453_v50, %v4886_v4  ;;  %v2227_v28 = vmul.f32 %v3453_v50, %v4880_v36 }
 0x619   : > { %v2248_v10 = vmul.f32 %v3455_v12, %v4957_v7  ;;  %v2247_v53 = vmul.f32 %v3455_v12, %v4955_v3  ;;  %3466 = vrcp.f32 %v2142_v0 }
 0x61a   : > { %2475 = vmatprep.mubr.bf16.mxu1 %v2280_v1  ;;  %v2272_v63 = vpack.c.bf16 %v2230_v30, %v2228_v37  ;;  %3468 = vrcp.f32 %v5002_v61  ;;  %v5299_v61 = vld [vmem:[#allocation6_spill] sm:$0xff] }
 0x61b   : > { %2476 = vmatmul.mubr.bf16.vlgmr.msra.gmra.mrb[128].mxu1 %v2279_v22 }
 0x61d   : > { %v3457_v62 = vpop.eup %3456  ;;  %2436 = vmatmul.mubr.bf16.gmra.mrb[100].mxu0 %v2269_v35 }
 0x61e   : > { %v3459_v29 = vpop.eup %3458  ;;  %v2250_v52 = vmul.f32 %v3457_v62, %v4965_v55  ;;  %v2249_v11 = vmul.f32 %v3457_v62, %v4961_v42  ;;  %2443 = vmatprep.mubr.bf16.mxu0 %v2272_v63  ;;  %v2271_v55 = vpack.c.bf16 %v2229_v18, %v2227_v28 }
 0x61f   : > { %v3461_v59 = vpop.eup %3460  ;;  %v2234_v45 = vmul.f32 %v3459_v29, %v4919_v26  ;;  %v2233_v19 = vmul.f32 %v3459_v29, %v5294_v17  ;;  %v5296_v26 = vld [vmem:[#allocation9_spill] sm:$0xff] }
 0x620   : > { %v2282_v25 = vpack.c.bf16 %v2250_v52, %v2248_v10  ;;  %v2281_v4 = vpack.c.bf16 %v2249_v11, %v2247_v53  ;;  %v2232_v7 = vmul.f32 %v3461_v59, %v4901_v16  ;;  %v3463_v3 = vpop.eup %3462  ;;  %v2231_v23 = vmul.f32 %v3461_v59, %v5296_v26 }
 0x621   : > { %v3465_v42 = vpop.eup %3464  ;;  %v2238_v44 = vmul.f32 %v3463_v3, %v5295_v6  ;;  %v2237_v14 = vmul.f32 %v3463_v3, %v5298_v56 }
 0x622   : > { %2483 = vmatprep.mubr.bf16.mxu1 %v2282_v25  ;;  %v2274_v34 = vpack.c.bf16 %v2234_v45, %v2232_v7  ;;  %v2236_v36 = vmul.f32 %v3465_v42, %v5297_v58  ;;  %v2273_v41 = vpack.c.bf16 %v2233_v19, %v2231_v23  ;;  %v2235_v31 = vmul.f32 %v3465_v42, %v5300_v13 }
 0x623   : > { %2484 = vmatmul.mubr.bf16.gmra.mrb[132].mxu1 %v2281_v4  ;;  %v3467_v16 = vpop.eup %3466 }
 0x624   : > { %v2276_v51 = vpack.c.bf16 %v2238_v44, %v2236_v36  ;;  %v3469_v48 = vpop.eup %3468  ;;  %v2242_v27 = vmul.f32 %v3467_v16, %v5299_v61  ;;  %v2275_v15 = vpack.c.bf16 %v2237_v14, %v2235_v31  ;;  %v2241_v54 = vmul.f32 %v3467_v16, %v5302_v8 }
 0x625   : > { %2444 = vmatmul.mubr.bf16.gmra.mrb[104].mxu0 %v2271_v55  ;;  %v2240_v33 = vmul.f32 %v3469_v48, %v5301_v60  ;;  %v2239_v40 = vmul.f32 %v3469_v48, %v5303_v2 }
 0x626   : > { %2451 = vmatprep.mubr.bf16.mxu0 %v2274_v34 }
 0x627   : > { %v2278_v0 = vpack.c.bf16 %v2242_v27, %v2240_v33  ;;  %v2277_v38 = vpack.c.bf16 %v2241_v54, %v2239_v40 }
 0x62d   : > { %2452 = vmatmul.mubr.bf16.gmra.mrb[108].mxu0 %v2273_v41 }
 0x62e   : > { %2459 = vmatprep.mubr.bf16.mxu0 %v2276_v51 }
 0x635   : > { %2460 = vmatmul.mubr.bf16.gmra.mrb[112].mxu0 %v2275_v15 }
 0x636   : > { %2467 = vmatprep.mubr.bf16.mxu0 %v2278_v0 }
 0x63d   : > { %2468 = vmatmul.mubr.bf16.gmra.mrb[116].mxu0 %v2277_v38 }
 0x68a   : > { %v2913_v46 = vpop.f32.mrb[64].mxu0 }
 0x68b   : > { %v2914_v43 = vpop.f32.mrb[65].mxu0 }
 0x68c   : > { %v2915_v21 = vadd.f32 %v2914_v43, %v2913_v46  ;;  %v2916_v9 = vpop.f32.mrb[66].mxu0 }
 0x68d   : > { %v2917_v20 = vpop.f32.mrb[67].mxu0 }
 0x68e   : > { %2653 = vst.msk [vmem:[%s4398_s20 + $0x100] sm:$0xff] %vm1273_vm1, %v2915_v21  ;;  %v2918_v24 = vadd.f32 %v2917_v20, %v2916_v9 }
 0x690   : > { %2654 = vst.msk [vmem:[%s4398_s20 + $0x108] sm:$0xff] %vm1273_vm1, %v2918_v24 }
 0x692   : > { %v2919_v49 = vpop.f32.mrb[68].mxu0 }
 0x693   : > { %v2920_v47 = vpop.f32.mrb[69].mxu0 }
 0x694   : > { %v2921_v57 = vadd.f32 %v2920_v47, %v2919_v49  ;;  %v2922_v39 = vpop.f32.mrb[70].mxu0 }
 0x695   : > { %v2923_v50 = vpop.f32.mrb[71].mxu0 }
 0x696   : > { %2655 = vst.msk [vmem:[%s4398_s20 + $0x110] sm:$0xff] %vm1273_vm1, %v2921_v57  ;;  %v2924_v1 = vadd.f32 %v2923_v50, %v2922_v39 }
 0x698   : > { %2656 = vst.msk [vmem:[%s4398_s20 + $0x118] sm:$0xff] %vm1273_vm1, %v2924_v1 }
 0x69a   : > { %v2925_v22 = vpop.f32.mrb[72].mxu0 }
 0x69b   : > { %v2926_v5 = vpop.f32.mrb[73].mxu0 }
 0x69c   : > { %v2927_v30 = vadd.f32 %v2926_v5, %v2925_v22  ;;  %v2928_v32 = vpop.f32.mrb[74].mxu0 }
 0x69d   : > { %v2929_v12 = vpop.f32.mrb[75].mxu0 }
 0x69e   : > { %2657 = vst.msk [vmem:[%s4398_s20 + $0x120] sm:$0xff] %vm1273_vm1, %v2927_v30  ;;  %v2930_v37 = vadd.f32 %v2929_v12, %v2928_v32 }
 0x6a0   : > { %2658 = vst.msk [vmem:[%s4398_s20 + $0x128] sm:$0xff] %vm1273_vm1, %v2930_v37 }
 0x6a2   : > { %v2931_v35 = vpop.f32.mrb[76].mxu0 }
 0x6a3   : > { %v2932_v62 = vpop.f32.mrb[77].mxu0 }
 0x6a4   : > { %v2933_v63 = vadd.f32 %v2932_v62, %v2931_v35  ;;  %v2934_v29 = vpop.f32.mrb[78].mxu0 }
 0x6a5   : > { %v2935_v10 = vpop.f32.mrb[79].mxu0 }
 0x6a6   : > { %2659 = vst.msk [vmem:[%s4398_s20 + $0x130] sm:$0xff] %vm1273_vm1, %v2933_v63  ;;  %v2936_v52 = vadd.f32 %v2935_v10, %v2934_v29 }
 0x6a8   : > { %2660 = vst.msk [vmem:[%s4398_s20 + $0x138] sm:$0xff] %vm1273_vm1, %v2936_v52 }
 0x6c8   : > { %v2937_v53 = vpop.f32.mrb[80].mxu0 }
 0x6c9   : > { %v2938_v11 = vpop.f32.mrb[81].mxu0 }
 0x6ca   : > { %v2939_v59 = vadd.f32 %v2938_v11, %v2937_v53  ;;  %v2940_v25 = vpop.f32.mrb[82].mxu0 }
 0x6cb   : > { %v2941_v4 = vpop.f32.mrb[83].mxu0 }
 0x6cc   : > { %2661 = vst.msk [vmem:[%s4398_s20 + $0x140] sm:$0xff] %vm1273_vm1, %v2939_v59  ;;  %v2942_v18 = vadd.f32 %v2941_v4, %v2940_v25 }
 0x6ce   : > { %2662 = vst.msk [vmem:[%s4398_s20 + $0x148] sm:$0xff] %vm1273_vm1, %v2942_v18 }
 0x6d0   : > { %v2943_v45 = vpop.f32.mrb[84].mxu0 }
 0x6d1   : > { %v2944_v28 = vpop.f32.mrb[85].mxu0 }
 0x6d2   : > { %v2945_v7 = vadd.f32 %v2944_v28, %v2943_v45  ;;  %v2946_v55 = vpop.f32.mrb[86].mxu0 }
 0x6d3   : > { %v2947_v34 = vpop.f32.mrb[87].mxu0 }
 0x6d4   : > { %2663 = vst.msk [vmem:[%s4398_s20 + $0x150] sm:$0xff] %vm1273_vm1, %v2945_v7  ;;  %v2948_v3 = vadd.f32 %v2947_v34, %v2946_v55 }
 0x6d6   : > { %2664 = vst.msk [vmem:[%s4398_s20 + $0x158] sm:$0xff] %vm1273_vm1, %v2948_v3 }
 0x6d8   : > { %v2949_v42 = vpop.f32.mrb[88].mxu0 }
 0x6d9   : > { %v2950_v17 = vpop.f32.mrb[89].mxu0 }
 0x6da   : > { %v2951_v19 = vadd.f32 %v2950_v17, %v2949_v42  ;;  %v2952_v6 = vpop.f32.mrb[90].mxu0 }
 0x6db   : > { %v2953_v44 = vpop.f32.mrb[91].mxu0 }
 0x6dc   : > { %2665 = vst.msk [vmem:[%s4398_s20 + $0x160] sm:$0xff] %vm1273_vm1, %v2951_v19  ;;  %v2954_v26 = vadd.f32 %v2953_v44, %v2952_v6 }
 0x6de   : > { %2666 = vst.msk [vmem:[%s4398_s20 + $0x168] sm:$0xff] %vm1273_vm1, %v2954_v26 }
 0x6e0   : > { %v2955_v23 = vpop.f32.mrb[92].mxu0 }
 0x6e1   : > { %v2956_v58 = vpop.f32.mrb[93].mxu0 }
 0x6e2   : > { %v2957_v36 = vadd.f32 %v2956_v58, %v2955_v23  ;;  %v2958_v41 = vpop.f32.mrb[94].mxu0 }
 0x6e3   : > { %v2959_v51 = vpop.f32.mrb[95].mxu0 }
 0x6e4   : > { %2667 = vst.msk [vmem:[%s4398_s20 + $0x170] sm:$0xff] %vm1273_vm1, %v2957_v36  ;;  %v2960_v16 = vadd.f32 %v2959_v51, %v2958_v41 }
 0x6e6   : > { %2668 = vst.msk [vmem:[%s4398_s20 + $0x178] sm:$0xff] %vm1273_vm1, %v2960_v16 }
 0x6e8   : > { %v2961_v48 = vpop.f32.mrb[96].mxu0 }
 0x6e9   : > { %v2962_v56 = vpop.f32.mrb[97].mxu0 }
 0x6ea   : > { %v2963_v14 = vadd.f32 %v2962_v56, %v2961_v48  ;;  %v2964_v61 = vpop.f32.mrb[98].mxu0 }
 0x6eb   : > { %v2965_v27 = vpop.f32.mrb[99].mxu0 }
 0x6ec   : > { %2669 = vst.msk [vmem:[%s4398_s20 + $0x180] sm:$0xff] %vm1273_vm1, %v2963_v14  ;;  %v2966_v13 = vadd.f32 %v2965_v27, %v2964_v61 }
 0x6ee   : > { %v2997_v31 = vpop.f32.mrb[128].mxu1  ;;  %2670 = vst.msk [vmem:[%s4398_s20 + $0x188] sm:$0xff] %vm1273_vm1, %v2966_v13 }
 0x6ef   : > { %v2998_v60 = vpop.f32.mrb[129].mxu1 }
 0x6f0   : > { %v2999_v33 = vadd.f32 %v2998_v60, %v2997_v31  ;;  %v3000_v15 = vpop.f32.mrb[130].mxu1  ;;  %v2967_v0 = vpop.f32.mrb[100].mxu0 }
 0x6f1   : > { %v3001_v8 = vpop.f32.mrb[131].mxu1  ;;  %v2968_v54 = vpop.f32.mrb[101].mxu0 }
 0x6f2   : > { %2681 = vst.msk [vmem:[%s4398_s20 + $0x1e0] sm:$0xff] %vm1273_vm1, %v2999_v33  ;;  %v3002_v2 = vadd.f32 %v3001_v8, %v3000_v15  ;;  %v2969_v40 = vadd.f32 %v2968_v54, %v2967_v0  ;;  %v2970_v38 = vpop.f32.mrb[102].mxu0 }
 0x6f3   : > { %v2971_v46 = vpop.f32.mrb[103].mxu0 }
 0x6f4   : > { %2682 = vst.msk [vmem:[%s4398_s20 + $0x1e8] sm:$0xff] %vm1273_vm1, %v3002_v2  ;;  %2671 = vst.msk [vmem:[%s4398_s20 + $0x190] sm:$0xff] %vm1273_vm1, %v2969_v40  ;;  %v2972_v43 = vadd.f32 %v2971_v46, %v2970_v38 }
 0x6f6   : > { %v3003_v21 = vpop.f32.mrb[132].mxu1  ;;  %2672 = vst.msk [vmem:[%s4398_s20 + $0x198] sm:$0xff] %vm1273_vm1, %v2972_v43 }
 0x6f7   : > { %v3004_v9 = vpop.f32.mrb[133].mxu1 }
 0x6f8   : > { %v3005_v20 = vadd.f32 %v3004_v9, %v3003_v21  ;;  %v3006_v24 = vpop.f32.mrb[134].mxu1  ;;  %v2973_v49 = vpop.f32.mrb[104].mxu0 }
 0x6f9   : > { %v3007_v47 = vpop.f32.mrb[135].mxu1  ;;  %v2974_v57 = vpop.f32.mrb[105].mxu0 }
 0x6fa   : > { %2683 = vst.msk [vmem:[%s4398_s20 + $0x1f0] sm:$0xff] %vm1273_vm1, %v3005_v20  ;;  %v3008_v39 = vadd.f32 %v3007_v47, %v3006_v24  ;;  %v2975_v50 = vadd.f32 %v2974_v57, %v2973_v49  ;;  %v2976_v1 = vpop.f32.mrb[106].mxu0 }
 0x6fb   : > { %v2977_v22 = vpop.f32.mrb[107].mxu0 }
 0x6fc   : > { %2684 = vst.msk [vmem:[%s4398_s20 + $0x1f8] sm:$0xff] %vm1273_vm1, %v3008_v39  ;;  %2673 = vst.msk [vmem:[%s4398_s20 + $0x1a0] sm:$0xff] %vm1273_vm1, %v2975_v50  ;;  %v2978_v5 = vadd.f32 %v2977_v22, %v2976_v1 }
 0x6fe   : > { %2674 = vst.msk [vmem:[%s4398_s20 + $0x1a8] sm:$0xff] %vm1273_vm1, %v2978_v5 }
 0x700   : > { %v2979_v30 = vpop.f32.mrb[108].mxu0 }
 0x701   : > { %v2980_v32 = vpop.f32.mrb[109].mxu0 }
 0x702   : > { %v2981_v12 = vadd.f32 %v2980_v32, %v2979_v30  ;;  %v2982_v37 = vpop.f32.mrb[110].mxu0 }
 0x703   : > { %v2983_v35 = vpop.f32.mrb[111].mxu0 }
 0x704   : > { %2675 = vst.msk [vmem:[%s4398_s20 + $0x1b0] sm:$0xff] %vm1273_vm1, %v2981_v12  ;;  %v2984_v62 = vadd.f32 %v2983_v35, %v2982_v37 }
 0x706   : > { %2676 = vst.msk [vmem:[%s4398_s20 + $0x1b8] sm:$0xff] %vm1273_vm1, %v2984_v62 }
 0x708   : > { %v2985_v63 = vpop.f32.mrb[112].mxu0 }
 0x709   : > { %v2986_v29 = vpop.f32.mrb[113].mxu0 }
 0x70a   : > { %v2987_v10 = vadd.f32 %v2986_v29, %v2985_v63  ;;  %v2988_v52 = vpop.f32.mrb[114].mxu0 }
 0x70b   : > { %v2989_v53 = vpop.f32.mrb[115].mxu0 }
 0x70c   : > { %2677 = vst.msk [vmem:[%s4398_s20 + $0x1c0] sm:$0xff] %vm1273_vm1, %v2987_v10  ;;  %v2990_v11 = vadd.f32 %v2989_v53, %v2988_v52 }
 0x70e   : > { %2678 = vst.msk [vmem:[%s4398_s20 + $0x1c8] sm:$0xff] %vm1273_vm1, %v2990_v11 }
 0x710   : > { %v2991_v59 = vpop.f32.mrb[116].mxu0 }
 0x711   : > { %v2992_v25 = vpop.f32.mrb[117].mxu0 }
 0x712   : > { %v2993_v4 = vadd.f32 %v2992_v25, %v2991_v59  ;;  %v2994_v18 = vpop.f32.mrb[118].mxu0 }
 0x713   : > { %v2995_v45 = vpop.f32.mrb[119].mxu0 }
 0x714   : > { %2679 = vst.msk [vmem:[%s4398_s20 + $0x1d0] sm:$0xff] %vm1273_vm1, %v2993_v4  ;;  %v2996_v28 = vadd.f32 %v2995_v45, %v2994_v18 }
 0x716   : > { %2680 = vst.msk [vmem:[%s4398_s20 + $0x1d8] sm:$0xff] %vm1273_vm1, %v2996_v28 }
 0x717 PF: > { %s11_s6 = sadd.s32 1, %s3490_s6  }
 0x718   : > { %p8_p4 = scmp.ge.s32.totalorder %s11_s6, 4  }
 0x71a   :  { %10 = sbr.rel (!%p8_p4) target bundleno = 1 (0x1), region = 55 }

// kernel: attentive_conv_forward.5
= control target key start
LH: loop header
LB: loop body
LE: loop exit
PB: predicated region body
PF: predicated region fallthrough
CT: control target
= control target key end

     0   :  { %s379_s12 = smov 0   ;;  %s402_s0 = inlined_call_operand.vmem [shape: f32[2,4,256], index: 0, kind: input, shape index: {}]   ;;  %s403_s1 = inlined_call_operand.vmem [shape: f32[4,4], index: 1, kind: input, shape index: {}]   ;;  %s404_s2 = inlined_call_operand.vmem [shape: f32[4,1], index: 2, kind: input, shape index: {}]   ;;  %s405_s3 = inlined_call_operand.vmem [shape: f32[2,4,256], index: 3, kind: output, shape index: {}]  }
   0x1 LB: > { %s321_s13 = sadd.s32 4294967295, %s355_s12   ;;  %p325_p0 = scmp.ge.s32.totalorder %s355_s12, 1  ;;  %s355_s12 = sphi %s379_s12, %s13_s12  }
   0x2   : > { %p137_p1 = scmp.lt.s32.totalorder %s355_s12, 3 }
   0x4   : > { %p138_p2 = pnand %p325_p0, %p137_p1 }
   0x5   : > { %p161_p3 = scmp.lt.s32.totalorder (!%p138_p2), %s321_s13, 1  ;;  %v357_v0 = vmov (!%p138_p2), 0.0   ;;  %v173_v1 = vld [vmem:[%s404_s2] sm:$0xf] (!%p138_p2)  ;;  %v358_v2 = vmov (!%p138_p2), 0   ;;  %vm185_vm0 = vcmask (!%p138_p2), 1043456  }
   0x6   : > { %141 = sbr.rel (%p138_p2) target bundleno = 239 (0xef), region = 32  ;;  %254 = vmatprep.mubr.f32.mxu0 (!%p138_p2), %v357_v0  ;;  %347 = vset.pattern.permute.xlu0 (!%p138_p2), %v358_v2  ;;  %v171_v5 = vld [vmem:[%s403_s1] sm:$0xf] (!%p138_p2)  ;;  %vm181_vm1 = vcmask (!%p138_p2), 31744  }
   0x7   : > { %176 = vperm.xlu0 (!%p138_p2), %347, %v173_v1  }
   0xd   : > { %s407_s13 = smov (!%p161_p3, %s321_s13), 1 }
   0xe   : > { %s335_s16 = sshll.u32 %s407_s13, 3 }
   0xf   : > { %s165_s19 = scalar_lea.vmem %s402_s0, %s335_s16  ;;  %s170_s24 = scalar_lea.vmem %s405_s3, %s335_s16 }
  0x10   : > { %v172_v3 = vld [vmem:[%s165_s19] sm:$0xff] }
  0x11   : > { %v180_v4 = vcombine.high %v172_v3, %v172_v3 }
  0x13   : > { %330 = vmatprep.subr.msk.mxu0 %vm185_vm0, %v180_v4 }
  0x14   : > { %331 = vmatpush1.msk.msra.mxu0 %vm185_vm0, %v172_v3 }
  0x15   : > { %332 = vmatmul.mubr.msk.f32.vlgmr.msra.gmra.mrb[0].mxu0 %vm181_vm1, %v171_v5 }
  0x86   : > { %v177_v6 = vpop.permute.xlu0 %176 }
  0xe8   : > { %v256_v7 = vpop.f32.mrb[0].mxu0 }
  0xe9   : > { %v257_v8 = vadd.f32 %v256_v7, %v177_v6  ;;  %v258_v9 = vpop.f32.mrb[1].mxu0 }
  0xea   : > { %v259_v10 = vadd.f32 %v258_v9, %v177_v6 }
  0xec   : > { %v263_v11 = vcombine.low %v257_v8, %v259_v10 }
  0xee   : > { %265 = vst [vmem:[%s170_s24] sm:$0xff] %v263_v11 }
  0xef PF: > { %s13_s12 = sadd.s32 1, %s355_s12  }
  0xf0   : > { %p10_p4 = scmp.ge.s32.totalorder %s13_s12, 4  }
  0xf2   :  { %12 = sbr.rel (!%p10_p4) target bundleno = 1 (0x1), region = 62 }

</bundles_post_ra>
